<compile_context>
chip_gen: v7x
topology: tpu7x:2x2x1
jax: 0.10.0
libtpu: 0.0.40
codegen_flags: <defaults>
</compile_context>

<pallas_src>
import jax
import jax.numpy as jnp
import numpy as np
from jax.experimental import pallas as pl
from jax.experimental.pallas import tpu as pltpu

# Model dims (fixed by the module definition).
D_IN = 75160            # fc1 in_features
H1 = 100                # fc1/fc2 out_features
C = 3264                # fc3 out_features (softmax classes)

# Lane-aligned padded reduction dim and K tile for the big fc1 matmul.
D_PAD = 75264           # 588 * 128  (zero-padded; exactness preserved)
TK = 12544              # 98 * 128
NK = D_PAD // TK        # 6 grid steps


def _mlp_kernel(x_ref, w1_ref, b1_ref, w2_ref, b2_ref, w3_ref, b3_ref,
                o_ref, acc_ref):
    """Grid axis 0 iterates over K-chunks of the fc1 reduction.

    fc1 partials (bf16 inputs, f32 accumulation) go into a VMEM scratch; on
    the last K-step the tiny fc2 / fc3 / softmax tail runs and the softmax
    probabilities are written out.
    """
    k = pl.program_id(0)

    @pl.when(k == 0)
    def _():
        acc_ref[...] = jnp.zeros_like(acc_ref)

    # fc1 partial product for this K-chunk: (B, TK)bf16 @ (TK, H1)bf16 -> f32
    acc_ref[...] += jnp.dot(x_ref[...], w1_ref[...],
                            preferred_element_type=jnp.float32)

    @pl.when(k == pl.num_programs(0) - 1)
    def _():
        # fc1 bias + relu (f32)
        h1 = jnp.maximum(acc_ref[...] + b1_ref[...], 0.0)
        # fc2 + relu
        h2 = jnp.dot(h1, w2_ref[...], preferred_element_type=jnp.float32)
        h2 = jnp.maximum(h2 + b2_ref[...], 0.0)
        # fc3 logits
        logits = jnp.dot(h2, w3_ref[...], preferred_element_type=jnp.float32)
        logits = logits + b3_ref[...]
        # softmax over dim=1 (last axis here), numerically stable
        m = jnp.max(logits, axis=-1, keepdims=True)
        e = jnp.exp(logits - m)
        denom = jnp.sum(e, axis=-1, keepdims=True)
        o_ref[...] = (e / denom).astype(o_ref.dtype)


def prepare_params(params):
    """One-time prep: pad W1 rows to D_PAD and cast it to bf16; rest stays f32."""
    w1, b1, w2, b2, w3, b3 = params
    w1p = jnp.pad(w1, ((0, D_PAD - D_IN), (0, 0))).astype(jnp.bfloat16)
    return w1p, b1, w2, b2, w3, b3


@jax.jit
def drug_recommendation_forward(x, prepared_params):
    """x: (B, 75160) float32 -> (B, 3264) float32 (softmax probabilities)."""
    w1p, b1, w2, b2, w3, b3 = prepared_params
    B = x.shape[0]

    # Zero-pad x to the lane-aligned reduction length and cast to bf16 for the
    # fc1 MXU matmul (f32 accumulation happens in the kernel scratch).
    xp = jnp.pad(x, ((0, 0), (0, D_PAD - D_IN))).astype(jnp.bfloat16)

    grid_spec = pltpu.PrefetchScalarGridSpec(
        num_scalar_prefetch=0,
        grid=(NK,),
        in_specs=[
            pl.BlockSpec((B, TK), lambda k: (0, k)),     # x: stream K-chunks (bf16)
            pl.BlockSpec((TK, H1), lambda k: (k, 0)),    # W1: stream K-chunks (bf16)
            pl.BlockSpec((1, H1), lambda k: (0, 0)),     # b1: resident (f32)
            pl.BlockSpec((H1, H1), lambda k: (0, 0)),    # W2: resident (f32)
            pl.BlockSpec((1, H1), lambda k: (0, 0)),     # b2: resident (f32)
            pl.BlockSpec((H1, C), lambda k: (0, 0)),     # W3: resident (f32)
            pl.BlockSpec((1, C), lambda k: (0, 0)),      # b3: resident (f32)
        ],
        out_specs=pl.BlockSpec((B, C), lambda k: (0, 0)),
        scratch_shapes=[pltpu.VMEM((B, H1), jnp.float32)],
    )

    # Advisory cost: dominated by the W1/x bf16 HBM stream.
    flops = 2 * B * D_PAD * H1 + 2 * B * H1 * H1 + 2 * B * H1 * C
    transcendentals = B * C
    bytes_accessed = (B * D_PAD * 2 + D_PAD * H1 * 2                 # bf16 x, W1
                      + (H1 + H1 * H1 + H1 + H1 * C + C) * 4         # f32 biases/W2/W3
                      + B * C * 4)                                   # f32 output
    cost = pl.CostEstimate(flops=flops,
                           transcendentals=transcendentals,
                           bytes_accessed=bytes_accessed)

    return pl.pallas_call(
        _mlp_kernel,
        out_shape=jax.ShapeDtypeStruct((B, C), jnp.float32),
        grid_spec=grid_spec,
        compiler_params=pltpu.CompilerParams(
            dimension_semantics=("arbitrary",),   # K is a reduction axis
            vmem_limit_bytes=32 << 20,            # fits v7x's 64 MiB VMEM with headroom
        ),
        cost_estimate=cost,
    )(xp, w1p, b1, w2, b2, w3, b3)


def init_params(key):
    """Deterministic params mimicking nn.Linear's U(-1/sqrt(fan_in), +) init.

    Weights are stored as (in_features, out_features) -- transposed relative
    to PyTorch's (out, in) -- so the kernel does x @ W directly.
    """
    k1, k2, k3, k4, k5, k6 = jax.random.split(key, 6)

    def unif(k, shape, fan_in):
        bound = 1.0 / np.sqrt(fan_in)
        return jax.random.uniform(k, shape, jnp.float32, -bound, bound)

    w1 = unif(k1, (D_IN, H1), D_IN)
    b1 = unif(k2, (1, H1), D_IN)
    w2 = unif(k3, (H1, H1), H1)
    b2 = unif(k4, (1, H1), H1)
    w3 = unif(k5, (H1, C), H1)
    b3 = unif(k6, (1, C), H1)
    return w1, b1, w2, b2, w3, b3


def reference_forward(x, params):
    """Pure-JAX reference. fc1 inputs are rounded to bf16 to match the kernel's
    reduced-precision fc1 operands (accumulation stays f32)."""
    w1, b1, w2, b2, w3, b3 = params
    xb = x.astype(jnp.bfloat16).astype(jnp.float32)
    w1b = w1.astype(jnp.bfloat16).astype(jnp.float32)
    h1 = jnp.maximum(xb @ w1b + b1, 0.0)
    h2 = jnp.maximum(h1 @ w2 + b2, 0.0)
    logits = h2 @ w3 + b3
    return jax.nn.softmax(logits, axis=1)


if __name__ == "__main__":
    key = jax.random.PRNGKey(0)
    kx, kp = jax.random.split(key)

    B = 2
    x = jax.random.normal(kx, (B, D_IN), jnp.float32)
    params = init_params(kp)
    prepared = prepare_params(params)

    out = drug_recommendation_forward(x, prepared)
    out = jax.block_until_ready(out)

    ref = reference_forward(x, params)
    assert out.shape == (B, C)
    assert bool(jnp.allclose(out, ref, atol=1e-4, rtol=1e-4))
    # probabilities should sum to 1 per row
    assert bool(jnp.allclose(jnp.sum(out, axis=1), 1.0, atol=1e-4))

    print("KERNEL_OK")
</pallas_src>

<mosaic_0001>
module attributes {stable_mosaic.version = 11 : i64} {
  func.func @_mlp_kernel(%arg0: i32, %arg1: memref<2x12544xbf16, #tpu.memory_space<vmem>>, %arg2: memref<12544x100xbf16, #tpu.memory_space<vmem>>, %arg3: memref<1x100xf32, #tpu.memory_space<vmem>>, %arg4: memref<100x100xf32, #tpu.memory_space<vmem>>, %arg5: memref<1x100xf32, #tpu.memory_space<vmem>>, %arg6: memref<100x3264xf32, #tpu.memory_space<vmem>>, %arg7: memref<1x3264xf32, #tpu.memory_space<vmem>>, %arg8: memref<2x3264xf32, #tpu.memory_space<vmem>>, %arg9: memref<2x100xf32, #tpu.memory_space<vmem>>) attributes {dimension_semantics = [#tpu.dimension_semantics<arbitrary>], iteration_bounds = array<i64: 6>, scalar_prefetch = 0 : i64, scratch_operands = 1 : i64, tpu.core_type = #tpu.core_type<tc>, window_params = [{transform_indices = @transform_0, window_bounds = array<i64: 2, 12544>}, {transform_indices = @transform_1, window_bounds = array<i64: 12544, 100>}, {pipeline_mode = #tpu.pipeline_mode<synchronous>, transform_indices = @transform_2, window_bounds = array<i64: 1, 100>}, {pipeline_mode = #tpu.pipeline_mode<synchronous>, transform_indices = @transform_3, window_bounds = array<i64: 100, 100>}, {pipeline_mode = #tpu.pipeline_mode<synchronous>, transform_indices = @transform_4, window_bounds = array<i64: 1, 100>}, {pipeline_mode = #tpu.pipeline_mode<synchronous>, transform_indices = @transform_5, window_bounds = array<i64: 100, 3264>}, {pipeline_mode = #tpu.pipeline_mode<synchronous>, transform_indices = @transform_6, window_bounds = array<i64: 1, 3264>}, {pipeline_mode = #tpu.pipeline_mode<synchronous>, transform_indices = @transform_7, window_bounds = array<i64: 2, 3264>}]} {
    %c0_i32 = arith.constant 0 : i32
    %0 = arith.cmpi eq, %arg0, %c0_i32 : i32
    %1 = arith.extui %0 : i1 to i32
    %c0_i32_0 = arith.constant 0 : i32
    %2 = arith.cmpi ne, %1, %c0_i32_0 : i32
    scf.if %2 {
      %cst_9 = arith.constant 0.000000e+00 : f32
      %12 = vector.broadcast %cst_9 : f32 to vector<2x100xf32>
      %c0_10 = arith.constant 0 : index
      %c0_11 = arith.constant 0 : index
      %13 = vector.load %arg9[%c0_10, %c0_11] : memref<2x100xf32, #tpu.memory_space<vmem>>, vector<2x100xf32>
      tpu.vector_store %arg9[%c0_10, %c0_11], %12 {strides = array<i32>} : memref<2x100xf32, #tpu.memory_space<vmem>>, vector<2x100xf32>,
    } else {
    }
    %c0 = arith.constant 0 : index
    %c0_1 = arith.constant 0 : index
    %3 = vector.load %arg9[%c0, %c0_1] : memref<2x100xf32, #tpu.memory_space<vmem>>, vector<2x100xf32>
    %c0_2 = arith.constant 0 : index
    %c0_3 = arith.constant 0 : index
    %4 = vector.load %arg1[%c0_2, %c0_3] : memref<2x12544xbf16, #tpu.memory_space<vmem>>, vector<2x12544xbf16>
    %c0_4 = arith.constant 0 : index
    %c0_5 = arith.constant 0 : index
    %5 = vector.load %arg2[%c0_4, %c0_5] : memref<12544x100xbf16, #tpu.memory_space<vmem>>, vector<12544x100xbf16>
    %cst = arith.constant dense<0.000000e+00> : vector<2x100xf32>
    %6 = tpu.matmul %4, %5, %cst {dimension_numbers = #tpu.dot_dimension_numbers<[1], [0], [0], [1], [0, 0, 1, 1], [], []>} : vector<2x12544xbf16>, vector<12544x100xbf16>, vector<2x100xf32> -> vector<2x100xf32>
    %7 = arith.addf %3, %6 : vector<2x100xf32>
    %c0_6 = arith.constant 0 : index
    %c0_7 = arith.constant 0 : index
    %8 = vector.load %arg9[%c0_6, %c0_7] : memref<2x100xf32, #tpu.memory_space<vmem>>, vector<2x100xf32>
    tpu.vector_store %arg9[%c0_6, %c0_7], %7 {strides = array<i32>} : memref<2x100xf32, #tpu.memory_space<vmem>>, vector<2x100xf32>,
    %c5_i32 = arith.constant 5 : i32
    %9 = arith.cmpi eq, %arg0, %c5_i32 : i32
    %10 = arith.extui %9 : i1 to i32
    %c0_i32_8 = arith.constant 0 : i32
    %11 = arith.cmpi ne, %10, %c0_i32_8 : i32
    scf.if %11 {
      %c0_9 = arith.constant 0 : index
      %c0_10 = arith.constant 0 : index
      %12 = vector.load %arg9[%c0_9, %c0_10] : memref<2x100xf32, #tpu.memory_space<vmem>>, vector<2x100xf32>
      %c0_11 = arith.constant 0 : index
      %c0_12 = arith.constant 0 : index
      %13 = vector.load %arg3[%c0_11, %c0_12] : memref<1x100xf32, #tpu.memory_space<vmem>>, vector<1x100xf32>
      %14 = vector.broadcast %13 : vector<1x100xf32> to vector<2x100xf32>
      %15 = arith.addf %12, %14 : vector<2x100xf32>
      %cst_13 = arith.constant 0.000000e+00 : f32
      %16 = vector.broadcast %cst_13 : f32 to vector<2x100xf32>
      %17 = arith.maximumf %15, %16 : vector<2x100xf32>
      %c0_14 = arith.constant 0 : index
      %c0_15 = arith.constant 0 : index
      %18 = vector.load %arg4[%c0_14, %c0_15] : memref<100x100xf32, #tpu.memory_space<vmem>>, vector<100x100xf32>
      %cst_16 = arith.constant dense<0.000000e+00> : vector<2x100xf32>
      %19 = tpu.matmul %17, %18, %cst_16 {dimension_numbers = #tpu.dot_dimension_numbers<[1], [0], [0], [1], [0, 0, 1, 1], [], []>} : vector<2x100xf32>, vector<100x100xf32>, vector<2x100xf32> -> vector<2x100xf32>
      %c0_17 = arith.constant 0 : index
      %c0_18 = arith.constant 0 : index
      %20 = vector.load %arg5[%c0_17, %c0_18] : memref<1x100xf32, #tpu.memory_space<vmem>>, vector<1x100xf32>
      %21 = vector.broadcast %20 : vector<1x100xf32> to vector<2x100xf32>
      %22 = arith.addf %19, %21 : vector<2x100xf32>
      %cst_19 = arith.constant 0.000000e+00 : f32
      %23 = vector.broadcast %cst_19 : f32 to vector<2x100xf32>
      %24 = arith.maximumf %22, %23 : vector<2x100xf32>
      %c0_20 = arith.constant 0 : index
      %c0_21 = arith.constant 0 : index
      %25 = vector.load %arg6[%c0_20, %c0_21] : memref<100x3264xf32, #tpu.memory_space<vmem>>, vector<100x3264xf32>
      %cst_22 = arith.constant dense<0.000000e+00> : vector<2x3264xf32>
      %26 = tpu.matmul %24, %25, %cst_22 {dimension_numbers = #tpu.dot_dimension_numbers<[1], [0], [0], [1], [0, 0, 1, 1], [], []>} : vector<2x100xf32>, vector<100x3264xf32>, vector<2x3264xf32> -> vector<2x3264xf32>
      %c0_23 = arith.constant 0 : index
      %c0_24 = arith.constant 0 : index
      %27 = vector.load %arg7[%c0_23, %c0_24] : memref<1x3264xf32, #tpu.memory_space<vmem>>, vector<1x3264xf32>
      %28 = vector.broadcast %27 : vector<1x3264xf32> to vector<2x3264xf32>
      %29 = arith.addf %26, %28 : vector<2x3264xf32>
      %cst_25 = arith.constant dense<0xFF800000> : vector<2xf32>
      %30 = vector.multi_reduction <maximumf>, %29, %cst_25 [1] : vector<2x3264xf32> to vector<2xf32>
      %31 = vector.shape_cast %30 : vector<2xf32> to vector<2x1xf32>
      %32 = vector.broadcast %31 : vector<2x1xf32> to vector<2x3264xf32>
      %33 = arith.subf %29, %32 : vector<2x3264xf32>
      %34 = math.exp %33 : vector<2x3264xf32>
      %cst_26 = arith.constant dense<0.000000e+00> : vector<2xf32>
      %35 = vector.multi_reduction <add>, %34, %cst_26 [1] : vector<2x3264xf32> to vector<2xf32>
      %36 = vector.shape_cast %35 : vector<2xf32> to vector<2x1xf32>
      %37 = vector.broadcast %36 : vector<2x1xf32> to vector<2x3264xf32>
      %38 = arith.divf %34, %37 : vector<2x3264xf32>
      %c0_27 = arith.constant 0 : index
      %c0_28 = arith.constant 0 : index
      %39 = vector.load %arg8[%c0_27, %c0_28] : memref<2x3264xf32, #tpu.memory_space<vmem>>, vector<2x3264xf32>
      tpu.vector_store %arg8[%c0_27, %c0_28], %38 {strides = array<i32>} : memref<2x3264xf32, #tpu.memory_space<vmem>>, vector<2x3264xf32>,
    } else {
    }
    return
  }
  func.func @transform_0(%arg0: i32) -> (i32, i32) {
    %c0_i32 = arith.constant 0 : i32
    %c0_i32_0 = arith.constant 0 : i32
    return %c0_i32, %arg0 : i32, i32
  }
  func.func @transform_1(%arg0: i32) -> (i32, i32) {
    %c0_i32 = arith.constant 0 : i32
    %c0_i32_0 = arith.constant 0 : i32
    return %arg0, %c0_i32 : i32, i32
  }
  func.func @transform_2(%arg0: i32) -> (i32, i32) {
    %c0_i32 = arith.constant 0 : i32
    %c0_i32_0 = arith.constant 0 : i32
    %c0_i32_1 = arith.constant 0 : i32
    return %c0_i32, %c0_i32_0 : i32, i32
  }
  func.func @transform_3(%arg0: i32) -> (i32, i32) {
    %c0_i32 = arith.constant 0 : i32
    %c0_i32_0 = arith.constant 0 : i32
    %c0_i32_1 = arith.constant 0 : i32
    return %c0_i32, %c0_i32_0 : i32, i32
  }
  func.func @transform_4(%arg0: i32) -> (i32, i32) {
    %c0_i32 = arith.constant 0 : i32
    %c0_i32_0 = arith.constant 0 : i32
    %c0_i32_1 = arith.constant 0 : i32
    return %c0_i32, %c0_i32_0 : i32, i32
  }
  func.func @transform_5(%arg0: i32) -> (i32, i32) {
    %c0_i32 = arith.constant 0 : i32
    %c0_i32_0 = arith.constant 0 : i32
    %c0_i32_1 = arith.constant 0 : i32
    return %c0_i32, %c0_i32_0 : i32, i32
  }
  func.func @transform_6(%arg0: i32) -> (i32, i32) {
    %c0_i32 = arith.constant 0 : i32
    %c0_i32_0 = arith.constant 0 : i32
    %c0_i32_1 = arith.constant 0 : i32
    return %c0_i32, %c0_i32_0 : i32, i32
  }
  func.func @transform_7(%arg0: i32) -> (i32, i32) {
    %c0_i32 = arith.constant 0 : i32
    %c0_i32_0 = arith.constant 0 : i32
    %c0_i32_1 = arith.constant 0 : i32
    return %c0_i32, %c0_i32_0 : i32, i32
  }
}

</mosaic_0001>

<bundles_post_ra>
// kernel: drug_recommendation_forward.1
= control target key start
LH: loop header
LB: loop body
LE: loop exit
PB: predicated region body
PF: predicated region fallthrough
CT: control target
= control target key end

     0   :  { %12 = vsyncpa [#allocation4], 0  ;;  %s14522_s24 = smov 0   ;;  %s17064_s0 = inlined_call_operand.vmem [shape: bf16[2,75264], index: 0, kind: input, shape index: {}]   ;;  %s17065_s1 = inlined_call_operand.vmem [shape: bf16[75264,100], index: 1, kind: input, shape index: {}]   ;;  %s17066_s2 = inlined_call_operand.vmem [shape: f32[1,100], index: 2, kind: input, shape index: {}]   ;;  %s17067_s3 = inlined_call_operand.vmem [shape: f32[100,100], index: 3, kind: input, shape index: {}]   ;;  %s17068_s4 = inlined_call_operand.vmem [shape: f32[1,100], index: 4, kind: input, shape index: {}]   ;;  %s17069_s5 = inlined_call_operand.vmem [shape: f32[100,3264], index: 5, kind: input, shape index: {}]   ;;  %s17070_s6 = inlined_call_operand.vmem [shape: f32[1,3264], index: 6, kind: input, shape index: {}]   ;;  %s17071_s7 = inlined_call_operand.hbm [shape: f32[2,3264], index: 7, kind: output, shape index: {}]  }
   0x1 LB: > { %s14528_s25 = sadd.s32 4294967295, %s14473_s24   ;;  %p11279_p0 = scmp.ge.s32.totalorder %s14473_s24, 1  ;;  %s14473_s24 = sphi %s14522_s24, %s18_s24  }
   0x2   : > { %p244_p1 = scmp.lt.s32.totalorder %s14473_s24, 7 }
   0x4   : > { %p245_p2 = pnand %p11279_p0, %p244_p1 }
   0x5   : > { %s275_s26 = smul.u32 (!%p245_p2), 98, %s14528_s25  ;;  %p11281_p5 = scmp.ne.s32.totalorder (!%p245_p2), %s14528_s25, 0 }
   0x6   : > { %248 = sbr.rel (%p245_p2) target bundleno = 2060 (0x80c), region = 48 }
   0x7   : > { %s280_s27 = smul.u32 (!%p245_p2), 1568, %s14528_s25  ;;  %p276_p3 = scmp.lt.s32.totalorder (!%p245_p2), %s275_s26, 587 }
   0x9   : > { %p281_p4 = scmp.lt.s32.totalorder (!%p245_p2), %s280_s27, 9407 }
   0xd   : > { %s17073_s26 = smov (!%p276_p3, %s275_s26), 587  ;;  %s17075_s27 = smov (!%p281_p4, %s280_s27), 9407 }
   0xe   : > { %s14537_s30 = scalar_lea.vmem %s17064_s0, %s17073_s26  ;;  %s11280_s8 = sshll.u32 %s17075_s27, 2  ;;  %vm291_vm0 = vcmask (!%p11281_p5), 812032   ;;  %v14475_v0 = vmov (!%p11281_p5), 0.0  }
   0xf   : > { %s14542_s11 = scalar_lea.vmem %s17065_s1, %s11280_s8  ;;  %290 = sbr.rel (%p11281_p5) target bundleno = 22 (0x16), region = 52  ;;  %292 = vst.msk [vmem:[#allocation2] sm:$0x3] (!%p11281_p5), %vm291_vm0, %v14475_v0 }
  0x16 PF: > { %v13587_v1 = vld [vmem:[%s14542_s11 + $0x40] sm:$0xff]   ;;  %v13591_v5 = vld [vmem:[%s14542_s11 + $0x48] sm:$0xff]   ;;  %v13595_v9 = vld [vmem:[%s14542_s11 + $0x50] sm:$0xff]   ;;  %v1892_v30 = vlaneseq  ;;  %v14476_v36 = vmov 1966171168   ;;  %vm9261_vm1 = vcmask 812032  }
  0x17   : > { %v13588_v2 = vld [vmem:[%s14542_s11 + $0xc0] sm:$0xff]   ;;  %12115 = vmatprep.subr.bf16.mxu0 %v13587_v1  ;;  %v13592_v6 = vld [vmem:[%s14542_s11 + $0xc8] sm:$0xff]   ;;  %v13596_v10 = vld [vmem:[%s14542_s11 + $0xd0] sm:$0xff]   ;;  %v1890_v37 = vunpack.c.l.s4 %v14476_v36  ;;  %p12067_p6 = scmp.ne.s32.totalorder %s14528_s25, 5 }
  0x18   : > { %v13589_v3 = vld [vmem:[%s14542_s11] sm:$0xff]   ;;  %12137 = vmatprep.subr.bf16.mxu1 %v13588_v2  ;;  %v13593_v7 = vld [vmem:[%s14542_s11 + $0x8] sm:$0xff]   ;;  %v13597_v11 = vld [vmem:[%s14542_s11 + $0x10] sm:$0xff]   ;;  %v14577_v34 = vshrl.u32 %v1892_v30, 7  ;;  %vm14479_vm2 = vmmov (!%p12067_p6), 0   ;;  %vm9301_vm3 = vcmask (!%p12067_p6), 1043456  }
  0x19   : > { %v13590_v4 = vld [vmem:[%s14542_s11 + $0x80] sm:$0xff]   ;;  %12116 = vmatpush3.bf16.msra.mxu0 %v13589_v3  ;;  %v13594_v8 = vld [vmem:[%s14542_s11 + $0x88] sm:$0xff]   ;;  %v13598_v12 = vld [vmem:[%s14542_s11 + $0x90] sm:$0xff]   ;;  %v1891_v40 = vunpack.c.0.s8 %v1890_v37  ;;  %vm9297_vm4 = vcmask (!%p12067_p6), 818176   ;;  %vm10856_vm5 = vcmask (!%p12067_p6), 1041408   ;;  %vm10903_vm6 = vcmask (!%p12067_p6), 517120  }
  0x1a   : > { %12138 = vmatpush3.bf16.msra.mxu1 %v13590_v4  ;;  %12117 = vmatprep.subr.bf16.mxu0 %v13591_v5  ;;  %v13599_v13 = vld [vmem:[%s14542_s11 + $0x58] sm:$0xff]   ;;  %v13603_v17 = vld [vmem:[%s14542_s11 + $0x60] sm:$0xff]   ;;  %v13607_v21 = vld [vmem:[%s14542_s11 + $0x68] sm:$0xff]   ;;  %vm11218_vm7 = vcmask (!%p12067_p6), 519170  }
  0x1b   : > { %12139 = vmatprep.subr.bf16.mxu1 %v13592_v6  ;;  %v13600_v14 = vld [vmem:[%s14542_s11 + $0xd8] sm:$0xff]   ;;  %v13604_v18 = vld [vmem:[%s14542_s11 + $0xe0] sm:$0xff]   ;;  %v13608_v22 = vld [vmem:[%s14542_s11 + $0xe8] sm:$0xff]   ;;  %v14583_v42 = vsub.s32 %v1891_v40, %v14577_v34 }
  0x1c   : > { %v13601_v15 = vld [vmem:[%s14542_s11 + $0x18] sm:$0xff]   ;;  %v13605_v19 = vld [vmem:[%s14542_s11 + $0x20] sm:$0xff]   ;;  %v13609_v23 = vld [vmem:[%s14542_s11 + $0x28] sm:$0xff]  }
  0x1d   : > { %12118 = vmatpush3.bf16.msra.mxu0 %v13593_v7  ;;  %v13602_v16 = vld [vmem:[%s14542_s11 + $0x98] sm:$0xff]   ;;  %v13606_v20 = vld [vmem:[%s14542_s11 + $0xa0] sm:$0xff]   ;;  %v13610_v24 = vld [vmem:[%s14542_s11 + $0xa8] sm:$0xff]  }
  0x1e   : > { %12140 = vmatpush3.bf16.msra.mxu1 %v13594_v8  ;;  %12119 = vmatprep.subr.bf16.mxu0 %v13595_v9  ;;  %v13611_v25 = vld [vmem:[%s14542_s11 + $0x70] sm:$0xff]   ;;  %v13615_v29 = vld [vmem:[%s14542_s11 + $0x78] sm:$0xff]   ;;  %v13620_v35 = vld [vmem:[%s14542_s11 + $0x140] sm:$0xff]  }
  0x1f   : > { %12141 = vmatprep.subr.bf16.mxu1 %v13596_v10  ;;  %v13612_v26 = vld [vmem:[%s14542_s11 + $0xf0] sm:$0xff]   ;;  %v13616_v31 = vld [vmem:[%s14542_s11 + $0xf8] sm:$0xff]   ;;  %v294_v38 = vld [vmem:[%s14537_s30] sm:$0xff] }
  0x20   : > { %v13613_v27 = vld [vmem:[%s14542_s11 + $0x30] sm:$0xff]   ;;  %v13617_v32 = vld [vmem:[%s14542_s11 + $0x38] sm:$0xff]   ;;  %v1888_v39 = vcombine.high %v294_v38, %v294_v38  ;;  %v13622_v41 = vld [vmem:[%s14542_s11 + $0x1c0] sm:$0xff]   ;;  %v1895_v43 = vrot.slane %v294_v38, %v14583_v42 }
  0x21   : > { %12120 = vmatpush3.bf16.msra.mxu0 %v13597_v11  ;;  %v13614_v28 = vld [vmem:[%s14542_s11 + $0xb0] sm:$0xff]   ;;  %v13618_v33 = vld [vmem:[%s14542_s11 + $0xb8] sm:$0xff]   ;;  %v13621_v48 = vld [vmem:[%s14542_s11 + $0x100] sm:$0xff]  }
  0x22   : > { %12142 = vmatpush3.bf16.msra.mxu1 %v13598_v12  ;;  %12121 = vmatprep.subr.bf16.mxu0 %v13599_v13  ;;  %v14587_v44 = vrot.slane %v1888_v39, %v14583_v42  ;;  %v1903_v45 = vcombine.high %v1895_v43, %v1895_v43  ;;  %v1911_v46 = vrot.slane %v1895_v43, %v14583_v42  ;;  %v13623_v50 = vld [vmem:[%s14542_s11 + $0x180] sm:$0xff]   ;;  %v13624_v53 = vld [vmem:[%s14542_s11 + $0x148] sm:$0xff]   ;;  %v13628_v59 = vld [vmem:[%s14542_s11 + $0x150] sm:$0xff]  }
  0x23   : > { %12143 = vmatprep.subr.bf16.mxu1 %v13600_v14  ;;  %v13625_v55 = vld [vmem:[%s14542_s11 + $0x108] sm:$0xff]   ;;  %v13629_v60 = vld [vmem:[%s14542_s11 + $0x110] sm:$0xff]   ;;  %v13632_v63 = vld [vmem:[%s14542_s11 + $0x158] sm:$0xff]  }
  0x24   : > { %v1904_v47 = vcombine.high %v14587_v44, %v14587_v44  ;;  %v1925_v49 = vrot.slane %v1903_v45, %v14583_v42  ;;  %v1933_v52 = vcombine.high %v1911_v46, %v1911_v46  ;;  %v13626_v56 = vld [vmem:[%s14542_s11 + $0x1c8] sm:$0xff]   ;;  %v13630_v61 = vld [vmem:[%s14542_s11 + $0x1d0] sm:$0xff]   ;;  %v13633_v0 = vld [vmem:[%s14542_s11 + $0x118] sm:$0xff]  }
  0x25   : > { %12122 = vmatpush3.bf16.msra.mxu0 %v13601_v15  ;;  %v13627_v58 = vld [vmem:[%s14542_s11 + $0x188] sm:$0xff]   ;;  %v13631_v62 = vld [vmem:[%s14542_s11 + $0x190] sm:$0xff]   ;;  %v13634_v1 = vld [vmem:[%s14542_s11 + $0x1d8] sm:$0xff]  }
  0x26   : > { %12144 = vmatpush3.bf16.msra.mxu1 %v13602_v16  ;;  %12123 = vmatprep.subr.bf16.mxu0 %v13603_v17  ;;  %v1932_v51 = vrot.slane %v1904_v47, %v14583_v42  ;;  %v1935_v54 = vcombine.high %v1925_v49, %v1925_v49  ;;  %v13635_v2 = vld [vmem:[%s14542_s11 + $0x198] sm:$0xff]   ;;  %v13636_v3 = vld [vmem:[%s14542_s11 + $0x160] sm:$0xff]   ;;  %v13640_v7 = vld [vmem:[%s14542_s11 + $0x168] sm:$0xff]  }
  0x27   : > { %12145 = vmatprep.subr.bf16.mxu1 %v13604_v18  ;;  %7332 = vmatprep.mubr.bf16.mxu0 %v1925_v49  ;;  %v13637_v4 = vld [vmem:[%s14542_s11 + $0x120] sm:$0xff]   ;;  %v13641_v8 = vld [vmem:[%s14542_s11 + $0x128] sm:$0xff]   ;;  %v13644_v11 = vld [vmem:[%s14542_s11 + $0x170] sm:$0xff]  }
  0x28   : > { %v1936_v57 = vcombine.high %v1932_v51, %v1932_v51  ;;  %7372 = vmatprep.mubr.bf16.mxu1 %v1935_v54  ;;  %v13638_v5 = vld [vmem:[%s14542_s11 + $0x1e0] sm:$0xff]   ;;  %v13642_v9 = vld [vmem:[%s14542_s11 + $0x1e8] sm:$0xff]   ;;  %v13645_v12 = vld [vmem:[%s14542_s11 + $0x130] sm:$0xff]  }
  0x29   : > { %12124 = vmatpush3.bf16.msra.mxu0 %v13605_v19  ;;  %v13639_v6 = vld [vmem:[%s14542_s11 + $0x1a0] sm:$0xff]   ;;  %v13643_v10 = vld [vmem:[%s14542_s11 + $0x1a8] sm:$0xff]   ;;  %v13646_v13 = vld [vmem:[%s14542_s11 + $0x1f0] sm:$0xff]   ;;  %v1918_v19 = vrot.slane %v14587_v44, %v14583_v42 }
  0x2a   : > { %12146 = vmatpush3.bf16.msra.mxu1 %v13606_v20  ;;  %12125 = vmatprep.subr.bf16.mxu0 %v13607_v21  ;;  %v13647_v14 = vld [vmem:[%s14542_s11 + $0x1b0] sm:$0xff]   ;;  %v13648_v15 = vld [vmem:[%s14542_s11 + $0x178] sm:$0xff]   ;;  %v13652_v20 = vld [vmem:[%s14542_s11 + $0x240] sm:$0xff]  }
  0x2b   : > { %12147 = vmatprep.subr.bf16.mxu1 %v13608_v22  ;;  %v13649_v16 = vld [vmem:[%s14542_s11 + $0x138] sm:$0xff]   ;;  %v13653_v21 = vld [vmem:[%s14542_s11 + $0x200] sm:$0xff]   ;;  %v13661_v30 = vld [vmem:[%s14542_s11 + $0x210] sm:$0xff]  }
  0x2c   : > { %v13650_v17 = vld [vmem:[%s14542_s11 + $0x1f8] sm:$0xff]   ;;  %v13654_v22 = vld [vmem:[%s14542_s11 + $0x2c0] sm:$0xff]   ;;  %v13672_v43 = vld [vmem:[%s14542_s11 + $0x268] sm:$0xff]  }
  0x2d   : > { %12126 = vmatpush3.bf16.msra.mxu0 %v13609_v23  ;;  %v13651_v18 = vld [vmem:[%s14542_s11 + $0x1b8] sm:$0xff]   ;;  %v13655_v23 = vld [vmem:[%s14542_s11 + $0x280] sm:$0xff]   ;;  %v13673_v44 = vld [vmem:[%s14542_s11 + $0x228] sm:$0xff]  }
  0x2e   : > { %12148 = vmatpush3.bf16.msra.mxu1 %v13610_v24  ;;  %12127 = vmatprep.subr.bf16.mxu0 %v13611_v25  ;;  %v1934_v24 = vcombine.high %v1918_v19, %v1918_v19  ;;  %v13656_v25 = vld [vmem:[%s14542_s11 + $0x248] sm:$0xff]   ;;  %v13666_v36 = vld [vmem:[%s14542_s11 + $0x2d8] sm:$0xff]   ;;  %v13668_v38 = vld [vmem:[%s14542_s11 + $0x260] sm:$0xff]  }
  0x2f   : > { %12149 = vmatprep.subr.bf16.mxu1 %v13612_v26  ;;  %v13657_v26 = vld [vmem:[%s14542_s11 + $0x208] sm:$0xff]   ;;  %v13667_v37 = vld [vmem:[%s14542_s11 + $0x298] sm:$0xff]   ;;  %v13669_v39 = vld [vmem:[%s14542_s11 + $0x220] sm:$0xff]  }
  0x30   : > { %v13670_v40 = vld [vmem:[%s14542_s11 + $0x2e0] sm:$0xff]   ;;  %v13674_v45 = vld [vmem:[%s14542_s11 + $0x2e8] sm:$0xff]   ;;  %vm11219_vm8 = vmor (!%p12067_p6), %vm11218_vm7, %vm10856_vm5 }
  0x31   : > { %12128 = vmatpush3.bf16.msra.mxu0 %v13613_v27  ;;  %v13658_v27 = vld [vmem:[%s14542_s11 + $0x2c8] sm:$0xff]  }
  0x32   : > { %12150 = vmatpush3.bf16.msra.mxu1 %v13614_v28  ;;  %12129 = vmatprep.subr.bf16.mxu0 %v13615_v29  ;;  %v13659_v28 = vld [vmem:[%s14542_s11 + $0x288] sm:$0xff]   ;;  %v13660_v29 = vld [vmem:[%s14542_s11 + $0x250] sm:$0xff]  }
  0x33   : > { %12151 = vmatprep.subr.bf16.mxu1 %v13616_v31  ;;  %v13662_v31 = vld [vmem:[%s14542_s11 + $0x2d0] sm:$0xff]   ;;  %v295_v47 = vld [vmem:[%s14537_s30 + $0x8] sm:$0xff] }
  0x34   : > { %v1944_v49 = vrot.slane %v295_v47, %v14583_v42 }
  0x35   : > { %12130 = vmatpush3.bf16.msra.mxu0 %v13617_v32  ;;  %v13663_v32 = vld [vmem:[%s14542_s11 + $0x290] sm:$0xff]  }
  0x36   : > { %12152 = vmatpush3.bf16.msra.mxu1 %v13618_v33  ;;  %12159 = vmatprep.subr.bf16.mxu0 %v13620_v35  ;;  %v13664_v33 = vld [vmem:[%s14542_s11 + $0x258] sm:$0xff]  }
  0x37   : > { %12181 = vmatprep.subr.bf16.mxu1 %v13622_v41  ;;  %v13665_v35 = vld [vmem:[%s14542_s11 + $0x218] sm:$0xff]   ;;  %v13671_v41 = vld [vmem:[%s14542_s11 + $0x2a0] sm:$0xff]  }
  0x38   : > { %7333 = vmatmul.mubr.bf16.vlgmr.msra.gmra.mrb[0].mxu0 %v1911_v46  ;;  %v13675_v46 = vld [vmem:[%s14542_s11 + $0x2a8] sm:$0xff]  }
  0x39   : > { %12160 = vmatpush3.bf16.msra.mxu0 %v13621_v48  ;;  %7373 = vmatmul.mubr.bf16.vlgmr.msra.gmra.mrb[0].mxu1 %v1933_v52  ;;  %v13676_v48 = vld [vmem:[%s14542_s11 + $0x270] sm:$0xff]  }
  0x3a   : > { %12161 = vmatprep.subr.bf16.mxu0 %v13624_v53  ;;  %12182 = vmatpush3.bf16.msra.mxu1 %v13623_v50  ;;  %v1937_v50 = vcombine.high %v295_v47, %v295_v47  ;;  %v13678_v52 = vld [vmem:[%s14542_s11 + $0x2f0] sm:$0xff]   ;;  %v1952_v53 = vcombine.high %v1944_v49, %v1944_v49 }
  0x3b   : > { %7412 = vmatprep.mubr.bf16.mxu0 %v1932_v51  ;;  %12183 = vmatprep.subr.bf16.mxu1 %v13626_v56  ;;  %v13677_v51 = vld [vmem:[%s14542_s11 + $0x230] sm:$0xff]   ;;  %v13680_v56 = vld [vmem:[%s14542_s11 + $0x278] sm:$0xff]  }
  0x3c   : > { %7452 = vmatprep.mubr.bf16.mxu1 %v1936_v57  ;;  %v14656_v54 = vrot.slane %v1937_v50, %v14583_v42  ;;  %v1974_v57 = vrot.slane %v1952_v53, %v14583_v42  ;;  %v13725_v47 = vld [vmem:[%s14542_s11 + $0x450] sm:$0xff]   ;;  %v13731_v53 = vld [vmem:[%s14542_s11 + $0x4d8] sm:$0xff]  }
  0x3d   : > { %12162 = vmatpush3.bf16.msra.mxu0 %v13625_v55  ;;  %v13679_v55 = vld [vmem:[%s14542_s11 + $0x2b0] sm:$0xff]  }
  0x3e   : > { %12163 = vmatprep.subr.bf16.mxu0 %v13628_v59  ;;  %12184 = vmatpush3.bf16.msra.mxu1 %v13627_v58  ;;  %v13681_v58 = vld [vmem:[%s14542_s11 + $0x238] sm:$0xff]   ;;  %v1953_v59 = vcombine.high %v14656_v54, %v14656_v54  ;;  %v13728_v50 = vld [vmem:[%s14542_s11 + $0x490] sm:$0xff]  }
  0x3f   : > { %12185 = vmatprep.subr.bf16.mxu1 %v13630_v61  ;;  %v1984_v61 = vcombine.high %v1974_v57, %v1974_v57 }
  0x41   : > { %12164 = vmatpush3.bf16.msra.mxu0 %v13629_v60  ;;  %v13682_v60 = vld [vmem:[%s14542_s11 + $0x2f8] sm:$0xff]  }
  0x42   : > { %12165 = vmatprep.subr.bf16.mxu0 %v13632_v63  ;;  %12186 = vmatpush3.bf16.msra.mxu1 %v13631_v62  ;;  %v13683_v62 = vld [vmem:[%s14542_s11 + $0x2b8] sm:$0xff]   ;;  %v1960_v63 = vrot.slane %v1944_v49, %v14583_v42  ;;  %v13727_v49 = vld [vmem:[%s14542_s11 + $0x4d0] sm:$0xff]  }
  0x43   : > { %12187 = vmatprep.subr.bf16.mxu1 %v13634_v1  ;;  %v13685_v1 = vld [vmem:[%s14542_s11 + $0x300] sm:$0xff]  }
  0x45   : > { %12166 = vmatpush3.bf16.msra.mxu0 %v13633_v0  ;;  %v13684_v0 = vld [vmem:[%s14542_s11 + $0x340] sm:$0xff]  }
  0x46   : > { %12167 = vmatprep.subr.bf16.mxu0 %v13636_v3  ;;  %12188 = vmatpush3.bf16.msra.mxu1 %v13635_v2  ;;  %v1981_v2 = vrot.slane %v1953_v59, %v14583_v42  ;;  %v13686_v3 = vld [vmem:[%s14542_s11 + $0x3c0] sm:$0xff]   ;;  %v13737_v59 = vld [vmem:[%s14542_s11 + $0x468] sm:$0xff]  }
  0x47   : > { %12189 = vmatprep.subr.bf16.mxu1 %v13638_v5  ;;  %v1982_v5 = vcombine.high %v1960_v63, %v1960_v63 }
  0x49   : > { %12168 = vmatpush3.bf16.msra.mxu0 %v13637_v4  ;;  %v13687_v4 = vld [vmem:[%s14542_s11 + $0x380] sm:$0xff]  }
  0x4a   : > { %12169 = vmatprep.subr.bf16.mxu0 %v13640_v7  ;;  %12190 = vmatpush3.bf16.msra.mxu1 %v13639_v6  ;;  %v13688_v6 = vld [vmem:[%s14542_s11 + $0x348] sm:$0xff]  }
  0x4b   : > { %12191 = vmatprep.subr.bf16.mxu1 %v13642_v9  ;;  %v13689_v7 = vld [vmem:[%s14542_s11 + $0x308] sm:$0xff]  }
  0x4c   : > { %v13690_v9 = vld [vmem:[%s14542_s11 + $0x3c8] sm:$0xff]  }
  0x4d   : > { %12170 = vmatpush3.bf16.msra.mxu0 %v13641_v8  ;;  %v1985_v8 = vcombine.high %v1981_v2, %v1981_v2 }
  0x4e   : > { %12171 = vmatprep.subr.bf16.mxu0 %v13644_v11  ;;  %12192 = vmatpush3.bf16.msra.mxu1 %v13643_v10  ;;  %v13691_v10 = vld [vmem:[%s14542_s11 + $0x388] sm:$0xff]   ;;  %v13692_v11 = vld [vmem:[%s14542_s11 + $0x350] sm:$0xff]  }
  0x4f   : > { %12193 = vmatprep.subr.bf16.mxu1 %v13646_v13  ;;  %v13694_v13 = vld [vmem:[%s14542_s11 + $0x3d0] sm:$0xff]  }
  0x51   : > { %12172 = vmatpush3.bf16.msra.mxu0 %v13645_v12  ;;  %v13693_v12 = vld [vmem:[%s14542_s11 + $0x310] sm:$0xff]  }
  0x52   : > { %12173 = vmatprep.subr.bf16.mxu0 %v13648_v15  ;;  %12194 = vmatpush3.bf16.msra.mxu1 %v13647_v14  ;;  %v13695_v14 = vld [vmem:[%s14542_s11 + $0x390] sm:$0xff]   ;;  %v13696_v15 = vld [vmem:[%s14542_s11 + $0x358] sm:$0xff]  }
  0x53   : > { %12195 = vmatprep.subr.bf16.mxu1 %v13650_v17  ;;  %v13698_v17 = vld [vmem:[%s14542_s11 + $0x3d8] sm:$0xff]  }
  0x55   : > { %12174 = vmatpush3.bf16.msra.mxu0 %v13649_v16  ;;  %v13697_v16 = vld [vmem:[%s14542_s11 + $0x318] sm:$0xff]  }
  0x56   : > { %12203 = vmatprep.subr.bf16.mxu0 %v13652_v20  ;;  %12196 = vmatpush3.bf16.msra.mxu1 %v13651_v18  ;;  %v13699_v18 = vld [vmem:[%s14542_s11 + $0x398] sm:$0xff]   ;;  %v13701_v20 = vld [vmem:[%s14542_s11 + $0x320] sm:$0xff]  }
  0x57   : > { %12225 = vmatprep.subr.bf16.mxu1 %v13654_v22  ;;  %v13703_v22 = vld [vmem:[%s14542_s11 + $0x3a0] sm:$0xff]  }
  0x58   : > { %7413 = vmatmul.mubr.bf16.vlgmr.msra.gmra.mrb[4].mxu0 %v1918_v19  ;;  %v13700_v19 = vld [vmem:[%s14542_s11 + $0x360] sm:$0xff]  }
  0x59   : > { %12204 = vmatpush3.bf16.msra.mxu0 %v13653_v21  ;;  %7453 = vmatmul.mubr.bf16.vlgmr.msra.gmra.mrb[4].mxu1 %v1934_v24  ;;  %v13702_v21 = vld [vmem:[%s14542_s11 + $0x3e0] sm:$0xff]   ;;  %v13705_v24 = vld [vmem:[%s14542_s11 + $0x328] sm:$0xff]  }
  0x5a   : > { %12205 = vmatprep.subr.bf16.mxu0 %v13656_v25  ;;  %12226 = vmatpush3.bf16.msra.mxu1 %v13655_v23  ;;  %v13704_v23 = vld [vmem:[%s14542_s11 + $0x368] sm:$0xff]  }
  0x5b   : > { %12227 = vmatprep.subr.bf16.mxu1 %v13658_v27  ;;  %7492 = vmatprep.mubr.bf16.mxu0 %v1974_v57  ;;  %v13706_v25 = vld [vmem:[%s14542_s11 + $0x3e8] sm:$0xff]   ;;  %v13708_v27 = vld [vmem:[%s14542_s11 + $0x370] sm:$0xff]   ;;  %v13735_v57 = vld [vmem:[%s14542_s11 + $0x4e0] sm:$0xff]  }
  0x5c   : > { %7532 = vmatprep.mubr.bf16.mxu1 %v1984_v61  ;;  %v13739_v61 = vld [vmem:[%s14542_s11 + $0x4e8] sm:$0xff]  }
  0x5d   : > { %12206 = vmatpush3.bf16.msra.mxu0 %v13657_v26  ;;  %v13707_v26 = vld [vmem:[%s14542_s11 + $0x3a8] sm:$0xff]  }
  0x5e   : > { %12207 = vmatprep.subr.bf16.mxu0 %v13660_v29  ;;  %12228 = vmatpush3.bf16.msra.mxu1 %v13659_v28  ;;  %v13709_v28 = vld [vmem:[%s14542_s11 + $0x330] sm:$0xff]  }
  0x5f   : > { %12229 = vmatprep.subr.bf16.mxu1 %v13662_v31  ;;  %v13710_v29 = vld [vmem:[%s14542_s11 + $0x3f0] sm:$0xff]   ;;  %v13712_v31 = vld [vmem:[%s14542_s11 + $0x378] sm:$0xff]  }
  0x61   : > { %12208 = vmatpush3.bf16.msra.mxu0 %v13661_v30  ;;  %v13711_v30 = vld [vmem:[%s14542_s11 + $0x3b0] sm:$0xff]  }
  0x62   : > { %12209 = vmatprep.subr.bf16.mxu0 %v13664_v33  ;;  %12230 = vmatpush3.bf16.msra.mxu1 %v13663_v32  ;;  %v13713_v32 = vld [vmem:[%s14542_s11 + $0x338] sm:$0xff]  }
  0x63   : > { %12231 = vmatprep.subr.bf16.mxu1 %v13666_v36  ;;  %v13714_v33 = vld [vmem:[%s14542_s11 + $0x3f8] sm:$0xff]   ;;  %v1967_v36 = vrot.slane %v14656_v54, %v14583_v42 }
  0x64   : > { %v13732_v54 = vld [vmem:[%s14542_s11 + $0x498] sm:$0xff]  }
  0x65   : > { %12210 = vmatpush3.bf16.msra.mxu0 %v13665_v35  ;;  %v13716_v35 = vld [vmem:[%s14542_s11 + $0x3b8] sm:$0xff]  }
  0x66   : > { %12211 = vmatprep.subr.bf16.mxu0 %v13668_v38  ;;  %12232 = vmatpush3.bf16.msra.mxu1 %v13667_v37  ;;  %v13717_v37 = vld [vmem:[%s14542_s11 + $0x440] sm:$0xff]  }
  0x67   : > { %12233 = vmatprep.subr.bf16.mxu1 %v13670_v40  ;;  %v13718_v38 = vld [vmem:[%s14542_s11 + $0x400] sm:$0xff]  }
  0x68   : > { %v13720_v40 = vld [vmem:[%s14542_s11 + $0x480] sm:$0xff]  }
  0x69   : > { %12212 = vmatpush3.bf16.msra.mxu0 %v13669_v39  ;;  %v13719_v39 = vld [vmem:[%s14542_s11 + $0x4c0] sm:$0xff]  }
  0x6a   : > { %12213 = vmatprep.subr.bf16.mxu0 %v13672_v43  ;;  %12234 = vmatpush3.bf16.msra.mxu1 %v13671_v41  ;;  %v1983_v41 = vcombine.high %v1967_v36, %v1967_v36  ;;  %v13721_v43 = vld [vmem:[%s14542_s11 + $0x448] sm:$0xff]  }
  0x6b   : > { %12235 = vmatprep.subr.bf16.mxu1 %v13674_v45  ;;  %v13723_v45 = vld [vmem:[%s14542_s11 + $0x4c8] sm:$0xff]  }
  0x6d   : > { %12214 = vmatpush3.bf16.msra.mxu0 %v13673_v44  ;;  %v13722_v44 = vld [vmem:[%s14542_s11 + $0x408] sm:$0xff]  }
  0x6e   : > { %12215 = vmatprep.subr.bf16.mxu0 %v13676_v48  ;;  %12236 = vmatpush3.bf16.msra.mxu1 %v13675_v46  ;;  %v13724_v46 = vld [vmem:[%s14542_s11 + $0x488] sm:$0xff]   ;;  %v13726_v48 = vld [vmem:[%s14542_s11 + $0x410] sm:$0xff]  }
  0x6f   : > { %12237 = vmatprep.subr.bf16.mxu1 %v13678_v52  ;;  %v13730_v52 = vld [vmem:[%s14542_s11 + $0x418] sm:$0xff]  }
  0x71   : > { %12216 = vmatpush3.bf16.msra.mxu0 %v13677_v51  ;;  %v13729_v51 = vld [vmem:[%s14542_s11 + $0x458] sm:$0xff]  }
  0x72   : > { %12217 = vmatprep.subr.bf16.mxu0 %v13680_v56  ;;  %12238 = vmatpush3.bf16.msra.mxu1 %v13679_v55  ;;  %v13733_v55 = vld [vmem:[%s14542_s11 + $0x460] sm:$0xff]  }
  0x73   : > { %12239 = vmatprep.subr.bf16.mxu1 %v13682_v60  ;;  %v13734_v56 = vld [vmem:[%s14542_s11 + $0x420] sm:$0xff]   ;;  %v13738_v60 = vld [vmem:[%s14542_s11 + $0x428] sm:$0xff]  }
  0x75   : > { %12218 = vmatpush3.bf16.msra.mxu0 %v13681_v58  ;;  %v13736_v58 = vld [vmem:[%s14542_s11 + $0x4a0] sm:$0xff]  }
  0x76   : > { %12247 = vmatprep.subr.bf16.mxu0 %v13684_v0  ;;  %12240 = vmatpush3.bf16.msra.mxu1 %v13683_v62  ;;  %v13740_v62 = vld [vmem:[%s14542_s11 + $0x4a8] sm:$0xff]   ;;  %v13741_v0 = vld [vmem:[%s14542_s11 + $0x470] sm:$0xff]  }
  0x77   : > { %12269 = vmatprep.subr.bf16.mxu1 %v13686_v3  ;;  %v13742_v3 = vld [vmem:[%s14542_s11 + $0x430] sm:$0xff]  }
  0x78   : > { %7493 = vmatmul.mubr.bf16.vlgmr.msra.gmra.mrb[8].mxu0 %v1960_v63  ;;  %v296_v63 = vld [vmem:[%s14537_s30 + $0x10] sm:$0xff] }
  0x79   : > { %12248 = vmatpush3.bf16.msra.mxu0 %v13685_v1  ;;  %7572 = vmatprep.mubr.bf16.mxu0 %v1981_v2  ;;  %v1993_v1 = vrot.slane %v296_v63, %v14583_v42  ;;  %v1986_v2 = vcombine.high %v296_v63, %v296_v63  ;;  %v13790_v63 = vld [vmem:[%s14542_s11 + $0x650] sm:$0xff]  }
  0x7a   : > { %7533 = vmatmul.mubr.bf16.vlgmr.msra.gmra.mrb[8].mxu1 %v1982_v5  ;;  %12249 = vmatprep.subr.bf16.mxu0 %v13688_v6 }
  0x7b   : > { %12270 = vmatpush3.bf16.msra.mxu1 %v13687_v4  ;;  %7612 = vmatprep.mubr.bf16.mxu1 %v1985_v8  ;;  %v13743_v4 = vld [vmem:[%s14542_s11 + $0x4f0] sm:$0xff]   ;;  %v2001_v5 = vcombine.high %v1993_v1, %v1993_v1  ;;  %v14732_v6 = vrot.slane %v1986_v2, %v14583_v42  ;;  %v13745_v8 = vld [vmem:[%s14542_s11 + $0x478] sm:$0xff]  }
  0x7c   : > { %12271 = vmatprep.subr.bf16.mxu1 %v13690_v9  ;;  %v13793_v2 = vld [vmem:[%s14542_s11 + $0x690] sm:$0xff]  }
  0x7d   : > { %12250 = vmatpush3.bf16.msra.mxu0 %v13689_v7  ;;  %v13744_v7 = vld [vmem:[%s14542_s11 + $0x4b0] sm:$0xff]   ;;  %v2023_v9 = vrot.slane %v2001_v5, %v14583_v42  ;;  %v13796_v5 = vld [vmem:[%s14542_s11 + $0x6d8] sm:$0xff]  }
  0x7e   : > { %12251 = vmatprep.subr.bf16.mxu0 %v13692_v11  ;;  %v2002_v11 = vcombine.high %v14732_v6, %v14732_v6 }
  0x7f   : > { %12272 = vmatpush3.bf16.msra.mxu1 %v13691_v10  ;;  %v13746_v10 = vld [vmem:[%s14542_s11 + $0x438] sm:$0xff]  }
  0x80   : > { %12273 = vmatprep.subr.bf16.mxu1 %v13694_v13  ;;  %v2033_v13 = vcombine.high %v2023_v9, %v2023_v9 }
  0x81   : > { %12252 = vmatpush3.bf16.msra.mxu0 %v13693_v12  ;;  %v13747_v12 = vld [vmem:[%s14542_s11 + $0x4f8] sm:$0xff]  }
  0x82   : > { %12253 = vmatprep.subr.bf16.mxu0 %v13696_v15  ;;  %v2009_v15 = vrot.slane %v1993_v1, %v14583_v42  ;;  %v13792_v1 = vld [vmem:[%s14542_s11 + $0x6d0] sm:$0xff]  }
  0x83   : > { %12274 = vmatpush3.bf16.msra.mxu1 %v13695_v14  ;;  %v13748_v14 = vld [vmem:[%s14542_s11 + $0x4b8] sm:$0xff]  }
  0x84   : > { %12275 = vmatprep.subr.bf16.mxu1 %v13698_v17  ;;  %v13750_v17 = vld [vmem:[%s14542_s11 + $0x500] sm:$0xff]  }
  0x85   : > { %12254 = vmatpush3.bf16.msra.mxu0 %v13697_v16  ;;  %v13749_v16 = vld [vmem:[%s14542_s11 + $0x540] sm:$0xff]  }
  0x86   : > { %12255 = vmatprep.subr.bf16.mxu0 %v13700_v19  ;;  %v13751_v19 = vld [vmem:[%s14542_s11 + $0x5c0] sm:$0xff]  }
  0x87   : > { %12276 = vmatpush3.bf16.msra.mxu1 %v13699_v18  ;;  %v2030_v18 = vrot.slane %v2002_v11, %v14583_v42  ;;  %v13802_v11 = vld [vmem:[%s14542_s11 + $0x668] sm:$0xff]  }
  0x88   : > { %12277 = vmatprep.subr.bf16.mxu1 %v13702_v21  ;;  %v2031_v21 = vcombine.high %v2009_v15, %v2009_v15 }
  0x89   : > { %12256 = vmatpush3.bf16.msra.mxu0 %v13701_v20  ;;  %v13752_v20 = vld [vmem:[%s14542_s11 + $0x580] sm:$0xff]  }
  0x8a   : > { %12257 = vmatprep.subr.bf16.mxu0 %v13704_v23  ;;  %v13754_v23 = vld [vmem:[%s14542_s11 + $0x508] sm:$0xff]  }
  0x8b   : > { %12278 = vmatpush3.bf16.msra.mxu1 %v13703_v22  ;;  %v13753_v22 = vld [vmem:[%s14542_s11 + $0x548] sm:$0xff]  }
  0x8c   : > { %12279 = vmatprep.subr.bf16.mxu1 %v13706_v25  ;;  %v13755_v25 = vld [vmem:[%s14542_s11 + $0x5c8] sm:$0xff]  }
  0x8d   : > { %12258 = vmatpush3.bf16.msra.mxu0 %v13705_v24  ;;  %v2034_v24 = vcombine.high %v2030_v18, %v2030_v18 }
  0x8e   : > { %12259 = vmatprep.subr.bf16.mxu0 %v13708_v27  ;;  %v13757_v27 = vld [vmem:[%s14542_s11 + $0x550] sm:$0xff]  }
  0x8f   : > { %12280 = vmatpush3.bf16.msra.mxu1 %v13707_v26  ;;  %v13756_v26 = vld [vmem:[%s14542_s11 + $0x588] sm:$0xff]  }
  0x90   : > { %12281 = vmatprep.subr.bf16.mxu1 %v13710_v29  ;;  %v13759_v29 = vld [vmem:[%s14542_s11 + $0x5d0] sm:$0xff]  }
  0x91   : > { %12260 = vmatpush3.bf16.msra.mxu0 %v13709_v28  ;;  %v13758_v28 = vld [vmem:[%s14542_s11 + $0x510] sm:$0xff]  }
  0x92   : > { %12261 = vmatprep.subr.bf16.mxu0 %v13712_v31  ;;  %v13761_v31 = vld [vmem:[%s14542_s11 + $0x558] sm:$0xff]  }
  0x93   : > { %12282 = vmatpush3.bf16.msra.mxu1 %v13711_v30  ;;  %v13760_v30 = vld [vmem:[%s14542_s11 + $0x590] sm:$0xff]  }
  0x94   : > { %12283 = vmatprep.subr.bf16.mxu1 %v13714_v33  ;;  %v13763_v33 = vld [vmem:[%s14542_s11 + $0x5d8] sm:$0xff]  }
  0x95   : > { %12262 = vmatpush3.bf16.msra.mxu0 %v13713_v32  ;;  %v13762_v32 = vld [vmem:[%s14542_s11 + $0x518] sm:$0xff]  }
  0x96   : > { %12291 = vmatprep.subr.bf16.mxu0 %v13717_v37  ;;  %v13766_v37 = vld [vmem:[%s14542_s11 + $0x520] sm:$0xff]  }
  0x97   : > { %12284 = vmatpush3.bf16.msra.mxu1 %v13716_v35  ;;  %v13764_v35 = vld [vmem:[%s14542_s11 + $0x598] sm:$0xff]  }
  0x98   : > { %7573 = vmatmul.mubr.bf16.vlgmr.msra.gmra.mrb[12].mxu0 %v1967_v36  ;;  %12313 = vmatprep.subr.bf16.mxu1 %v13719_v39  ;;  %v13765_v36 = vld [vmem:[%s14542_s11 + $0x560] sm:$0xff]  }
  0x99   : > { %12292 = vmatpush3.bf16.msra.mxu0 %v13718_v38  ;;  %7652 = vmatprep.mubr.bf16.mxu0 %v2023_v9  ;;  %v13767_v38 = vld [vmem:[%s14542_s11 + $0x5e0] sm:$0xff]  }
  0x9a   : > { %7613 = vmatmul.mubr.bf16.vlgmr.msra.gmra.mrb[12].mxu1 %v1983_v41  ;;  %12293 = vmatprep.subr.bf16.mxu0 %v13721_v43  ;;  %v13768_v39 = vld [vmem:[%s14542_s11 + $0x5a0] sm:$0xff]   ;;  %v13770_v41 = vld [vmem:[%s14542_s11 + $0x528] sm:$0xff]  }
  0x9b   : > { %12314 = vmatpush3.bf16.msra.mxu1 %v13720_v40  ;;  %7692 = vmatprep.mubr.bf16.mxu1 %v2033_v13  ;;  %v13769_v40 = vld [vmem:[%s14542_s11 + $0x568] sm:$0xff]   ;;  %v13800_v9 = vld [vmem:[%s14542_s11 + $0x6e0] sm:$0xff]  }
  0x9c   : > { %12315 = vmatprep.subr.bf16.mxu1 %v13723_v45  ;;  %v13771_v43 = vld [vmem:[%s14542_s11 + $0x5e8] sm:$0xff]   ;;  %v13773_v45 = vld [vmem:[%s14542_s11 + $0x570] sm:$0xff]  }
  0x9d   : > { %12294 = vmatpush3.bf16.msra.mxu0 %v13722_v44  ;;  %v13772_v44 = vld [vmem:[%s14542_s11 + $0x5a8] sm:$0xff]  }
  0x9e   : > { %12295 = vmatprep.subr.bf16.mxu0 %v13725_v47  ;;  %v13775_v47 = vld [vmem:[%s14542_s11 + $0x5f0] sm:$0xff]   ;;  %v13804_v13 = vld [vmem:[%s14542_s11 + $0x6e8] sm:$0xff]  }
  0x9f   : > { %12316 = vmatpush3.bf16.msra.mxu1 %v13724_v46  ;;  %v13774_v46 = vld [vmem:[%s14542_s11 + $0x530] sm:$0xff]  }
  0xa0   : > { %12317 = vmatprep.subr.bf16.mxu1 %v13727_v49  ;;  %v13777_v49 = vld [vmem:[%s14542_s11 + $0x578] sm:$0xff]  }
  0xa1   : > { %12296 = vmatpush3.bf16.msra.mxu0 %v13726_v48  ;;  %v13776_v48 = vld [vmem:[%s14542_s11 + $0x5b0] sm:$0xff]  }
  0xa2   : > { %12297 = vmatprep.subr.bf16.mxu0 %v13729_v51  ;;  %v13779_v51 = vld [vmem:[%s14542_s11 + $0x5f8] sm:$0xff]  }
  0xa3   : > { %12318 = vmatpush3.bf16.msra.mxu1 %v13728_v50  ;;  %v13778_v50 = vld [vmem:[%s14542_s11 + $0x538] sm:$0xff]  }
  0xa4   : > { %12319 = vmatprep.subr.bf16.mxu1 %v13731_v53  ;;  %v2016_v53 = vrot.slane %v14732_v6, %v14583_v42  ;;  %v13797_v6 = vld [vmem:[%s14542_s11 + $0x698] sm:$0xff]  }
  0xa5   : > { %12298 = vmatpush3.bf16.msra.mxu0 %v13730_v52  ;;  %v13781_v52 = vld [vmem:[%s14542_s11 + $0x5b8] sm:$0xff]  }
  0xa6   : > { %12299 = vmatprep.subr.bf16.mxu0 %v13733_v55  ;;  %v13783_v55 = vld [vmem:[%s14542_s11 + $0x600] sm:$0xff]  }
  0xa7   : > { %12320 = vmatpush3.bf16.msra.mxu1 %v13732_v54  ;;  %v13782_v54 = vld [vmem:[%s14542_s11 + $0x640] sm:$0xff]  }
  0xa8   : > { %12321 = vmatprep.subr.bf16.mxu1 %v13735_v57  ;;  %v13785_v57 = vld [vmem:[%s14542_s11 + $0x680] sm:$0xff]  }
  0xa9   : > { %12300 = vmatpush3.bf16.msra.mxu0 %v13734_v56  ;;  %v13784_v56 = vld [vmem:[%s14542_s11 + $0x6c0] sm:$0xff]  }
  0xaa   : > { %12301 = vmatprep.subr.bf16.mxu0 %v13737_v59  ;;  %v13786_v59 = vld [vmem:[%s14542_s11 + $0x648] sm:$0xff]  }
  0xab   : > { %12322 = vmatpush3.bf16.msra.mxu1 %v13736_v58  ;;  %v2032_v58 = vcombine.high %v2016_v53, %v2016_v53 }
  0xac   : > { %12323 = vmatprep.subr.bf16.mxu1 %v13739_v61  ;;  %v13788_v61 = vld [vmem:[%s14542_s11 + $0x6c8] sm:$0xff]  }
  0xad   : > { %12302 = vmatpush3.bf16.msra.mxu0 %v13738_v60  ;;  %v13787_v60 = vld [vmem:[%s14542_s11 + $0x608] sm:$0xff]  }
  0xae   : > { %12303 = vmatprep.subr.bf16.mxu0 %v13741_v0  ;;  %v13791_v0 = vld [vmem:[%s14542_s11 + $0x610] sm:$0xff]  }
  0xaf   : > { %12324 = vmatpush3.bf16.msra.mxu1 %v13740_v62  ;;  %v13789_v62 = vld [vmem:[%s14542_s11 + $0x688] sm:$0xff]  }
  0xb0   : > { %12325 = vmatprep.subr.bf16.mxu1 %v13743_v4  ;;  %v13795_v4 = vld [vmem:[%s14542_s11 + $0x618] sm:$0xff]  }
  0xb1   : > { %12304 = vmatpush3.bf16.msra.mxu0 %v13742_v3  ;;  %v13794_v3 = vld [vmem:[%s14542_s11 + $0x658] sm:$0xff]  }
  0xb2   : > { %12305 = vmatprep.subr.bf16.mxu0 %v13745_v8  ;;  %v13799_v8 = vld [vmem:[%s14542_s11 + $0x620] sm:$0xff]  }
  0xb3   : > { %12326 = vmatpush3.bf16.msra.mxu1 %v13744_v7  ;;  %v13798_v7 = vld [vmem:[%s14542_s11 + $0x660] sm:$0xff]  }
  0xb4   : > { %12327 = vmatprep.subr.bf16.mxu1 %v13747_v12  ;;  %v13803_v12 = vld [vmem:[%s14542_s11 + $0x628] sm:$0xff]  }
  0xb5   : > { %12306 = vmatpush3.bf16.msra.mxu0 %v13746_v10  ;;  %v13801_v10 = vld [vmem:[%s14542_s11 + $0x6a0] sm:$0xff]  }
  0xb6   : > { %12335 = vmatprep.subr.bf16.mxu0 %v13749_v16  ;;  %v297_v16 = vld [vmem:[%s14537_s30 + $0x18] sm:$0xff] }
  0xb7   : > { %12328 = vmatpush3.bf16.msra.mxu1 %v13748_v14  ;;  %v13805_v14 = vld [vmem:[%s14542_s11 + $0x6a8] sm:$0xff]  }
  0xb8   : > { %7653 = vmatmul.mubr.bf16.vlgmr.msra.gmra.mrb[16].mxu0 %v2009_v15  ;;  %12357 = vmatprep.subr.bf16.mxu1 %v13751_v19  ;;  %v13806_v15 = vld [vmem:[%s14542_s11 + $0x670] sm:$0xff]   ;;  %v2035_v19 = vcombine.high %v297_v16, %v297_v16 }
  0xb9   : > { %12336 = vmatpush3.bf16.msra.mxu0 %v13750_v17  ;;  %7732 = vmatprep.mubr.bf16.mxu0 %v2030_v18  ;;  %v13807_v17 = vld [vmem:[%s14542_s11 + $0x630] sm:$0xff]   ;;  %v2042_v18 = vrot.slane %v297_v16, %v14583_v42 }
  0xba   : > { %7693 = vmatmul.mubr.bf16.vlgmr.msra.gmra.mrb[16].mxu1 %v2031_v21  ;;  %12337 = vmatprep.subr.bf16.mxu0 %v13753_v22  ;;  %v13809_v21 = vld [vmem:[%s14542_s11 + $0x6b0] sm:$0xff]  }
  0xbb   : > { %12358 = vmatpush3.bf16.msra.mxu1 %v13752_v20  ;;  %7772 = vmatprep.mubr.bf16.mxu1 %v2034_v24  ;;  %v13808_v20 = vld [vmem:[%s14542_s11 + $0x6f0] sm:$0xff]   ;;  %v2050_v22 = vcombine.high %v2042_v18, %v2042_v18  ;;  %v13810_v24 = vld [vmem:[%s14542_s11 + $0x678] sm:$0xff]  }
  0xbc   : > { %12359 = vmatprep.subr.bf16.mxu1 %v13755_v25  ;;  %v13811_v25 = vld [vmem:[%s14542_s11 + $0x638] sm:$0xff]  }
  0xbd   : > { %12338 = vmatpush3.bf16.msra.mxu0 %v13754_v23  ;;  %v14809_v23 = vrot.slane %v2035_v19, %v14583_v42  ;;  %v13849_v19 = vld [vmem:[%s14542_s11 + $0x8c0] sm:$0xff]  }
  0xbe   : > { %12339 = vmatprep.subr.bf16.mxu0 %v13757_v27 }
  0xbf   : > { %12360 = vmatpush3.bf16.msra.mxu1 %v13756_v26  ;;  %v2072_v26 = vrot.slane %v2050_v22, %v14583_v42  ;;  %v2051_v27 = vcombine.high %v14809_v23, %v14809_v23  ;;  %v2065_v16 = vrot.slane %v14809_v23, %v14583_v42  ;;  %v13851_v22 = vld [vmem:[%s14542_s11 + $0x848] sm:$0xff]  }
  0xc0   : > { %12361 = vmatprep.subr.bf16.mxu1 %v13759_v29  ;;  %v13813_v29 = vld [vmem:[%s14542_s11 + $0x6b8] sm:$0xff]   ;;  %v13853_v23 = vld [vmem:[%s14542_s11 + $0x8c8] sm:$0xff]  }
  0xc1   : > { %12340 = vmatpush3.bf16.msra.mxu0 %v13758_v28  ;;  %v13812_v28 = vld [vmem:[%s14542_s11 + $0x6f8] sm:$0xff]  }
  0xc2   : > { %12341 = vmatprep.subr.bf16.mxu0 %v13761_v31  ;;  %v2058_v31 = vrot.slane %v2042_v18, %v14583_v42  ;;  %v13848_v18 = vld [vmem:[%s14542_s11 + $0x800] sm:$0xff]  }
  0xc3   : > { %12362 = vmatpush3.bf16.msra.mxu1 %v13760_v30  ;;  %v2082_v30 = vcombine.high %v2072_v26, %v2072_v26 }
  0xc4   : > { %12363 = vmatprep.subr.bf16.mxu1 %v13763_v33  ;;  %v13815_v33 = vld [vmem:[%s14542_s11 + $0x700] sm:$0xff]  }
  0xc5   : > { %12342 = vmatpush3.bf16.msra.mxu0 %v13762_v32  ;;  %v13814_v32 = vld [vmem:[%s14542_s11 + $0x740] sm:$0xff]  }
  0xc6   : > { %12343 = vmatprep.subr.bf16.mxu0 %v13765_v36  ;;  %v13816_v36 = vld [vmem:[%s14542_s11 + $0x7c0] sm:$0xff]  }
  0xc7   : > { %12364 = vmatpush3.bf16.msra.mxu1 %v13764_v35  ;;  %v2079_v35 = vrot.slane %v2051_v27, %v14583_v42  ;;  %v13856_v27 = vld [vmem:[%s14542_s11 + $0x810] sm:$0xff]  }
  0xc8   : > { %12365 = vmatprep.subr.bf16.mxu1 %v13767_v38  ;;  %v2080_v38 = vcombine.high %v2058_v31, %v2058_v31 }
  0xc9   : > { %12344 = vmatpush3.bf16.msra.mxu0 %v13766_v37  ;;  %v13817_v37 = vld [vmem:[%s14542_s11 + $0x780] sm:$0xff]  }
  0xca   : > { %12345 = vmatprep.subr.bf16.mxu0 %v13769_v40  ;;  %v13819_v40 = vld [vmem:[%s14542_s11 + $0x708] sm:$0xff]  }
  0xcb   : > { %12366 = vmatpush3.bf16.msra.mxu1 %v13768_v39  ;;  %v13818_v39 = vld [vmem:[%s14542_s11 + $0x748] sm:$0xff]  }
  0xcc   : > { %12367 = vmatprep.subr.bf16.mxu1 %v13771_v43  ;;  %v13820_v43 = vld [vmem:[%s14542_s11 + $0x7c8] sm:$0xff]  }
  0xcd   : > { %12346 = vmatpush3.bf16.msra.mxu0 %v13770_v41  ;;  %v2083_v41 = vcombine.high %v2079_v35, %v2079_v35 }
  0xce   : > { %12347 = vmatprep.subr.bf16.mxu0 %v13773_v45  ;;  %v13822_v45 = vld [vmem:[%s14542_s11 + $0x750] sm:$0xff]  }
  0xcf   : > { %12368 = vmatpush3.bf16.msra.mxu1 %v13772_v44  ;;  %v13821_v44 = vld [vmem:[%s14542_s11 + $0x788] sm:$0xff]  }
  0xd0   : > { %12369 = vmatprep.subr.bf16.mxu1 %v13775_v47  ;;  %v13824_v47 = vld [vmem:[%s14542_s11 + $0x7d0] sm:$0xff]  }
  0xd1   : > { %12348 = vmatpush3.bf16.msra.mxu0 %v13774_v46  ;;  %v13823_v46 = vld [vmem:[%s14542_s11 + $0x710] sm:$0xff]  }
  0xd2   : > { %12349 = vmatprep.subr.bf16.mxu0 %v13777_v49  ;;  %v13826_v49 = vld [vmem:[%s14542_s11 + $0x758] sm:$0xff]  }
  0xd3   : > { %12370 = vmatpush3.bf16.msra.mxu1 %v13776_v48  ;;  %v13825_v48 = vld [vmem:[%s14542_s11 + $0x790] sm:$0xff]  }
  0xd4   : > { %12371 = vmatprep.subr.bf16.mxu1 %v13779_v51  ;;  %v13828_v51 = vld [vmem:[%s14542_s11 + $0x7d8] sm:$0xff]  }
  0xd5   : > { %12350 = vmatpush3.bf16.msra.mxu0 %v13778_v50  ;;  %v13827_v50 = vld [vmem:[%s14542_s11 + $0x718] sm:$0xff]  }
  0xd6   : > { %12379 = vmatprep.subr.bf16.mxu0 %v13782_v54  ;;  %v13831_v54 = vld [vmem:[%s14542_s11 + $0x720] sm:$0xff]  }
  0xd7   : > { %12372 = vmatpush3.bf16.msra.mxu1 %v13781_v52  ;;  %v13829_v52 = vld [vmem:[%s14542_s11 + $0x798] sm:$0xff]  }
  0xd8   : > { %7733 = vmatmul.mubr.bf16.vlgmr.msra.gmra.mrb[20].mxu0 %v2016_v53  ;;  %12401 = vmatprep.subr.bf16.mxu1 %v13784_v56  ;;  %v13830_v53 = vld [vmem:[%s14542_s11 + $0x760] sm:$0xff]  }
  0xd9   : > { %12380 = vmatpush3.bf16.msra.mxu0 %v13783_v55  ;;  %7812 = vmatprep.mubr.bf16.mxu0 %v2072_v26  ;;  %v13832_v55 = vld [vmem:[%s14542_s11 + $0x7e0] sm:$0xff]   ;;  %v13855_v26 = vld [vmem:[%s14542_s11 + $0x850] sm:$0xff]  }
  0xda   : > { %7773 = vmatmul.mubr.bf16.vlgmr.msra.gmra.mrb[20].mxu1 %v2032_v58  ;;  %12381 = vmatprep.subr.bf16.mxu0 %v13786_v59  ;;  %v13833_v56 = vld [vmem:[%s14542_s11 + $0x7a0] sm:$0xff]   ;;  %v13835_v58 = vld [vmem:[%s14542_s11 + $0x728] sm:$0xff]  }
  0xdb   : > { %12402 = vmatpush3.bf16.msra.mxu1 %v13785_v57  ;;  %7852 = vmatprep.mubr.bf16.mxu1 %v2082_v30  ;;  %v13834_v57 = vld [vmem:[%s14542_s11 + $0x768] sm:$0xff]   ;;  %v13859_v30 = vld [vmem:[%s14542_s11 + $0x858] sm:$0xff]  }
  0xdc   : > { %12403 = vmatprep.subr.bf16.mxu1 %v13788_v61  ;;  %v13836_v59 = vld [vmem:[%s14542_s11 + $0x7e8] sm:$0xff]   ;;  %v13838_v61 = vld [vmem:[%s14542_s11 + $0x770] sm:$0xff]  }
  0xdd   : > { %12382 = vmatpush3.bf16.msra.mxu0 %v13787_v60  ;;  %v13837_v60 = vld [vmem:[%s14542_s11 + $0x7a8] sm:$0xff]  }
  0xde   : > { %12383 = vmatprep.subr.bf16.mxu0 %v13790_v63  ;;  %v13839_v63 = vld [vmem:[%s14542_s11 + $0x730] sm:$0xff]  }
  0xdf   : > { %12404 = vmatpush3.bf16.msra.mxu1 %v13789_v62 }
  0xe0   : > { %12405 = vmatprep.subr.bf16.mxu1 %v13792_v1  ;;  %v13840_v1 = vld [vmem:[%s14542_s11 + $0x7f0] sm:$0xff]  }
  0xe1   : > { %12384 = vmatpush3.bf16.msra.mxu0 %v13791_v0 }
  0xe2   : > { %12385 = vmatprep.subr.bf16.mxu0 %v13794_v3 }
  0xe3   : > { %12406 = vmatpush3.bf16.msra.mxu1 %v13793_v2 }
  0xe4   : > { %12407 = vmatprep.subr.bf16.mxu1 %v13796_v5  ;;  %v13841_v5 = vld [vmem:[%s14542_s11 + $0x7b0] sm:$0xff]  }
  0xe5   : > { %12386 = vmatpush3.bf16.msra.mxu0 %v13795_v4 }
  0xe6   : > { %12387 = vmatprep.subr.bf16.mxu0 %v13798_v7 }
  0xe7   : > { %12408 = vmatpush3.bf16.msra.mxu1 %v13797_v6  ;;  %v13842_v6 = vld [vmem:[%s14542_s11 + $0x778] sm:$0xff]  }
  0xe8   : > { %12409 = vmatprep.subr.bf16.mxu1 %v13800_v9 }
  0xe9   : > { %12388 = vmatpush3.bf16.msra.mxu0 %v13799_v8 }
  0xea   : > { %12389 = vmatprep.subr.bf16.mxu0 %v13802_v11 }
  0xeb   : > { %12410 = vmatpush3.bf16.msra.mxu1 %v13801_v10  ;;  %v13843_v10 = vld [vmem:[%s14542_s11 + $0x738] sm:$0xff]  }
  0xec   : > { %12411 = vmatprep.subr.bf16.mxu1 %v13804_v13 }
  0xed   : > { %12390 = vmatpush3.bf16.msra.mxu0 %v13803_v12  ;;  %v13844_v12 = vld [vmem:[%s14542_s11 + $0x7f8] sm:$0xff]  }
  0xee   : > { %12391 = vmatprep.subr.bf16.mxu0 %v13806_v15  ;;  %v13846_v15 = vld [vmem:[%s14542_s11 + $0x7b8] sm:$0xff]  }
  0xef   : > { %12412 = vmatpush3.bf16.msra.mxu1 %v13805_v14 }
  0xf0   : > { %12413 = vmatprep.subr.bf16.mxu1 %v13808_v20  ;;  %v13850_v20 = vld [vmem:[%s14542_s11 + $0x880] sm:$0xff]  }
  0xf1   : > { %12392 = vmatpush3.bf16.msra.mxu0 %v13807_v17  ;;  %v13847_v17 = vld [vmem:[%s14542_s11 + $0x840] sm:$0xff]  }
  0xf2   : > { %12393 = vmatprep.subr.bf16.mxu0 %v13810_v24  ;;  %v13852_v24 = vld [vmem:[%s14542_s11 + $0x808] sm:$0xff]  }
  0xf3   : > { %12414 = vmatpush3.bf16.msra.mxu1 %v13809_v21  ;;  %v2081_v21 = vcombine.high %v2065_v16, %v2065_v16 }
  0xf4   : > { %12415 = vmatprep.subr.bf16.mxu1 %v13812_v28  ;;  %v13857_v28 = vld [vmem:[%s14542_s11 + $0x8d0] sm:$0xff]  }
  0xf5   : > { %12394 = vmatpush3.bf16.msra.mxu0 %v13811_v25  ;;  %v13854_v25 = vld [vmem:[%s14542_s11 + $0x888] sm:$0xff]  }
  0xf6   : > { %12423 = vmatprep.subr.bf16.mxu0 %v13814_v32  ;;  %v13861_v32 = vld [vmem:[%s14542_s11 + $0x8d8] sm:$0xff]  }
  0xf7   : > { %12416 = vmatpush3.bf16.msra.mxu1 %v13813_v29  ;;  %v13858_v29 = vld [vmem:[%s14542_s11 + $0x890] sm:$0xff]  }
  0xf8   : > { %7813 = vmatmul.mubr.bf16.vlgmr.msra.gmra.mrb[24].mxu0 %v2058_v31  ;;  %12445 = vmatprep.subr.bf16.mxu1 %v13816_v36  ;;  %v13860_v31 = vld [vmem:[%s14542_s11 + $0x818] sm:$0xff]   ;;  %v13864_v36 = vld [vmem:[%s14542_s11 + $0x820] sm:$0xff]  }
  0xf9   : > { %12424 = vmatpush3.bf16.msra.mxu0 %v13815_v33  ;;  %7892 = vmatprep.mubr.bf16.mxu0 %v2079_v35  ;;  %v13862_v33 = vld [vmem:[%s14542_s11 + $0x898] sm:$0xff]   ;;  %v13863_v35 = vld [vmem:[%s14542_s11 + $0x860] sm:$0xff]  }
  0xfa   : > { %7853 = vmatmul.mubr.bf16.vlgmr.msra.gmra.mrb[24].mxu1 %v2080_v38  ;;  %12425 = vmatprep.subr.bf16.mxu0 %v13818_v39  ;;  %v13866_v38 = vld [vmem:[%s14542_s11 + $0x8a0] sm:$0xff]   ;;  %v13867_v39 = vld [vmem:[%s14542_s11 + $0x868] sm:$0xff]  }
  0xfb   : > { %12446 = vmatpush3.bf16.msra.mxu1 %v13817_v37  ;;  %7932 = vmatprep.mubr.bf16.mxu1 %v2083_v41  ;;  %v13865_v37 = vld [vmem:[%s14542_s11 + $0x8e0] sm:$0xff]   ;;  %v13869_v41 = vld [vmem:[%s14542_s11 + $0x8e8] sm:$0xff]  }
  0xfc   : > { %12447 = vmatprep.subr.bf16.mxu1 %v13820_v43  ;;  %v13870_v43 = vld [vmem:[%s14542_s11 + $0x8a8] sm:$0xff]  }
  0xfd   : > { %12426 = vmatpush3.bf16.msra.mxu0 %v13819_v40  ;;  %v13868_v40 = vld [vmem:[%s14542_s11 + $0x828] sm:$0xff]  }
  0xfe   : > { %12427 = vmatprep.subr.bf16.mxu0 %v13822_v45  ;;  %v298_v45 = vld [vmem:[%s14537_s30 + $0x20] sm:$0xff] }
  0xff   : > { %12448 = vmatpush3.bf16.msra.mxu1 %v13821_v44  ;;  %v13871_v44 = vld [vmem:[%s14542_s11 + $0x870] sm:$0xff]  }
 0x100   : > { %12449 = vmatprep.subr.bf16.mxu1 %v13824_v47  ;;  %v13872_v47 = vld [vmem:[%s14542_s11 + $0x830] sm:$0xff]  }
 0x101   : > { %12428 = vmatpush3.bf16.msra.mxu0 %v13823_v46 }
 0x102   : > { %12429 = vmatprep.subr.bf16.mxu0 %v13826_v49  ;;  %v2084_v49 = vcombine.high %v298_v45, %v298_v45 }
 0x103   : > { %12450 = vmatpush3.bf16.msra.mxu1 %v13825_v48  ;;  %v2091_v48 = vrot.slane %v298_v45, %v14583_v42 }
 0x104   : > { %12451 = vmatprep.subr.bf16.mxu1 %v13828_v51  ;;  %v13873_v51 = vld [vmem:[%s14542_s11 + $0x8f0] sm:$0xff]  }
 0x105   : > { %12430 = vmatpush3.bf16.msra.mxu0 %v13827_v50 }
 0x106   : > { %12431 = vmatprep.subr.bf16.mxu0 %v13830_v53 }
 0x107   : > { %12452 = vmatpush3.bf16.msra.mxu1 %v13829_v52 }
 0x108   : > { %12453 = vmatprep.subr.bf16.mxu1 %v13832_v55  ;;  %v2099_v55 = vcombine.high %v2091_v48, %v2091_v48 }
 0x109   : > { %12432 = vmatpush3.bf16.msra.mxu0 %v13831_v54 }
 0x10a   : > { %12433 = vmatprep.subr.bf16.mxu0 %v13834_v57 }
 0x10b   : > { %v12131_v62 = vpop.f32.mrb[0].mxu0  ;;  %12454 = vmatpush3.bf16.msra.mxu1 %v13833_v56  ;;  %v14886_v56 = vrot.slane %v2084_v49, %v14583_v42 }
 0x10c   : > { %v12132_v0 = vpop.f32.mrb[1].mxu0  ;;  %12455 = vmatprep.subr.bf16.mxu1 %v13836_v59  ;;  %v12153_v2 = vpop.f32.mrb[0].mxu1  ;;  %v13874_v59 = vld [vmem:[%s14542_s11 + $0x8b0] sm:$0xff]  }
 0x10d   : > { %v12133_v3 = vadd.f32 %v12132_v0, %v12131_v62  ;;  %v12134_v4 = vpop.f32.mrb[2].mxu0  ;;  %12434 = vmatpush3.bf16.msra.mxu0 %v13835_v58  ;;  %v12154_v7 = vpop.f32.mrb[1].mxu1  ;;  %v2121_v0 = vrot.slane %v2099_v55, %v14583_v42 }
 0x10e   : > { %v12135_v8 = vpop.f32.mrb[3].mxu0  ;;  %12435 = vmatprep.subr.bf16.mxu0 %v13838_v61  ;;  %v12155_v9 = vadd.f32 %v12154_v7, %v12153_v2  ;;  %v12156_v11 = vpop.f32.mrb[2].mxu1 }
 0x10f   : > { %12456 = vmatpush3.bf16.msra.mxu1 %v13837_v60  ;;  %v12157_v13 = vpop.f32.mrb[3].mxu1  ;;  %v13875_v60 = vld [vmem:[%s14542_s11 + $0x878] sm:$0xff]   ;;  %v2107_v8 = vrot.slane %v2091_v48, %v14583_v42 }
 0x110   : > { %12457 = vmatprep.subr.bf16.mxu1 %v13840_v1  ;;  %v14851_v14 = vadd.f32 %v12155_v9, %v12133_v3  ;;  %v13877_v1 = vld [vmem:[%s14542_s11 + $0x8f8] sm:$0xff]   ;;  %v2100_v3 = vcombine.high %v14886_v56, %v14886_v56  ;;  %v13879_v9 = vld [vmem:[%s14542_s11 + $0x940] sm:$0xff]  }
 0x111   : > { %12436 = vmatpush3.bf16.msra.mxu0 %v13839_v63  ;;  %v13876_v63 = vld [vmem:[%s14542_s11 + $0x838] sm:$0xff]   ;;  %v13882_v13 = vld [vmem:[%s14542_s11 + $0x980] sm:$0xff]  }
 0x112   : > { %12437 = vmatprep.subr.bf16.mxu0 %v13842_v6  ;;  %v2131_v6 = vcombine.high %v2121_v0, %v2121_v0  ;;  %v2128_v11 = vrot.slane %v2100_v3, %v14583_v42  ;;  %v13919_v3 = vld [vmem:[%s14542_s11 + $0xa88] sm:$0xff]  }
 0x113   : > { %12458 = vmatpush3.bf16.msra.mxu1 %v13841_v5  ;;  %v13878_v5 = vld [vmem:[%s14542_s11 + $0x8b8] sm:$0xff]  }
 0x114   : > { %12459 = vmatprep.subr.bf16.mxu1 %v13844_v12  ;;  %v13881_v12 = vld [vmem:[%s14542_s11 + $0x9c0] sm:$0xff]  }
 0x115   : > { %12438 = vmatpush3.bf16.msra.mxu0 %v13843_v10  ;;  %v13880_v10 = vld [vmem:[%s14542_s11 + $0x900] sm:$0xff]  }
 0x116   : > { %12467 = vmatprep.subr.bf16.mxu0 %v13847_v17  ;;  %v2132_v17 = vcombine.high %v2128_v11, %v2128_v11 }
 0x117   : > { %12460 = vmatpush3.bf16.msra.mxu1 %v13846_v15  ;;  %v13883_v15 = vld [vmem:[%s14542_s11 + $0x948] sm:$0xff]  }
 0x118   : > { %7893 = vmatmul.mubr.bf16.vlgmr.msra.gmra.mrb[28].mxu0 %v2065_v16  ;;  %12489 = vmatprep.subr.bf16.mxu1 %v13849_v19  ;;  %v13884_v16 = vld [vmem:[%s14542_s11 + $0x908] sm:$0xff]  }
 0x119   : > { %12468 = vmatpush3.bf16.msra.mxu0 %v13848_v18  ;;  %7972 = vmatprep.mubr.bf16.mxu0 %v2121_v0  ;;  %v13885_v18 = vld [vmem:[%s14542_s11 + $0x9c8] sm:$0xff]  }
 0x11a   : > { %7933 = vmatmul.mubr.bf16.vlgmr.msra.gmra.mrb[28].mxu1 %v2081_v21  ;;  %12469 = vmatprep.subr.bf16.mxu0 %v13851_v22  ;;  %v13886_v19 = vld [vmem:[%s14542_s11 + $0x988] sm:$0xff]   ;;  %v13888_v21 = vld [vmem:[%s14542_s11 + $0x910] sm:$0xff]  }
 0x11b   : > { %12490 = vmatpush3.bf16.msra.mxu1 %v13850_v20  ;;  %8012 = vmatprep.mubr.bf16.mxu1 %v2131_v6  ;;  %v13887_v20 = vld [vmem:[%s14542_s11 + $0x950] sm:$0xff]  }
 0x11c   : > { %12491 = vmatprep.subr.bf16.mxu1 %v13853_v23  ;;  %v13889_v22 = vld [vmem:[%s14542_s11 + $0x9d0] sm:$0xff]   ;;  %v13891_v23 = vld [vmem:[%s14542_s11 + $0x958] sm:$0xff]  }
 0x11d   : > { %12470 = vmatpush3.bf16.msra.mxu0 %v13852_v24  ;;  %v13890_v24 = vld [vmem:[%s14542_s11 + $0x990] sm:$0xff]  }
 0x11e   : > { %12471 = vmatprep.subr.bf16.mxu0 %v13855_v26  ;;  %v13893_v26 = vld [vmem:[%s14542_s11 + $0x9d8] sm:$0xff]   ;;  %v13922_v6 = vld [vmem:[%s14542_s11 + $0xad0] sm:$0xff]  }
 0x11f   : > { %12492 = vmatpush3.bf16.msra.mxu1 %v13854_v25  ;;  %v13892_v25 = vld [vmem:[%s14542_s11 + $0x918] sm:$0xff]  }
 0x120   : > { %12493 = vmatprep.subr.bf16.mxu1 %v13857_v28  ;;  %v13895_v28 = vld [vmem:[%s14542_s11 + $0x960] sm:$0xff]  }
 0x121   : > { %12472 = vmatpush3.bf16.msra.mxu0 %v13856_v27  ;;  %v13894_v27 = vld [vmem:[%s14542_s11 + $0x998] sm:$0xff]  }
 0x122   : > { %12473 = vmatprep.subr.bf16.mxu0 %v13859_v30  ;;  %v13897_v30 = vld [vmem:[%s14542_s11 + $0x9e0] sm:$0xff]  }
 0x123   : > { %12494 = vmatpush3.bf16.msra.mxu1 %v13858_v29  ;;  %v13896_v29 = vld [vmem:[%s14542_s11 + $0x920] sm:$0xff]  }
 0x124   : > { %12495 = vmatprep.subr.bf16.mxu1 %v13861_v32  ;;  %v13899_v32 = vld [vmem:[%s14542_s11 + $0x968] sm:$0xff]  }
 0x125   : > { %12474 = vmatpush3.bf16.msra.mxu0 %v13860_v31  ;;  %v13898_v31 = vld [vmem:[%s14542_s11 + $0x9a0] sm:$0xff]  }
 0x126   : > { %12475 = vmatprep.subr.bf16.mxu0 %v13863_v35  ;;  %v13901_v35 = vld [vmem:[%s14542_s11 + $0x9e8] sm:$0xff]  }
 0x127   : > { %12496 = vmatpush3.bf16.msra.mxu1 %v13862_v33  ;;  %v13900_v33 = vld [vmem:[%s14542_s11 + $0x928] sm:$0xff]  }
 0x128   : > { %12497 = vmatprep.subr.bf16.mxu1 %v13865_v37  ;;  %v13903_v37 = vld [vmem:[%s14542_s11 + $0x970] sm:$0xff]  }
 0x129   : > { %12476 = vmatpush3.bf16.msra.mxu0 %v13864_v36  ;;  %v13902_v36 = vld [vmem:[%s14542_s11 + $0x9a8] sm:$0xff]  }
 0x12a   : > { %12477 = vmatprep.subr.bf16.mxu0 %v13867_v39  ;;  %v13904_v39 = vld [vmem:[%s14542_s11 + $0x930] sm:$0xff]  }
 0x12b   : > { %v12175_v46 = vpop.f32.mrb[4].mxu0  ;;  %12498 = vmatpush3.bf16.msra.mxu1 %v13866_v38 }
 0x12c   : > { %v12176_v50 = vpop.f32.mrb[5].mxu0  ;;  %12499 = vmatprep.subr.bf16.mxu1 %v13869_v41  ;;  %v12197_v54 = vpop.f32.mrb[4].mxu1  ;;  %v13905_v41 = vld [vmem:[%s14542_s11 + $0x9f0] sm:$0xff]  }
 0x12d   : > { %v12177_v52 = vadd.f32 %v12176_v50, %v12175_v46  ;;  %v12178_v53 = vpop.f32.mrb[6].mxu0  ;;  %12478 = vmatpush3.bf16.msra.mxu0 %v13868_v40  ;;  %v12198_v58 = vpop.f32.mrb[5].mxu1  ;;  %v13906_v46 = vld [vmem:[%s14542_s11 + $0x9b0] sm:$0xff]  }
 0x12e   : > { %v12179_v57 = vpop.f32.mrb[7].mxu0  ;;  %12479 = vmatprep.subr.bf16.mxu0 %v13871_v44  ;;  %v12199_v62 = vadd.f32 %v12198_v58, %v12197_v54  ;;  %v12200_v2 = vpop.f32.mrb[6].mxu1  ;;  %v13909_v54 = vld [vmem:[%s14542_s11 + $0x9f8] sm:$0xff]  }
 0x12f   : > { %v7415_v61 = vadd.f32 %v12177_v52, %v14851_v14  ;;  %12500 = vmatpush3.bf16.msra.mxu1 %v13870_v43  ;;  %v12201_v7 = vpop.f32.mrb[7].mxu1  ;;  %v2129_v14 = vcombine.high %v2107_v8, %v2107_v8  ;;  %v13908_v52 = vld [vmem:[%s14542_s11 + $0x938] sm:$0xff]   ;;  %v13917_v2 = vld [vmem:[%s14542_s11 + $0xa08] sm:$0xff]  }
 0x130   : > { %12501 = vmatprep.subr.bf16.mxu1 %v13873_v51  ;;  %v13911_v58 = vld [vmem:[%s14542_s11 + $0x9b8] sm:$0xff]   ;;  %v13923_v7 = vld [vmem:[%s14542_s11 + $0xa90] sm:$0xff]  }
 0x131   : > { %v14896_v4 = vadd.f32 %v12199_v62, %v7415_v61  ;;  %12480 = vmatpush3.bf16.msra.mxu0 %v13872_v47  ;;  %v13907_v47 = vld [vmem:[%s14542_s11 + $0x978] sm:$0xff]   ;;  %v13913_v61 = vld [vmem:[%s14542_s11 + $0xa00] sm:$0xff]  }
 0x132   : > { %12481 = vmatprep.subr.bf16.mxu0 %v13875_v60  ;;  %v13912_v60 = vld [vmem:[%s14542_s11 + $0xa40] sm:$0xff]  }
 0x133   : > { %12502 = vmatpush3.bf16.msra.mxu1 %v13874_v59  ;;  %v2114_v59 = vrot.slane %v14886_v56, %v14583_v42  ;;  %v13914_v62 = vld [vmem:[%s14542_s11 + $0xac0] sm:$0xff]   ;;  %v13918_v56 = vld [vmem:[%s14542_s11 + $0xac8] sm:$0xff]  }
 0x134   : > { %12503 = vmatprep.subr.bf16.mxu1 %v13877_v1  ;;  %v13916_v1 = vld [vmem:[%s14542_s11 + $0xa48] sm:$0xff]  }
 0x135   : > { %12482 = vmatpush3.bf16.msra.mxu0 %v13876_v63  ;;  %v13915_v63 = vld [vmem:[%s14542_s11 + $0xa80] sm:$0xff]   ;;  %v2130_v0 = vcombine.high %v2114_v59, %v2114_v59 }
 0x136   : > { %12511 = vmatprep.subr.bf16.mxu0 %v13879_v9  ;;  %v13925_v9 = vld [vmem:[%s14542_s11 + $0xa18] sm:$0xff]  }
 0x137   : > { %12504 = vmatpush3.bf16.msra.mxu1 %v13878_v5  ;;  %v13921_v5 = vld [vmem:[%s14542_s11 + $0xa10] sm:$0xff]  }
 0x138   : > { %7973 = vmatmul.mubr.bf16.vlgmr.msra.gmra.mrb[32].mxu0 %v2107_v8  ;;  %12533 = vmatprep.subr.bf16.mxu1 %v13881_v12  ;;  %v13924_v8 = vld [vmem:[%s14542_s11 + $0xa58] sm:$0xff]   ;;  %v13928_v12 = vld [vmem:[%s14542_s11 + $0xa60] sm:$0xff]  }
 0x139   : > { %12512 = vmatpush3.bf16.msra.mxu0 %v13880_v10  ;;  %8052 = vmatprep.mubr.bf16.mxu0 %v2128_v11  ;;  %v13926_v10 = vld [vmem:[%s14542_s11 + $0xad8] sm:$0xff]  }
 0x13a   : > { %8013 = vmatmul.mubr.bf16.vlgmr.msra.gmra.mrb[32].mxu1 %v2129_v14  ;;  %12513 = vmatprep.subr.bf16.mxu0 %v13883_v15  ;;  %v13927_v11 = vld [vmem:[%s14542_s11 + $0xa98] sm:$0xff]   ;;  %v13930_v14 = vld [vmem:[%s14542_s11 + $0xae0] sm:$0xff]  }
 0x13b   : > { %12534 = vmatpush3.bf16.msra.mxu1 %v13882_v13  ;;  %8092 = vmatprep.mubr.bf16.mxu1 %v2132_v17  ;;  %v13929_v13 = vld [vmem:[%s14542_s11 + $0xa20] sm:$0xff]   ;;  %v13933_v17 = vld [vmem:[%s14542_s11 + $0xa28] sm:$0xff]  }
 0x13c   : > { %12535 = vmatprep.subr.bf16.mxu1 %v13885_v18  ;;  %v13931_v15 = vld [vmem:[%s14542_s11 + $0xaa0] sm:$0xff]   ;;  %v13934_v18 = vld [vmem:[%s14542_s11 + $0xae8] sm:$0xff]  }
 0x13d   : > { %12514 = vmatpush3.bf16.msra.mxu0 %v13884_v16  ;;  %v13932_v16 = vld [vmem:[%s14542_s11 + $0xa68] sm:$0xff]  }
 0x13e   : > { %12515 = vmatprep.subr.bf16.mxu0 %v13887_v20  ;;  %v13936_v20 = vld [vmem:[%s14542_s11 + $0xa70] sm:$0xff]  }
 0x13f   : > { %12536 = vmatpush3.bf16.msra.mxu1 %v13886_v19  ;;  %v13935_v19 = vld [vmem:[%s14542_s11 + $0xaa8] sm:$0xff]  }
 0x140   : > { %12537 = vmatprep.subr.bf16.mxu1 %v13889_v22  ;;  %v13937_v22 = vld [vmem:[%s14542_s11 + $0xa30] sm:$0xff]  }
 0x141   : > { %12516 = vmatpush3.bf16.msra.mxu0 %v13888_v21 }
 0x142   : > { %12517 = vmatprep.subr.bf16.mxu0 %v13891_v23 }
 0x143   : > { %12538 = vmatpush3.bf16.msra.mxu1 %v13890_v24  ;;  %v299_v24 = vld [vmem:[%s14537_s30 + $0x28] sm:$0xff] }
 0x144   : > { %12539 = vmatprep.subr.bf16.mxu1 %v13893_v26  ;;  %v2140_v26 = vrot.slane %v299_v24, %v14583_v42 }
 0x145   : > { %12518 = vmatpush3.bf16.msra.mxu0 %v13892_v25  ;;  %v13938_v25 = vld [vmem:[%s14542_s11 + $0xaf0] sm:$0xff]  }
 0x146   : > { %12519 = vmatprep.subr.bf16.mxu0 %v13895_v28 }
 0x147   : > { %12540 = vmatpush3.bf16.msra.mxu1 %v13894_v27  ;;  %v2133_v27 = vcombine.high %v299_v24, %v299_v24  ;;  %v13972_v24 = vld [vmem:[%s14542_s11 + $0xb78] sm:$0xff]  }
 0x148   : > { %12541 = vmatprep.subr.bf16.mxu1 %v13897_v30 }
 0x149   : > { %12520 = vmatpush3.bf16.msra.mxu0 %v13896_v29 }
 0x14a   : > { %12521 = vmatprep.subr.bf16.mxu0 %v13899_v32 }
 0x14b   : > { %v12219_v38 = vpop.f32.mrb[8].mxu0  ;;  %12542 = vmatpush3.bf16.msra.mxu1 %v13898_v31 }
 0x14c   : > { %v12220_v40 = vpop.f32.mrb[9].mxu0  ;;  %12543 = vmatprep.subr.bf16.mxu1 %v13901_v35  ;;  %v13940_v35 = vld [vmem:[%s14542_s11 + $0xa78] sm:$0xff]  }
 0x14d   : > { %v12221_v43 = vadd.f32 %v12220_v40, %v12219_v38  ;;  %v12222_v44 = vpop.f32.mrb[10].mxu0  ;;  %v12241_v45 = vpop.f32.mrb[8].mxu1  ;;  %12522 = vmatpush3.bf16.msra.mxu0 %v13900_v33  ;;  %v13939_v33 = vld [vmem:[%s14542_s11 + $0xab0] sm:$0xff]   ;;  %v13941_v40 = vld [vmem:[%s14542_s11 + $0xa38] sm:$0xff]  }
 0x14e   : > { %v12223_v48 = vpop.f32.mrb[11].mxu0  ;;  %v12242_v49 = vpop.f32.mrb[9].mxu1  ;;  %12523 = vmatprep.subr.bf16.mxu0 %v13903_v37  ;;  %v14970_v37 = vrot.slane %v2133_v27, %v14583_v42 }
 0x14f   : > { %v7495_v50 = vadd.f32 %v12221_v43, %v14896_v4  ;;  %v12243_v51 = vadd.f32 %v12242_v49, %v12241_v45  ;;  %12544 = vmatpush3.bf16.msra.mxu1 %v13902_v36  ;;  %v12244_v53 = vpop.f32.mrb[10].mxu1  ;;  %v13920_v4 = vld [vmem:[%s14542_s11 + $0xa50] sm:$0xff]   ;;  %v2148_v36 = vcombine.high %v2140_v26, %v2140_v26  ;;  %v2156_v49 = vrot.slane %v2140_v26, %v14583_v42 }
 0x150   : > { %12545 = vmatprep.subr.bf16.mxu1 %v13905_v41  ;;  %v12245_v55 = vpop.f32.mrb[11].mxu1  ;;  %v13942_v41 = vld [vmem:[%s14542_s11 + $0xaf8] sm:$0xff]   ;;  %v2149_v45 = vcombine.high %v14970_v37, %v14970_v37 }
 0x151   : > { %v14933_v57 = vadd.f32 %v12243_v51, %v7495_v50  ;;  %12524 = vmatpush3.bf16.msra.mxu0 %v13904_v39  ;;  %v2170_v43 = vrot.slane %v2148_v36, %v14583_v42  ;;  %v13944_v50 = vld [vmem:[%s14542_s11 + $0xb40] sm:$0xff]  }
 0x152   : > { %12525 = vmatprep.subr.bf16.mxu0 %v13907_v47  ;;  %v13943_v47 = vld [vmem:[%s14542_s11 + $0xab8] sm:$0xff]   ;;  %v2177_v53 = vrot.slane %v2149_v45, %v14583_v42  ;;  %v13947_v55 = vld [vmem:[%s14542_s11 + $0xb80] sm:$0xff]   ;;  %v13984_v45 = vld [vmem:[%s14542_s11 + $0xc88] sm:$0xff]  }
 0x153   : > { %12546 = vmatpush3.bf16.msra.mxu1 %v13906_v46  ;;  %v2180_v51 = vcombine.high %v2170_v43, %v2170_v43  ;;  %v13977_v36 = vld [vmem:[%s14542_s11 + $0xc40] sm:$0xff]  }
 0x154   : > { %12547 = vmatprep.subr.bf16.mxu1 %v13909_v54  ;;  %v13946_v54 = vld [vmem:[%s14542_s11 + $0xbc0] sm:$0xff]  }
 0x155   : > { %12526 = vmatpush3.bf16.msra.mxu0 %v13908_v52  ;;  %v13945_v52 = vld [vmem:[%s14542_s11 + $0xb00] sm:$0xff]  }
 0x156   : > { %12555 = vmatprep.subr.bf16.mxu0 %v13912_v60  ;;  %v2181_v60 = vcombine.high %v2177_v53, %v2177_v53 }
 0x157   : > { %12548 = vmatpush3.bf16.msra.mxu1 %v13911_v58  ;;  %v13948_v58 = vld [vmem:[%s14542_s11 + $0xb48] sm:$0xff]  }
 0x158   : > { %8053 = vmatmul.mubr.bf16.vlgmr.msra.gmra.mrb[36].mxu0 %v2114_v59  ;;  %12577 = vmatprep.subr.bf16.mxu1 %v13914_v62  ;;  %v13949_v59 = vld [vmem:[%s14542_s11 + $0xb08] sm:$0xff]  }
 0x159   : > { %12556 = vmatpush3.bf16.msra.mxu0 %v13913_v61  ;;  %8132 = vmatprep.mubr.bf16.mxu0 %v2170_v43  ;;  %v13950_v61 = vld [vmem:[%s14542_s11 + $0xbc8] sm:$0xff]  }
 0x15a   : > { %8093 = vmatmul.mubr.bf16.vlgmr.msra.gmra.mrb[36].mxu1 %v2130_v0  ;;  %12557 = vmatprep.subr.bf16.mxu0 %v13916_v1  ;;  %v13951_v62 = vld [vmem:[%s14542_s11 + $0xb88] sm:$0xff]   ;;  %v13953_v0 = vld [vmem:[%s14542_s11 + $0xb10] sm:$0xff]  }
 0x15b   : > { %12578 = vmatpush3.bf16.msra.mxu1 %v13915_v63  ;;  %8172 = vmatprep.mubr.bf16.mxu1 %v2180_v51  ;;  %v13952_v63 = vld [vmem:[%s14542_s11 + $0xb50] sm:$0xff]   ;;  %v13981_v43 = vld [vmem:[%s14542_s11 + $0xc48] sm:$0xff]   ;;  %v13990_v51 = vld [vmem:[%s14542_s11 + $0xc18] sm:$0xff]  }
 0x15c   : > { %12579 = vmatprep.subr.bf16.mxu1 %v13918_v56  ;;  %v13954_v1 = vld [vmem:[%s14542_s11 + $0xbd0] sm:$0xff]   ;;  %v13956_v56 = vld [vmem:[%s14542_s11 + $0xb58] sm:$0xff]  }
 0x15d   : > { %12558 = vmatpush3.bf16.msra.mxu0 %v13917_v2  ;;  %v13955_v2 = vld [vmem:[%s14542_s11 + $0xb90] sm:$0xff]  }
 0x15e   : > { %12559 = vmatprep.subr.bf16.mxu0 %v13920_v4  ;;  %v13958_v4 = vld [vmem:[%s14542_s11 + $0xbd8] sm:$0xff]  }
 0x15f   : > { %12580 = vmatpush3.bf16.msra.mxu1 %v13919_v3  ;;  %v13957_v3 = vld [vmem:[%s14542_s11 + $0xb18] sm:$0xff]  }
 0x160   : > { %12581 = vmatprep.subr.bf16.mxu1 %v13922_v6  ;;  %v13960_v6 = vld [vmem:[%s14542_s11 + $0xb60] sm:$0xff]  }
 0x161   : > { %12560 = vmatpush3.bf16.msra.mxu0 %v13921_v5  ;;  %v13959_v5 = vld [vmem:[%s14542_s11 + $0xb98] sm:$0xff]  }
 0x162   : > { %12561 = vmatprep.subr.bf16.mxu0 %v13924_v8  ;;  %v13962_v8 = vld [vmem:[%s14542_s11 + $0xbe0] sm:$0xff]  }
 0x163   : > { %12582 = vmatpush3.bf16.msra.mxu1 %v13923_v7  ;;  %v13961_v7 = vld [vmem:[%s14542_s11 + $0xb20] sm:$0xff]  }
 0x164   : > { %12583 = vmatprep.subr.bf16.mxu1 %v13926_v10  ;;  %v13964_v10 = vld [vmem:[%s14542_s11 + $0xb68] sm:$0xff]  }
 0x165   : > { %12562 = vmatpush3.bf16.msra.mxu0 %v13925_v9  ;;  %v13963_v9 = vld [vmem:[%s14542_s11 + $0xba0] sm:$0xff]  }
 0x166   : > { %12563 = vmatprep.subr.bf16.mxu0 %v13928_v12  ;;  %v13966_v12 = vld [vmem:[%s14542_s11 + $0xbe8] sm:$0xff]  }
 0x167   : > { %12584 = vmatpush3.bf16.msra.mxu1 %v13927_v11  ;;  %v13965_v11 = vld [vmem:[%s14542_s11 + $0xb28] sm:$0xff]  }
 0x168   : > { %12585 = vmatprep.subr.bf16.mxu1 %v13930_v14  ;;  %v13968_v14 = vld [vmem:[%s14542_s11 + $0xb70] sm:$0xff]  }
 0x169   : > { %12564 = vmatpush3.bf16.msra.mxu0 %v13929_v13  ;;  %v13967_v13 = vld [vmem:[%s14542_s11 + $0xba8] sm:$0xff]  }
 0x16a   : > { %12565 = vmatprep.subr.bf16.mxu0 %v13932_v16  ;;  %v13969_v16 = vld [vmem:[%s14542_s11 + $0xb30] sm:$0xff]  }
 0x16b   : > { %v12263_v21 = vpop.f32.mrb[12].mxu0  ;;  %12586 = vmatpush3.bf16.msra.mxu1 %v13931_v15 }
 0x16c   : > { %v12264_v23 = vpop.f32.mrb[13].mxu0  ;;  %12587 = vmatprep.subr.bf16.mxu1 %v13934_v18  ;;  %v13970_v18 = vld [vmem:[%s14542_s11 + $0xbf0] sm:$0xff]  }
 0x16d   : > { %v12265_v28 = vadd.f32 %v12264_v23, %v12263_v21  ;;  %v12266_v29 = vpop.f32.mrb[14].mxu0  ;;  %v12285_v30 = vpop.f32.mrb[12].mxu1  ;;  %12566 = vmatpush3.bf16.msra.mxu0 %v13933_v17 }
 0x16e   : > { %v12267_v31 = vpop.f32.mrb[15].mxu0  ;;  %v12286_v32 = vpop.f32.mrb[13].mxu1  ;;  %12567 = vmatprep.subr.bf16.mxu0 %v13936_v20 }
 0x16f   : > { %v7575_v38 = vadd.f32 %v12265_v28, %v14933_v57  ;;  %v12287_v39 = vadd.f32 %v12286_v32, %v12285_v30  ;;  %12588 = vmatpush3.bf16.msra.mxu1 %v13935_v19  ;;  %v12288_v44 = vpop.f32.mrb[14].mxu1  ;;  %v2178_v57 = vcombine.high %v2156_v49, %v2156_v49  ;;  %v13973_v28 = vld [vmem:[%s14542_s11 + $0xb38] sm:$0xff]  }
 0x170   : > { %12589 = vmatprep.subr.bf16.mxu1 %v13938_v25  ;;  %v12289_v48 = vpop.f32.mrb[15].mxu1  ;;  %v13974_v30 = vld [vmem:[%s14542_s11 + $0xbf8] sm:$0xff]   ;;  %v13982_v44 = vld [vmem:[%s14542_s11 + $0xc08] sm:$0xff]  }
 0x171   : > { %v14978_v46 = vadd.f32 %v12287_v39, %v7575_v38  ;;  %12568 = vmatpush3.bf16.msra.mxu0 %v13937_v22  ;;  %v13971_v22 = vld [vmem:[%s14542_s11 + $0xbb0] sm:$0xff]   ;;  %v13978_v38 = vld [vmem:[%s14542_s11 + $0xc00] sm:$0xff]  }
 0x172   : > { %12569 = vmatprep.subr.bf16.mxu0 %v13940_v35  ;;  %v2163_v35 = vrot.slane %v14970_v37, %v14583_v42  ;;  %v13979_v39 = vld [vmem:[%s14542_s11 + $0xcc0] sm:$0xff]   ;;  %v13983_v37 = vld [vmem:[%s14542_s11 + $0xcc8] sm:$0xff]   ;;  %v13987_v48 = vld [vmem:[%s14542_s11 + $0xcd0] sm:$0xff]  }
 0x173   : > { %12590 = vmatpush3.bf16.msra.mxu1 %v13939_v33  ;;  %v13976_v33 = vld [vmem:[%s14542_s11 + $0xbb8] sm:$0xff]  }
 0x174   : > { %12591 = vmatprep.subr.bf16.mxu1 %v13942_v41  ;;  %v2179_v41 = vcombine.high %v2163_v35, %v2163_v35 }
 0x175   : > { %12570 = vmatpush3.bf16.msra.mxu0 %v13941_v40  ;;  %v13980_v40 = vld [vmem:[%s14542_s11 + $0xc80] sm:$0xff]  }
 0x176   : > { %12599 = vmatprep.subr.bf16.mxu0 %v13944_v50  ;;  %v13989_v50 = vld [vmem:[%s14542_s11 + $0xc58] sm:$0xff]  }
 0x177   : > { %12592 = vmatpush3.bf16.msra.mxu1 %v13943_v47  ;;  %v13986_v47 = vld [vmem:[%s14542_s11 + $0xc10] sm:$0xff]  }
 0x178   : > { %8133 = vmatmul.mubr.bf16.vlgmr.msra.gmra.mrb[40].mxu0 %v2156_v49  ;;  %12621 = vmatprep.subr.bf16.mxu1 %v13946_v54  ;;  %v13988_v49 = vld [vmem:[%s14542_s11 + $0xc90] sm:$0xff]   ;;  %v13993_v54 = vld [vmem:[%s14542_s11 + $0xc60] sm:$0xff]  }
 0x179   : > { %12600 = vmatpush3.bf16.msra.mxu0 %v13945_v52  ;;  %8212 = vmatprep.mubr.bf16.mxu0 %v2177_v53  ;;  %v13991_v52 = vld [vmem:[%s14542_s11 + $0xcd8] sm:$0xff]  }
 0x17a   : > { %8173 = vmatmul.mubr.bf16.vlgmr.msra.gmra.mrb[40].mxu1 %v2178_v57  ;;  %12601 = vmatprep.subr.bf16.mxu0 %v13948_v58  ;;  %v13992_v53 = vld [vmem:[%s14542_s11 + $0xc98] sm:$0xff]   ;;  %v13995_v57 = vld [vmem:[%s14542_s11 + $0xce0] sm:$0xff]  }
 0x17b   : > { %12622 = vmatpush3.bf16.msra.mxu1 %v13947_v55  ;;  %8252 = vmatprep.mubr.bf16.mxu1 %v2181_v60  ;;  %v13994_v55 = vld [vmem:[%s14542_s11 + $0xc20] sm:$0xff]   ;;  %v13998_v60 = vld [vmem:[%s14542_s11 + $0xc28] sm:$0xff]  }
 0x17c   : > { %12623 = vmatprep.subr.bf16.mxu1 %v13950_v61  ;;  %v13996_v58 = vld [vmem:[%s14542_s11 + $0xca0] sm:$0xff]   ;;  %v13999_v61 = vld [vmem:[%s14542_s11 + $0xce8] sm:$0xff]  }
 0x17d   : > { %12602 = vmatpush3.bf16.msra.mxu0 %v13949_v59  ;;  %v13997_v59 = vld [vmem:[%s14542_s11 + $0xc68] sm:$0xff]  }
 0x17e   : > { %12603 = vmatprep.subr.bf16.mxu0 %v13952_v63  ;;  %v14001_v63 = vld [vmem:[%s14542_s11 + $0xc70] sm:$0xff]  }
 0x17f   : > { %12624 = vmatpush3.bf16.msra.mxu1 %v13951_v62  ;;  %v14000_v62 = vld [vmem:[%s14542_s11 + $0xca8] sm:$0xff]  }
 0x180   : > { %12625 = vmatprep.subr.bf16.mxu1 %v13954_v1  ;;  %v14002_v1 = vld [vmem:[%s14542_s11 + $0xc30] sm:$0xff]  }
 0x181   : > { %12604 = vmatpush3.bf16.msra.mxu0 %v13953_v0 }
 0x182   : > { %12605 = vmatprep.subr.bf16.mxu0 %v13956_v56  ;;  %v14003_v56 = vld [vmem:[%s14542_s11 + $0xcf0] sm:$0xff]  }
 0x183   : > { %12626 = vmatpush3.bf16.msra.mxu1 %v13955_v2 }
 0x184   : > { %12627 = vmatprep.subr.bf16.mxu1 %v13958_v4 }
 0x185   : > { %12606 = vmatpush3.bf16.msra.mxu0 %v13957_v3  ;;  %v300_v3 = vld [vmem:[%s14537_s30 + $0x30] sm:$0xff] }
 0x186   : > { %12607 = vmatprep.subr.bf16.mxu0 %v13960_v6 }
 0x187   : > { %12628 = vmatpush3.bf16.msra.mxu1 %v13959_v5 }
 0x188   : > { %12629 = vmatprep.subr.bf16.mxu1 %v13962_v8  ;;  %v2182_v8 = vcombine.high %v300_v3, %v300_v3 }
 0x189   : > { %12608 = vmatpush3.bf16.msra.mxu0 %v13961_v7  ;;  %v2189_v7 = vrot.slane %v300_v3, %v14583_v42 }
 0x18a   : > { %12609 = vmatprep.subr.bf16.mxu0 %v13964_v10 }
 0x18b   : > { %v12307_v15 = vpop.f32.mrb[16].mxu0  ;;  %12630 = vmatpush3.bf16.msra.mxu1 %v13963_v9 }
 0x18c   : > { %v12308_v17 = vpop.f32.mrb[17].mxu0  ;;  %12631 = vmatprep.subr.bf16.mxu1 %v13966_v12  ;;  %v14005_v12 = vld [vmem:[%s14542_s11 + $0xc78] sm:$0xff]  }
 0x18d   : > { %v12309_v19 = vadd.f32 %v12308_v17, %v12307_v15  ;;  %v12310_v20 = vpop.f32.mrb[18].mxu0  ;;  %v12329_v21 = vpop.f32.mrb[16].mxu1  ;;  %12610 = vmatpush3.bf16.msra.mxu0 %v13965_v11  ;;  %v14004_v11 = vld [vmem:[%s14542_s11 + $0xcb0] sm:$0xff]   ;;  %v14006_v15 = vld [vmem:[%s14542_s11 + $0xc38] sm:$0xff]  }
 0x18e   : > { %v12311_v23 = vpop.f32.mrb[19].mxu0  ;;  %v12330_v25 = vpop.f32.mrb[17].mxu1  ;;  %12611 = vmatprep.subr.bf16.mxu0 %v13968_v14  ;;  %v14007_v17 = vld [vmem:[%s14542_s11 + $0xcf8] sm:$0xff]  }
 0x18f   : > { %v7655_v26 = vadd.f32 %v12309_v19, %v14978_v46  ;;  %v12331_v27 = vadd.f32 %v12330_v25, %v12329_v21  ;;  %12632 = vmatpush3.bf16.msra.mxu1 %v13967_v13  ;;  %v12332_v29 = vpop.f32.mrb[18].mxu1  ;;  %v13985_v46 = vld [vmem:[%s14542_s11 + $0xc50] sm:$0xff]   ;;  %v15055_v19 = vrot.slane %v2182_v8, %v14583_v42  ;;  %v2205_v23 = vrot.slane %v2189_v7, %v14583_v42  ;;  %v14009_v25 = vld [vmem:[%s14542_s11 + $0xd40] sm:$0xff]   ;;  %v14039_v8 = vld [vmem:[%s14542_s11 + $0xdf8] sm:$0xff]  }
 0x190   : > { %12633 = vmatprep.subr.bf16.mxu1 %v13970_v18  ;;  %v12333_v31 = vpop.f32.mrb[19].mxu1  ;;  %v14011_v29 = vld [vmem:[%s14542_s11 + $0xdc0] sm:$0xff]  }
 0x191   : > { %v15015_v32 = vadd.f32 %v12331_v27, %v7655_v26  ;;  %12612 = vmatpush3.bf16.msra.mxu0 %v13969_v16  ;;  %v2197_v16 = vcombine.high %v2189_v7, %v2189_v7  ;;  %v2198_v26 = vcombine.high %v15055_v19, %v15055_v19  ;;  %v14012_v31 = vld [vmem:[%s14542_s11 + $0xd80] sm:$0xff]  }
 0x192   : > { %12613 = vmatprep.subr.bf16.mxu0 %v13972_v24 }
 0x193   : > { %12634 = vmatpush3.bf16.msra.mxu1 %v13971_v22  ;;  %v2219_v21 = vrot.slane %v2197_v16, %v14583_v42  ;;  %v14008_v22 = vld [vmem:[%s14542_s11 + $0xcb8] sm:$0xff]   ;;  %v14045_v16 = vld [vmem:[%s14542_s11 + $0xe80] sm:$0xff]  }
 0x194   : > { %12635 = vmatprep.subr.bf16.mxu1 %v13974_v30  ;;  %v2226_v30 = vrot.slane %v2198_v26, %v14583_v42  ;;  %v14054_v26 = vld [vmem:[%s14542_s11 + $0xe58] sm:$0xff]  }
 0x195   : > { %12614 = vmatpush3.bf16.msra.mxu0 %v13973_v28  ;;  %v2229_v27 = vcombine.high %v2219_v21, %v2219_v21  ;;  %v14010_v28 = vld [vmem:[%s14542_s11 + $0xd00] sm:$0xff]  }
 0x196   : > { %12643 = vmatprep.subr.bf16.mxu0 %v13977_v36  ;;  %v2230_v36 = vcombine.high %v2226_v30, %v2226_v30 }
 0x197   : > { %12636 = vmatpush3.bf16.msra.mxu1 %v13976_v33  ;;  %v14013_v33 = vld [vmem:[%s14542_s11 + $0xd48] sm:$0xff]  }
 0x198   : > { %8213 = vmatmul.mubr.bf16.vlgmr.msra.gmra.mrb[44].mxu0 %v2163_v35  ;;  %12665 = vmatprep.subr.bf16.mxu1 %v13979_v39  ;;  %v14014_v35 = vld [vmem:[%s14542_s11 + $0xd08] sm:$0xff]  }
 0x199   : > { %12644 = vmatpush3.bf16.msra.mxu0 %v13978_v38  ;;  %8292 = vmatprep.mubr.bf16.mxu0 %v2219_v21  ;;  %v14015_v38 = vld [vmem:[%s14542_s11 + $0xdc8] sm:$0xff]  }
 0x19a   : > { %8253 = vmatmul.mubr.bf16.vlgmr.msra.gmra.mrb[44].mxu1 %v2179_v41  ;;  %12645 = vmatprep.subr.bf16.mxu0 %v13981_v43  ;;  %v14016_v39 = vld [vmem:[%s14542_s11 + $0xd88] sm:$0xff]   ;;  %v14018_v41 = vld [vmem:[%s14542_s11 + $0xd10] sm:$0xff]  }
 0x19b   : > { %12666 = vmatpush3.bf16.msra.mxu1 %v13980_v40  ;;  %8332 = vmatprep.mubr.bf16.mxu1 %v2229_v27  ;;  %v14017_v40 = vld [vmem:[%s14542_s11 + $0xd50] sm:$0xff]   ;;  %v14049_v21 = vld [vmem:[%s14542_s11 + $0xe88] sm:$0xff]   ;;  %v14055_v27 = vld [vmem:[%s14542_s11 + $0xe18] sm:$0xff]  }
 0x19c   : > { %12667 = vmatprep.subr.bf16.mxu1 %v13983_v37  ;;  %v14019_v43 = vld [vmem:[%s14542_s11 + $0xdd0] sm:$0xff]   ;;  %v14021_v37 = vld [vmem:[%s14542_s11 + $0xd58] sm:$0xff]  }
 0x19d   : > { %12646 = vmatpush3.bf16.msra.mxu0 %v13982_v44  ;;  %v14020_v44 = vld [vmem:[%s14542_s11 + $0xd90] sm:$0xff]  }
 0x19e   : > { %12647 = vmatprep.subr.bf16.mxu0 %v13985_v46  ;;  %v14023_v46 = vld [vmem:[%s14542_s11 + $0xdd8] sm:$0xff]  }
 0x19f   : > { %12668 = vmatpush3.bf16.msra.mxu1 %v13984_v45  ;;  %v14022_v45 = vld [vmem:[%s14542_s11 + $0xd18] sm:$0xff]  }
 0x1a0   : > { %12669 = vmatprep.subr.bf16.mxu1 %v13987_v48  ;;  %v14025_v48 = vld [vmem:[%s14542_s11 + $0xd60] sm:$0xff]  }
 0x1a1   : > { %12648 = vmatpush3.bf16.msra.mxu0 %v13986_v47  ;;  %v14024_v47 = vld [vmem:[%s14542_s11 + $0xd98] sm:$0xff]  }
 0x1a2   : > { %12649 = vmatprep.subr.bf16.mxu0 %v13989_v50  ;;  %v14027_v50 = vld [vmem:[%s14542_s11 + $0xde0] sm:$0xff]  }
 0x1a3   : > { %12670 = vmatpush3.bf16.msra.mxu1 %v13988_v49  ;;  %v14026_v49 = vld [vmem:[%s14542_s11 + $0xd20] sm:$0xff]  }
 0x1a4   : > { %12671 = vmatprep.subr.bf16.mxu1 %v13991_v52  ;;  %v14029_v52 = vld [vmem:[%s14542_s11 + $0xd68] sm:$0xff]  }
 0x1a5   : > { %12650 = vmatpush3.bf16.msra.mxu0 %v13990_v51  ;;  %v14028_v51 = vld [vmem:[%s14542_s11 + $0xda0] sm:$0xff]  }
 0x1a6   : > { %12651 = vmatprep.subr.bf16.mxu0 %v13993_v54  ;;  %v14031_v54 = vld [vmem:[%s14542_s11 + $0xde8] sm:$0xff]  }
 0x1a7   : > { %12672 = vmatpush3.bf16.msra.mxu1 %v13992_v53  ;;  %v14030_v53 = vld [vmem:[%s14542_s11 + $0xd28] sm:$0xff]  }
 0x1a8   : > { %12673 = vmatprep.subr.bf16.mxu1 %v13995_v57  ;;  %v14033_v57 = vld [vmem:[%s14542_s11 + $0xd70] sm:$0xff]  }
 0x1a9   : > { %12652 = vmatpush3.bf16.msra.mxu0 %v13994_v55  ;;  %v14032_v55 = vld [vmem:[%s14542_s11 + $0xda8] sm:$0xff]  }
 0x1aa   : > { %12653 = vmatprep.subr.bf16.mxu0 %v13997_v59  ;;  %v14034_v59 = vld [vmem:[%s14542_s11 + $0xd30] sm:$0xff]  }
 0x1ab   : > { %v12351_v0 = vpop.f32.mrb[20].mxu0  ;;  %12674 = vmatpush3.bf16.msra.mxu1 %v13996_v58 }
 0x1ac   : > { %v12352_v2 = vpop.f32.mrb[21].mxu0  ;;  %12675 = vmatprep.subr.bf16.mxu1 %v13999_v61  ;;  %v14035_v61 = vld [vmem:[%s14542_s11 + $0xdf0] sm:$0xff]  }
 0x1ad   : > { %v12353_v4 = vadd.f32 %v12352_v2, %v12351_v0  ;;  %v12354_v5 = vpop.f32.mrb[22].mxu0  ;;  %v12373_v6 = vpop.f32.mrb[20].mxu1  ;;  %12654 = vmatpush3.bf16.msra.mxu0 %v13998_v60  ;;  %v14037_v2 = vld [vmem:[%s14542_s11 + $0xd78] sm:$0xff]  }
 0x1ae   : > { %v12355_v9 = vpop.f32.mrb[23].mxu0  ;;  %v12374_v10 = vpop.f32.mrb[21].mxu1  ;;  %12655 = vmatprep.subr.bf16.mxu0 %v14001_v63 }
 0x1af   : > { %v7735_v13 = vadd.f32 %v12353_v4, %v15015_v32  ;;  %v12375_v14 = vadd.f32 %v12374_v10, %v12373_v6  ;;  %12676 = vmatpush3.bf16.msra.mxu1 %v14000_v62  ;;  %v12376_v18 = vpop.f32.mrb[22].mxu1  ;;  %v2227_v32 = vcombine.high %v2205_v23, %v2205_v23  ;;  %v14038_v6 = vld [vmem:[%s14542_s11 + $0xd38] sm:$0xff]  }
 0x1b0   : > { %12677 = vmatprep.subr.bf16.mxu1 %v14003_v56  ;;  %v12377_v24 = vpop.f32.mrb[23].mxu1  ;;  %v14046_v18 = vld [vmem:[%s14542_s11 + $0xe48] sm:$0xff]  }
 0x1b1   : > { %v15057_v20 = vadd.f32 %v12375_v14, %v7735_v13  ;;  %12656 = vmatpush3.bf16.msra.mxu0 %v14002_v1  ;;  %v14036_v1 = vld [vmem:[%s14542_s11 + $0xdb0] sm:$0xff]   ;;  %v14042_v13 = vld [vmem:[%s14542_s11 + $0xe40] sm:$0xff]  }
 0x1b2   : > { %12657 = vmatprep.subr.bf16.mxu0 %v14005_v12  ;;  %v2212_v12 = vrot.slane %v15055_v19, %v14583_v42  ;;  %v14043_v14 = vld [vmem:[%s14542_s11 + $0xe00] sm:$0xff]   ;;  %v14048_v19 = vld [vmem:[%s14542_s11 + $0xec8] sm:$0xff]   ;;  %v14051_v24 = vld [vmem:[%s14542_s11 + $0xe10] sm:$0xff]  }
 0x1b3   : > { %12678 = vmatpush3.bf16.msra.mxu1 %v14004_v11  ;;  %v14041_v11 = vld [vmem:[%s14542_s11 + $0xdb8] sm:$0xff]  }
 0x1b4   : > { %12679 = vmatprep.subr.bf16.mxu1 %v14007_v17  ;;  %v2228_v17 = vcombine.high %v2212_v12, %v2212_v12 }
 0x1b5   : > { %12658 = vmatpush3.bf16.msra.mxu0 %v14006_v15  ;;  %v14044_v15 = vld [vmem:[%s14542_s11 + $0xec0] sm:$0xff]  }
 0x1b6   : > { %12687 = vmatprep.subr.bf16.mxu0 %v14009_v25  ;;  %v14053_v25 = vld [vmem:[%s14542_s11 + $0xe90] sm:$0xff]  }
 0x1b7   : > { %12680 = vmatpush3.bf16.msra.mxu1 %v14008_v22  ;;  %v14050_v22 = vld [vmem:[%s14542_s11 + $0xe50] sm:$0xff]  }
 0x1b8   : > { %8293 = vmatmul.mubr.bf16.vlgmr.msra.gmra.mrb[48].mxu0 %v2205_v23  ;;  %12709 = vmatprep.subr.bf16.mxu1 %v14011_v29  ;;  %v14052_v23 = vld [vmem:[%s14542_s11 + $0xed0] sm:$0xff]   ;;  %v14057_v29 = vld [vmem:[%s14542_s11 + $0xe98] sm:$0xff]  }
 0x1b9   : > { %12688 = vmatpush3.bf16.msra.mxu0 %v14010_v28  ;;  %8372 = vmatprep.mubr.bf16.mxu0 %v2226_v30  ;;  %v14056_v28 = vld [vmem:[%s14542_s11 + $0xed8] sm:$0xff]   ;;  %v14058_v30 = vld [vmem:[%s14542_s11 + $0xe60] sm:$0xff]  }
 0x1ba   : > { %8333 = vmatmul.mubr.bf16.vlgmr.msra.gmra.mrb[48].mxu1 %v2227_v32  ;;  %12689 = vmatprep.subr.bf16.mxu0 %v14013_v33  ;;  %v14060_v32 = vld [vmem:[%s14542_s11 + $0xee0] sm:$0xff]  }
 0x1bb   : > { %12710 = vmatpush3.bf16.msra.mxu1 %v14012_v31  ;;  %8412 = vmatprep.mubr.bf16.mxu1 %v2230_v36  ;;  %v14059_v31 = vld [vmem:[%s14542_s11 + $0xe20] sm:$0xff]   ;;  %v14063_v36 = vld [vmem:[%s14542_s11 + $0xe28] sm:$0xff]  }
 0x1bc   : > { %12711 = vmatprep.subr.bf16.mxu1 %v14015_v38  ;;  %v14061_v33 = vld [vmem:[%s14542_s11 + $0xea0] sm:$0xff]   ;;  %v14064_v38 = vld [vmem:[%s14542_s11 + $0xee8] sm:$0xff]  }
 0x1bd   : > { %12690 = vmatpush3.bf16.msra.mxu0 %v14014_v35  ;;  %v14062_v35 = vld [vmem:[%s14542_s11 + $0xe68] sm:$0xff]  }
 0x1be   : > { %12691 = vmatprep.subr.bf16.mxu0 %v14017_v40  ;;  %v14066_v40 = vld [vmem:[%s14542_s11 + $0xe70] sm:$0xff]  }
 0x1bf   : > { %12712 = vmatpush3.bf16.msra.mxu1 %v14016_v39  ;;  %v14065_v39 = vld [vmem:[%s14542_s11 + $0xea8] sm:$0xff]  }
 0x1c0   : > { %12713 = vmatprep.subr.bf16.mxu1 %v14019_v43  ;;  %v14067_v43 = vld [vmem:[%s14542_s11 + $0xe30] sm:$0xff]  }
 0x1c1   : > { %12692 = vmatpush3.bf16.msra.mxu0 %v14018_v41 }
 0x1c2   : > { %12693 = vmatprep.subr.bf16.mxu0 %v14021_v37  ;;  %v14068_v37 = vld [vmem:[%s14542_s11 + $0xef0] sm:$0xff]  }
 0x1c3   : > { %12714 = vmatpush3.bf16.msra.mxu1 %v14020_v44 }
 0x1c4   : > { %12715 = vmatprep.subr.bf16.mxu1 %v14023_v46 }
 0x1c5   : > { %12694 = vmatpush3.bf16.msra.mxu0 %v14022_v45 }
 0x1c6   : > { %12695 = vmatprep.subr.bf16.mxu0 %v14025_v48  ;;  %v14069_v48 = vld [vmem:[%s14542_s11 + $0xeb0] sm:$0xff]  }
 0x1c7   : > { %12716 = vmatpush3.bf16.msra.mxu1 %v14024_v47 }
 0x1c8   : > { %12717 = vmatprep.subr.bf16.mxu1 %v14027_v50  ;;  %v301_v50 = vld [vmem:[%s14537_s30 + $0x38] sm:$0xff] }
 0x1c9   : > { %12696 = vmatpush3.bf16.msra.mxu0 %v14026_v49  ;;  %v14070_v49 = vld [vmem:[%s14542_s11 + $0xe78] sm:$0xff]  }
 0x1ca   : > { %12697 = vmatprep.subr.bf16.mxu0 %v14029_v52 }
 0x1cb   : > { %v12395_v58 = vpop.f32.mrb[24].mxu0  ;;  %12718 = vmatpush3.bf16.msra.mxu1 %v14028_v51 }
 0x1cc   : > { %v12396_v60 = vpop.f32.mrb[25].mxu0  ;;  %12719 = vmatprep.subr.bf16.mxu1 %v14031_v54  ;;  %v2231_v54 = vcombine.high %v301_v50, %v301_v50 }
 0x1cd   : > { %v12397_v62 = vadd.f32 %v12396_v60, %v12395_v58  ;;  %v12398_v63 = vpop.f32.mrb[26].mxu0  ;;  %v12417_v0 = vpop.f32.mrb[24].mxu1  ;;  %12698 = vmatpush3.bf16.msra.mxu0 %v14030_v53  ;;  %v2238_v53 = vrot.slane %v301_v50, %v14583_v42  ;;  %v14071_v58 = vld [vmem:[%s14542_s11 + $0xe38] sm:$0xff]  }
 0x1ce   : > { %v12399_v56 = vpop.f32.mrb[27].mxu0  ;;  %v12418_v3 = vpop.f32.mrb[25].mxu1  ;;  %12699 = vmatprep.subr.bf16.mxu0 %v14033_v57  ;;  %v14072_v60 = vld [vmem:[%s14542_s11 + $0xef8] sm:$0xff]   ;;  %v15137_v63 = vrot.slane %v2231_v54, %v14583_v42 }
 0x1cf   : > { %v7815_v4 = vadd.f32 %v12397_v62, %v15057_v20  ;;  %v12419_v5 = vadd.f32 %v12418_v3, %v12417_v0  ;;  %12720 = vmatpush3.bf16.msra.mxu1 %v14032_v55  ;;  %v12420_v7 = vpop.f32.mrb[26].mxu1  ;;  %v14047_v20 = vld [vmem:[%s14542_s11 + $0xe08] sm:$0xff]   ;;  %v2254_v56 = vrot.slane %v2238_v53, %v14583_v42  ;;  %v14074_v3 = vld [vmem:[%s14542_s11 + $0xf40] sm:$0xff]   ;;  %v14104_v50 = vld [vmem:[%s14542_s11 + $0xff8] sm:$0xff]  }
 0x1d0   : > { %12721 = vmatprep.subr.bf16.mxu1 %v14035_v61  ;;  %v12421_v9 = vpop.f32.mrb[27].mxu1  ;;  %v2246_v61 = vcombine.high %v2238_v53, %v2238_v53  ;;  %v14076_v7 = vld [vmem:[%s14542_s11 + $0xfc0] sm:$0xff]   ;;  %v14106_v53 = vld [vmem:[%s14542_s11 + $0xfb8] sm:$0xff]   ;;  %v2261_v54 = vrot.slane %v15137_v63, %v14583_v42 }
 0x1d1   : > { %v15097_v10 = vadd.f32 %v12419_v5, %v7815_v4  ;;  %12700 = vmatpush3.bf16.msra.mxu0 %v14034_v59  ;;  %v2247_v4 = vcombine.high %v15137_v63, %v15137_v63  ;;  %v14075_v5 = vld [vmem:[%s14542_s11 + $0xf00] sm:$0xff]   ;;  %v14113_v63 = vld [vmem:[%s14542_s11 + $0x10c8] sm:$0xff]  }
 0x1d2   : > { %12701 = vmatprep.subr.bf16.mxu0 %v14037_v2  ;;  %v2268_v2 = vrot.slane %v2246_v61, %v14583_v42  ;;  %v14077_v9 = vld [vmem:[%s14542_s11 + $0xf80] sm:$0xff]   ;;  %v14111_v61 = vld [vmem:[%s14542_s11 + $0x1048] sm:$0xff]  }
 0x1d3   : > { %12722 = vmatpush3.bf16.msra.mxu1 %v14036_v1  ;;  %v14073_v1 = vld [vmem:[%s14542_s11 + $0xeb8] sm:$0xff]  }
 0x1d4   : > { %12723 = vmatprep.subr.bf16.mxu1 %v14039_v8  ;;  %v2275_v8 = vrot.slane %v2247_v4, %v14583_v42  ;;  %v14119_v4 = vld [vmem:[%s14542_s11 + $0x1058] sm:$0xff]  }
 0x1d5   : > { %12702 = vmatpush3.bf16.msra.mxu0 %v14038_v6  ;;  %v2278_v6 = vcombine.high %v2268_v2, %v2268_v2 }
 0x1d6   : > { %12731 = vmatprep.subr.bf16.mxu0 %v14042_v13  ;;  %v2279_v13 = vcombine.high %v2275_v8, %v2275_v8 }
 0x1d7   : > { %12724 = vmatpush3.bf16.msra.mxu1 %v14041_v11  ;;  %v14078_v11 = vld [vmem:[%s14542_s11 + $0xf48] sm:$0xff]  }
 0x1d8   : > { %8373 = vmatmul.mubr.bf16.vlgmr.msra.gmra.mrb[52].mxu0 %v2212_v12  ;;  %12753 = vmatprep.subr.bf16.mxu1 %v14044_v15  ;;  %v14079_v12 = vld [vmem:[%s14542_s11 + $0xf08] sm:$0xff]  }
 0x1d9   : > { %12732 = vmatpush3.bf16.msra.mxu0 %v14043_v14  ;;  %8452 = vmatprep.mubr.bf16.mxu0 %v2268_v2  ;;  %v14080_v14 = vld [vmem:[%s14542_s11 + $0xfc8] sm:$0xff]   ;;  %v14116_v2 = vld [vmem:[%s14542_s11 + $0x1010] sm:$0xff]  }
 0x1da   : > { %8413 = vmatmul.mubr.bf16.vlgmr.msra.gmra.mrb[52].mxu1 %v2228_v17  ;;  %12733 = vmatprep.subr.bf16.mxu0 %v14046_v18  ;;  %v14081_v15 = vld [vmem:[%s14542_s11 + $0xf88] sm:$0xff]   ;;  %v14083_v17 = vld [vmem:[%s14542_s11 + $0xf10] sm:$0xff]  }
 0x1db   : > { %12754 = vmatpush3.bf16.msra.mxu1 %v14045_v16  ;;  %8492 = vmatprep.mubr.bf16.mxu1 %v2278_v6  ;;  %v14082_v16 = vld [vmem:[%s14542_s11 + $0xf50] sm:$0xff]   ;;  %v14121_v6 = vld [vmem:[%s14542_s11 + $0x10d8] sm:$0xff]  }
 0x1dc   : > { %12755 = vmatprep.subr.bf16.mxu1 %v14048_v19  ;;  %v14084_v18 = vld [vmem:[%s14542_s11 + $0xfd0] sm:$0xff]   ;;  %v14086_v19 = vld [vmem:[%s14542_s11 + $0xf58] sm:$0xff]  }
 0x1dd   : > { %12734 = vmatpush3.bf16.msra.mxu0 %v14047_v20  ;;  %v14085_v20 = vld [vmem:[%s14542_s11 + $0xf90] sm:$0xff]  }
 0x1de   : > { %12735 = vmatprep.subr.bf16.mxu0 %v14050_v22  ;;  %v14088_v22 = vld [vmem:[%s14542_s11 + $0xfd8] sm:$0xff]  }
 0x1df   : > { %12756 = vmatpush3.bf16.msra.mxu1 %v14049_v21  ;;  %v14087_v21 = vld [vmem:[%s14542_s11 + $0xf18] sm:$0xff]  }
 0x1e0   : > { %12757 = vmatprep.subr.bf16.mxu1 %v14052_v23  ;;  %v14090_v23 = vld [vmem:[%s14542_s11 + $0xf60] sm:$0xff]  }
 0x1e1   : > { %12736 = vmatpush3.bf16.msra.mxu0 %v14051_v24  ;;  %v14089_v24 = vld [vmem:[%s14542_s11 + $0xf98] sm:$0xff]  }
 0x1e2   : > { %12737 = vmatprep.subr.bf16.mxu0 %v14054_v26  ;;  %v14092_v26 = vld [vmem:[%s14542_s11 + $0xfe0] sm:$0xff]  }
 0x1e3   : > { %12758 = vmatpush3.bf16.msra.mxu1 %v14053_v25  ;;  %v14091_v25 = vld [vmem:[%s14542_s11 + $0xf20] sm:$0xff]  }
 0x1e4   : > { %12759 = vmatprep.subr.bf16.mxu1 %v14056_v28  ;;  %v14094_v28 = vld [vmem:[%s14542_s11 + $0xf68] sm:$0xff]  }
 0x1e5   : > { %12738 = vmatpush3.bf16.msra.mxu0 %v14055_v27  ;;  %v14093_v27 = vld [vmem:[%s14542_s11 + $0xfa0] sm:$0xff]  }
 0x1e6   : > { %12739 = vmatprep.subr.bf16.mxu0 %v14058_v30  ;;  %v14096_v30 = vld [vmem:[%s14542_s11 + $0xfe8] sm:$0xff]  }
 0x1e7   : > { %12760 = vmatpush3.bf16.msra.mxu1 %v14057_v29  ;;  %v14095_v29 = vld [vmem:[%s14542_s11 + $0xf28] sm:$0xff]  }
 0x1e8   : > { %12761 = vmatprep.subr.bf16.mxu1 %v14060_v32  ;;  %v14098_v32 = vld [vmem:[%s14542_s11 + $0xf70] sm:$0xff]  }
 0x1e9   : > { %12740 = vmatpush3.bf16.msra.mxu0 %v14059_v31  ;;  %v14097_v31 = vld [vmem:[%s14542_s11 + $0xfa8] sm:$0xff]  }
 0x1ea   : > { %12741 = vmatprep.subr.bf16.mxu0 %v14062_v35  ;;  %v14099_v35 = vld [vmem:[%s14542_s11 + $0xf30] sm:$0xff]  }
 0x1eb   : > { %v12439_v41 = vpop.f32.mrb[28].mxu0  ;;  %12762 = vmatpush3.bf16.msra.mxu1 %v14061_v33 }
 0x1ec   : > { %v12440_v44 = vpop.f32.mrb[29].mxu0  ;;  %12763 = vmatprep.subr.bf16.mxu1 %v14064_v38  ;;  %v14100_v38 = vld [vmem:[%s14542_s11 + $0xff0] sm:$0xff]  }
 0x1ed   : > { %v12441_v45 = vadd.f32 %v12440_v44, %v12439_v41  ;;  %v12442_v46 = vpop.f32.mrb[30].mxu0  ;;  %v12461_v47 = vpop.f32.mrb[28].mxu1  ;;  %12742 = vmatpush3.bf16.msra.mxu0 %v14063_v36  ;;  %v14102_v44 = vld [vmem:[%s14542_s11 + $0xf78] sm:$0xff]  }
 0x1ee   : > { %v12443_v51 = vpop.f32.mrb[31].mxu0  ;;  %v12462_v52 = vpop.f32.mrb[29].mxu1  ;;  %12743 = vmatprep.subr.bf16.mxu0 %v14066_v40 }
 0x1ef   : > { %v7895_v55 = vadd.f32 %v12441_v45, %v15097_v10  ;;  %v12463_v57 = vadd.f32 %v12462_v52, %v12461_v47  ;;  %12764 = vmatpush3.bf16.msra.mxu1 %v14065_v39  ;;  %v12464_v59 = vpop.f32.mrb[30].mxu1  ;;  %v2276_v10 = vcombine.high %v2254_v56, %v2254_v56 }
 0x1f0   : > { %12765 = vmatprep.subr.bf16.mxu1 %v14068_v37  ;;  %v12465_v62 = vpop.f32.mrb[31].mxu1  ;;  %v14110_v59 = vld [vmem:[%s14542_s11 + $0x1080] sm:$0xff]  }
 0x1f1   : > { %v15139_v0 = vadd.f32 %v12463_v57, %v7895_v55  ;;  %12744 = vmatpush3.bf16.msra.mxu0 %v14067_v43  ;;  %v14101_v43 = vld [vmem:[%s14542_s11 + $0xfb0] sm:$0xff]   ;;  %v14107_v55 = vld [vmem:[%s14542_s11 + $0x1040] sm:$0xff]   ;;  %v14112_v62 = vld [vmem:[%s14542_s11 + $0x1008] sm:$0xff]  }
 0x1f2   : > { %12745 = vmatprep.subr.bf16.mxu0 %v14070_v49  ;;  %v14108_v57 = vld [vmem:[%s14542_s11 + $0x1000] sm:$0xff]  }
 0x1f3   : > { %12766 = vmatpush3.bf16.msra.mxu1 %v14069_v48  ;;  %v14103_v48 = vld [vmem:[%s14542_s11 + $0xf38] sm:$0xff]  }
 0x1f4   : > { %12767 = vmatprep.subr.bf16.mxu1 %v14072_v60  ;;  %v2277_v60 = vcombine.high %v2261_v54, %v2261_v54 }
 0x1f5   : > { %12746 = vmatpush3.bf16.msra.mxu0 %v14071_v58  ;;  %v14109_v58 = vld [vmem:[%s14542_s11 + $0x10c0] sm:$0xff]  }
 0x1f6   : > { %12775 = vmatprep.subr.bf16.mxu0 %v14074_v3  ;;  %v14118_v3 = vld [vmem:[%s14542_s11 + $0x1090] sm:$0xff]  }
 0x1f7   : > { %12768 = vmatpush3.bf16.msra.mxu1 %v14073_v1  ;;  %v14115_v1 = vld [vmem:[%s14542_s11 + $0x1050] sm:$0xff]  }
 0x1f8   : > { %8453 = vmatmul.mubr.bf16.vlgmr.msra.gmra.mrb[56].mxu0 %v2254_v56  ;;  %12797 = vmatprep.subr.bf16.mxu1 %v14076_v7  ;;  %v14117_v56 = vld [vmem:[%s14542_s11 + $0x10d0] sm:$0xff]   ;;  %v14122_v7 = vld [vmem:[%s14542_s11 + $0x1098] sm:$0xff]  }
 0x1f9   : > { %12776 = vmatpush3.bf16.msra.mxu0 %v14075_v5  ;;  %8532 = vmatprep.mubr.bf16.mxu0 %v2275_v8  ;;  %v14120_v5 = vld [vmem:[%s14542_s11 + $0x1018] sm:$0xff]   ;;  %v14123_v8 = vld [vmem:[%s14542_s11 + $0x1060] sm:$0xff]  }
 0x1fa   : > { %8493 = vmatmul.mubr.bf16.vlgmr.msra.gmra.mrb[56].mxu1 %v2276_v10  ;;  %12777 = vmatprep.subr.bf16.mxu0 %v14078_v11  ;;  %v14125_v10 = vld [vmem:[%s14542_s11 + $0x10e0] sm:$0xff]  }
 0x1fb   : > { %12798 = vmatpush3.bf16.msra.mxu1 %v14077_v9  ;;  %8572 = vmatprep.mubr.bf16.mxu1 %v2279_v13  ;;  %v14124_v9 = vld [vmem:[%s14542_s11 + $0x1020] sm:$0xff]   ;;  %v14128_v13 = vld [vmem:[%s14542_s11 + $0x1028] sm:$0xff]  }
 0x1fc   : > { %12799 = vmatprep.subr.bf16.mxu1 %v14080_v14  ;;  %v14126_v11 = vld [vmem:[%s14542_s11 + $0x10a0] sm:$0xff]   ;;  %v14129_v14 = vld [vmem:[%s14542_s11 + $0x10e8] sm:$0xff]  }
 0x1fd   : > { %12778 = vmatpush3.bf16.msra.mxu0 %v14079_v12  ;;  %v14127_v12 = vld [vmem:[%s14542_s11 + $0x1068] sm:$0xff]  }
 0x1fe   : > { %12779 = vmatprep.subr.bf16.mxu0 %v14082_v16  ;;  %v14131_v16 = vld [vmem:[%s14542_s11 + $0x1070] sm:$0xff]  }
 0x1ff   : > { %12800 = vmatpush3.bf16.msra.mxu1 %v14081_v15  ;;  %v14130_v15 = vld [vmem:[%s14542_s11 + $0x10a8] sm:$0xff]  }
 0x200   : > { %12801 = vmatprep.subr.bf16.mxu1 %v14084_v18  ;;  %v14132_v18 = vld [vmem:[%s14542_s11 + $0x1030] sm:$0xff]  }
 0x201   : > { %12780 = vmatpush3.bf16.msra.mxu0 %v14083_v17 }
 0x202   : > { %12781 = vmatprep.subr.bf16.mxu0 %v14086_v19  ;;  %v14133_v19 = vld [vmem:[%s14542_s11 + $0x10f0] sm:$0xff]  }
 0x203   : > { %12802 = vmatpush3.bf16.msra.mxu1 %v14085_v20 }
 0x204   : > { %12803 = vmatprep.subr.bf16.mxu1 %v14088_v22 }
 0x205   : > { %12782 = vmatpush3.bf16.msra.mxu0 %v14087_v21 }
 0x206   : > { %12783 = vmatprep.subr.bf16.mxu0 %v14090_v23  ;;  %v14134_v23 = vld [vmem:[%s14542_s11 + $0x10b0] sm:$0xff]  }
 0x207   : > { %12804 = vmatpush3.bf16.msra.mxu1 %v14089_v24 }
 0x208   : > { %12805 = vmatprep.subr.bf16.mxu1 %v14092_v26 }
 0x209   : > { %12784 = vmatpush3.bf16.msra.mxu0 %v14091_v25  ;;  %v14135_v25 = vld [vmem:[%s14542_s11 + $0x1078] sm:$0xff]  }
 0x20a   : > { %12785 = vmatprep.subr.bf16.mxu0 %v14094_v28 }
 0x20b   : > { %v12483_v33 = vpop.f32.mrb[32].mxu0  ;;  %12806 = vmatpush3.bf16.msra.mxu1 %v14093_v27 }
 0x20c   : > { %v12484_v36 = vpop.f32.mrb[33].mxu0  ;;  %12807 = vmatprep.subr.bf16.mxu1 %v14096_v30  ;;  %v14136_v30 = vld [vmem:[%s14542_s11 + $0x1038] sm:$0xff]  }
 0x20d   : > { %v12485_v39 = vadd.f32 %v12484_v36, %v12483_v33  ;;  %v12486_v40 = vpop.f32.mrb[34].mxu0  ;;  %v12505_v41 = vpop.f32.mrb[32].mxu1  ;;  %12786 = vmatpush3.bf16.msra.mxu0 %v14095_v29  ;;  %v14137_v33 = vld [vmem:[%s14542_s11 + $0x10f8] sm:$0xff]  }
 0x20e   : > { %v12487_v37 = vpop.f32.mrb[35].mxu0  ;;  %v12506_v45 = vpop.f32.mrb[33].mxu1  ;;  %12787 = vmatprep.subr.bf16.mxu0 %v14098_v32  ;;  %v14138_v40 = vld [vmem:[%s14542_s11 + $0x10b8] sm:$0xff]  }
 0x20f   : > { %v7975_v46 = vadd.f32 %v12485_v39, %v15139_v0  ;;  %v12507_v47 = vadd.f32 %v12506_v45, %v12505_v41  ;;  %12808 = vmatpush3.bf16.msra.mxu1 %v14097_v31  ;;  %v12508_v49 = vpop.f32.mrb[34].mxu1  ;;  %v14114_v0 = vld [vmem:[%s14542_s11 + $0x1088] sm:$0xff]   ;;  %v302_v31 = vld [vmem:[%s14537_s30 + $0x40] sm:$0xff] }
 0x210   : > { %12809 = vmatprep.subr.bf16.mxu1 %v14100_v38  ;;  %v12509_v51 = vpop.f32.mrb[35].mxu1  ;;  %v2280_v38 = vcombine.high %v302_v31, %v302_v31  ;;  %v14140_v45 = vld [vmem:[%s14542_s11 + $0x1100] sm:$0xff]  }
 0x211   : > { %v15179_v52 = vadd.f32 %v12507_v47, %v7975_v46  ;;  %12788 = vmatpush3.bf16.msra.mxu0 %v14099_v35  ;;  %v2287_v35 = vrot.slane %v302_v31, %v14583_v42  ;;  %v14141_v47 = vld [vmem:[%s14542_s11 + $0x11c0] sm:$0xff]  }
 0x212   : > { %12789 = vmatprep.subr.bf16.mxu0 %v14102_v44  ;;  %v14139_v44 = vld [vmem:[%s14542_s11 + $0x1140] sm:$0xff]   ;;  %v15224_v37 = vrot.slane %v2280_v38, %v14583_v42  ;;  %v14176_v38 = vld [vmem:[%s14542_s11 + $0x1248] sm:$0xff]  }
 0x213   : > { %12810 = vmatpush3.bf16.msra.mxu1 %v14101_v43  ;;  %v2295_v41 = vcombine.high %v2287_v35, %v2287_v35  ;;  %v2303_v43 = vrot.slane %v2287_v35, %v14583_v42  ;;  %v14142_v49 = vld [vmem:[%s14542_s11 + $0x1180] sm:$0xff]  }
 0x214   : > { %12811 = vmatprep.subr.bf16.mxu1 %v14104_v50  ;;  %v14172_v31 = vld [vmem:[%s14542_s11 + $0x1240] sm:$0xff]  }
 0x215   : > { %12790 = vmatpush3.bf16.msra.mxu0 %v14103_v48  ;;  %v2317_v46 = vrot.slane %v2295_v41, %v14583_v42  ;;  %v2296_v48 = vcombine.high %v15224_v37, %v15224_v37  ;;  %v2325_v51 = vcombine.high %v2303_v43, %v2303_v43  ;;  %v14175_v35 = vld [vmem:[%s14542_s11 + $0x1280] sm:$0xff]   ;;  %v14179_v41 = vld [vmem:[%s14542_s11 + $0x1288] sm:$0xff]  }
 0x216   : > { %12819 = vmatprep.subr.bf16.mxu0 %v14107_v55  ;;  %v14145_v55 = vld [vmem:[%s14542_s11 + $0x11c8] sm:$0xff]  }
 0x217   : > { %12812 = vmatpush3.bf16.msra.mxu1 %v14106_v53  ;;  %v2327_v50 = vcombine.high %v2317_v46, %v2317_v46  ;;  %v2324_v53 = vrot.slane %v2296_v48, %v14583_v42  ;;  %v14186_v48 = vld [vmem:[%s14542_s11 + $0x12d8] sm:$0xff]  }
 0x218   : > { %8533 = vmatmul.mubr.bf16.vlgmr.msra.gmra.mrb[60].mxu0 %v2261_v54  ;;  %12841 = vmatprep.subr.bf16.mxu1 %v14109_v58  ;;  %v14144_v54 = vld [vmem:[%s14542_s11 + $0x1108] sm:$0xff]  }
 0x219   : > { %12820 = vmatpush3.bf16.msra.mxu0 %v14108_v57  ;;  %8612 = vmatprep.mubr.bf16.mxu0 %v2317_v46  ;;  %v2328_v57 = vcombine.high %v2324_v53, %v2324_v53  ;;  %v14146_v58 = vld [vmem:[%s14542_s11 + $0x1188] sm:$0xff]   ;;  %v14184_v46 = vld [vmem:[%s14542_s11 + $0x1258] sm:$0xff]  }
 0x21a   : > { %8573 = vmatmul.mubr.bf16.vlgmr.msra.gmra.mrb[60].mxu1 %v2277_v60  ;;  %12821 = vmatprep.subr.bf16.mxu0 %v14111_v61  ;;  %v14148_v60 = vld [vmem:[%s14542_s11 + $0x1110] sm:$0xff]  }
 0x21b   : > { %12842 = vmatpush3.bf16.msra.mxu1 %v14110_v59  ;;  %8652 = vmatprep.mubr.bf16.mxu1 %v2327_v50  ;;  %v14147_v59 = vld [vmem:[%s14542_s11 + $0x1150] sm:$0xff]   ;;  %v14188_v50 = vld [vmem:[%s14542_s11 + $0x1260] sm:$0xff]  }
 0x21c   : > { %12843 = vmatprep.subr.bf16.mxu1 %v14113_v63  ;;  %v14149_v61 = vld [vmem:[%s14542_s11 + $0x11d0] sm:$0xff]   ;;  %v14151_v63 = vld [vmem:[%s14542_s11 + $0x1158] sm:$0xff]  }
 0x21d   : > { %12822 = vmatpush3.bf16.msra.mxu0 %v14112_v62  ;;  %v14150_v62 = vld [vmem:[%s14542_s11 + $0x1190] sm:$0xff]  }
 0x21e   : > { %12823 = vmatprep.subr.bf16.mxu0 %v14115_v1  ;;  %v14153_v1 = vld [vmem:[%s14542_s11 + $0x11d8] sm:$0xff]  }
 0x21f   : > { %12844 = vmatpush3.bf16.msra.mxu1 %v14114_v0  ;;  %v14152_v0 = vld [vmem:[%s14542_s11 + $0x1118] sm:$0xff]  }
 0x220   : > { %12845 = vmatprep.subr.bf16.mxu1 %v14117_v56  ;;  %v14155_v56 = vld [vmem:[%s14542_s11 + $0x1160] sm:$0xff]  }
 0x221   : > { %12824 = vmatpush3.bf16.msra.mxu0 %v14116_v2  ;;  %v14154_v2 = vld [vmem:[%s14542_s11 + $0x1198] sm:$0xff]  }
 0x222   : > { %12825 = vmatprep.subr.bf16.mxu0 %v14119_v4  ;;  %v14157_v4 = vld [vmem:[%s14542_s11 + $0x11e0] sm:$0xff]  }
 0x223   : > { %12846 = vmatpush3.bf16.msra.mxu1 %v14118_v3  ;;  %v14156_v3 = vld [vmem:[%s14542_s11 + $0x1120] sm:$0xff]  }
 0x224   : > { %12847 = vmatprep.subr.bf16.mxu1 %v14121_v6  ;;  %v14159_v6 = vld [vmem:[%s14542_s11 + $0x1168] sm:$0xff]  }
 0x225   : > { %12826 = vmatpush3.bf16.msra.mxu0 %v14120_v5  ;;  %v14158_v5 = vld [vmem:[%s14542_s11 + $0x11a0] sm:$0xff]  }
 0x226   : > { %12827 = vmatprep.subr.bf16.mxu0 %v14123_v8  ;;  %v14161_v8 = vld [vmem:[%s14542_s11 + $0x11e8] sm:$0xff]  }
 0x227   : > { %12848 = vmatpush3.bf16.msra.mxu1 %v14122_v7  ;;  %v14160_v7 = vld [vmem:[%s14542_s11 + $0x1128] sm:$0xff]  }
 0x228   : > { %12849 = vmatprep.subr.bf16.mxu1 %v14125_v10  ;;  %v14163_v10 = vld [vmem:[%s14542_s11 + $0x1170] sm:$0xff]  }
 0x229   : > { %12828 = vmatpush3.bf16.msra.mxu0 %v14124_v9  ;;  %v14162_v9 = vld [vmem:[%s14542_s11 + $0x11a8] sm:$0xff]  }
 0x22a   : > { %12829 = vmatprep.subr.bf16.mxu0 %v14127_v12  ;;  %v14164_v12 = vld [vmem:[%s14542_s11 + $0x1130] sm:$0xff]  }
 0x22b   : > { %v12527_v17 = vpop.f32.mrb[36].mxu0  ;;  %12850 = vmatpush3.bf16.msra.mxu1 %v14126_v11 }
 0x22c   : > { %v12528_v20 = vpop.f32.mrb[37].mxu0  ;;  %12851 = vmatprep.subr.bf16.mxu1 %v14129_v14  ;;  %v14165_v14 = vld [vmem:[%s14542_s11 + $0x11f0] sm:$0xff]  }
 0x22d   : > { %v12529_v21 = vadd.f32 %v12528_v20, %v12527_v17  ;;  %v12530_v22 = vpop.f32.mrb[38].mxu0  ;;  %v12549_v24 = vpop.f32.mrb[36].mxu1  ;;  %12830 = vmatpush3.bf16.msra.mxu0 %v14128_v13  ;;  %v14167_v20 = vld [vmem:[%s14542_s11 + $0x1178] sm:$0xff]  }
 0x22e   : > { %v12531_v26 = vpop.f32.mrb[39].mxu0  ;;  %v12550_v27 = vpop.f32.mrb[37].mxu1  ;;  %12831 = vmatprep.subr.bf16.mxu0 %v14131_v16 }
 0x22f   : > { %v8055_v28 = vadd.f32 %v12529_v21, %v15179_v52  ;;  %v12551_v29 = vadd.f32 %v12550_v27, %v12549_v24  ;;  %12852 = vmatpush3.bf16.msra.mxu1 %v14130_v15  ;;  %v12552_v32 = vpop.f32.mrb[38].mxu1  ;;  %v14143_v52 = vld [vmem:[%s14542_s11 + $0x1148] sm:$0xff]   ;;  %v14169_v26 = vld [vmem:[%s14542_s11 + $0x11f8] sm:$0xff]  }
 0x230   : > { %12853 = vmatprep.subr.bf16.mxu1 %v14133_v19  ;;  %v12553_v36 = vpop.f32.mrb[39].mxu1  ;;  %v14173_v32 = vld [vmem:[%s14542_s11 + $0x1200] sm:$0xff]  }
 0x231   : > { %v15218_v39 = vadd.f32 %v12551_v29, %v8055_v28  ;;  %12832 = vmatpush3.bf16.msra.mxu0 %v14132_v18  ;;  %v14166_v18 = vld [vmem:[%s14542_s11 + $0x11b0] sm:$0xff]   ;;  %v14171_v29 = vld [vmem:[%s14542_s11 + $0x11b8] sm:$0xff]  }
 0x232   : > { %12833 = vmatprep.subr.bf16.mxu0 %v14135_v25 }
 0x233   : > { %12854 = vmatpush3.bf16.msra.mxu1 %v14134_v23  ;;  %v14168_v23 = vld [vmem:[%s14542_s11 + $0x1138] sm:$0xff]  }
 0x234   : > { %12855 = vmatprep.subr.bf16.mxu1 %v14137_v33  ;;  %v14174_v33 = vld [vmem:[%s14542_s11 + $0x12c0] sm:$0xff]  }
 0x235   : > { %12834 = vmatpush3.bf16.msra.mxu0 %v14136_v30  ;;  %v2310_v30 = vrot.slane %v15224_v37, %v14583_v42  ;;  %v14182_v37 = vld [vmem:[%s14542_s11 + $0x12d0] sm:$0xff]  }
 0x236   : > { %12863 = vmatprep.subr.bf16.mxu0 %v14139_v44  ;;  %v14181_v44 = vld [vmem:[%s14542_s11 + $0x1210] sm:$0xff]  }
 0x237   : > { %12856 = vmatpush3.bf16.msra.mxu1 %v14138_v40  ;;  %v2326_v36 = vcombine.high %v2310_v30, %v2310_v30  ;;  %v14178_v40 = vld [vmem:[%s14542_s11 + $0x12c8] sm:$0xff]  }
 0x238   : > { %8613 = vmatmul.mubr.bf16.vlgmr.msra.gmra.mrb[64].mxu0 %v2303_v43  ;;  %12885 = vmatprep.subr.bf16.mxu1 %v14141_v47  ;;  %v14180_v43 = vld [vmem:[%s14542_s11 + $0x1250] sm:$0xff]   ;;  %v14185_v47 = vld [vmem:[%s14542_s11 + $0x1218] sm:$0xff]  }
 0x239   : > { %12864 = vmatpush3.bf16.msra.mxu0 %v14140_v45  ;;  %8692 = vmatprep.mubr.bf16.mxu0 %v2324_v53  ;;  %v14183_v45 = vld [vmem:[%s14542_s11 + $0x1290] sm:$0xff]   ;;  %v14191_v53 = vld [vmem:[%s14542_s11 + $0x12a0] sm:$0xff]  }
 0x23a   : > { %8653 = vmatmul.mubr.bf16.vlgmr.msra.gmra.mrb[64].mxu1 %v2325_v51  ;;  %12865 = vmatprep.subr.bf16.mxu0 %v14143_v52  ;;  %v14189_v51 = vld [vmem:[%s14542_s11 + $0x1220] sm:$0xff]  }
 0x23b   : > { %12886 = vmatpush3.bf16.msra.mxu1 %v14142_v49  ;;  %8732 = vmatprep.mubr.bf16.mxu1 %v2328_v57  ;;  %v14187_v49 = vld [vmem:[%s14542_s11 + $0x1298] sm:$0xff]   ;;  %v14190_v52 = vld [vmem:[%s14542_s11 + $0x12e0] sm:$0xff]   ;;  %v14194_v57 = vld [vmem:[%s14542_s11 + $0x12e8] sm:$0xff]  }
 0x23c   : > { %12887 = vmatprep.subr.bf16.mxu1 %v14145_v55  ;;  %v14193_v55 = vld [vmem:[%s14542_s11 + $0x1228] sm:$0xff]  }
 0x23d   : > { %12866 = vmatpush3.bf16.msra.mxu0 %v14144_v54  ;;  %v14192_v54 = vld [vmem:[%s14542_s11 + $0x1268] sm:$0xff]  }
 0x23e   : > { %12867 = vmatprep.subr.bf16.mxu0 %v14147_v59  ;;  %v14196_v59 = vld [vmem:[%s14542_s11 + $0x1270] sm:$0xff]  }
 0x23f   : > { %12888 = vmatpush3.bf16.msra.mxu1 %v14146_v58  ;;  %v14195_v58 = vld [vmem:[%s14542_s11 + $0x12a8] sm:$0xff]  }
 0x240   : > { %12889 = vmatprep.subr.bf16.mxu1 %v14149_v61  ;;  %v14197_v61 = vld [vmem:[%s14542_s11 + $0x1230] sm:$0xff]  }
 0x241   : > { %12868 = vmatpush3.bf16.msra.mxu0 %v14148_v60 }
 0x242   : > { %12869 = vmatprep.subr.bf16.mxu0 %v14151_v63  ;;  %v14198_v63 = vld [vmem:[%s14542_s11 + $0x12f0] sm:$0xff]  }
 0x243   : > { %12890 = vmatpush3.bf16.msra.mxu1 %v14150_v62 }
 0x244   : > { %12891 = vmatprep.subr.bf16.mxu1 %v14153_v1 }
 0x245   : > { %12870 = vmatpush3.bf16.msra.mxu0 %v14152_v0 }
 0x246   : > { %12871 = vmatprep.subr.bf16.mxu0 %v14155_v56  ;;  %v14199_v56 = vld [vmem:[%s14542_s11 + $0x12b0] sm:$0xff]  }
 0x247   : > { %12892 = vmatpush3.bf16.msra.mxu1 %v14154_v2 }
 0x248   : > { %12893 = vmatprep.subr.bf16.mxu1 %v14157_v4 }
 0x249   : > { %12872 = vmatpush3.bf16.msra.mxu0 %v14156_v3  ;;  %v14200_v3 = vld [vmem:[%s14542_s11 + $0x1278] sm:$0xff]  }
 0x24a   : > { %12873 = vmatprep.subr.bf16.mxu0 %v14159_v6 }
 0x24b   : > { %v12571_v11 = vpop.f32.mrb[40].mxu0  ;;  %12894 = vmatpush3.bf16.msra.mxu1 %v14158_v5 }
 0x24c   : > { %v12572_v13 = vpop.f32.mrb[41].mxu0  ;;  %12895 = vmatprep.subr.bf16.mxu1 %v14161_v8  ;;  %v14201_v8 = vld [vmem:[%s14542_s11 + $0x1238] sm:$0xff]  }
 0x24d   : > { %v12573_v15 = vadd.f32 %v12572_v13, %v12571_v11  ;;  %v12574_v16 = vpop.f32.mrb[42].mxu0  ;;  %v12593_v17 = vpop.f32.mrb[40].mxu1  ;;  %12874 = vmatpush3.bf16.msra.mxu0 %v14160_v7  ;;  %v303_v11 = vld [vmem:[%s14537_s30 + $0x48] sm:$0xff] }
 0x24e   : > { %v12575_v19 = vpop.f32.mrb[43].mxu0  ;;  %v12594_v21 = vpop.f32.mrb[41].mxu1  ;;  %12875 = vmatprep.subr.bf16.mxu0 %v14163_v10  ;;  %v2329_v16 = vcombine.high %v303_v11, %v303_v11 }
 0x24f   : > { %v8135_v22 = vadd.f32 %v12573_v15, %v15218_v39  ;;  %v12595_v24 = vadd.f32 %v12594_v21, %v12593_v17  ;;  %12896 = vmatpush3.bf16.msra.mxu1 %v14162_v9  ;;  %v12596_v25 = vpop.f32.mrb[42].mxu1  ;;  %v14177_v39 = vld [vmem:[%s14542_s11 + $0x1208] sm:$0xff]   ;;  %v14202_v9 = vld [vmem:[%s14542_s11 + $0x12f8] sm:$0xff]   ;;  %v14204_v17 = vld [vmem:[%s14542_s11 + $0x1340] sm:$0xff]  }
 0x250   : > { %12897 = vmatprep.subr.bf16.mxu1 %v14165_v14  ;;  %v12597_v27 = vpop.f32.mrb[43].mxu1  ;;  %v2336_v14 = vrot.slane %v303_v11, %v14583_v42  ;;  %v14203_v15 = vld [vmem:[%s14542_s11 + $0x12b8] sm:$0xff]   ;;  %v14205_v19 = vld [vmem:[%s14542_s11 + $0x1300] sm:$0xff]   ;;  %v15307_v21 = vrot.slane %v2329_v16, %v14583_v42  ;;  %v14243_v16 = vld [vmem:[%s14542_s11 + $0x14c8] sm:$0xff]  }
 0x251   : > { %v15261_v28 = vadd.f32 %v12595_v24, %v8135_v22  ;;  %12876 = vmatpush3.bf16.msra.mxu0 %v14164_v12  ;;  %v14206_v22 = vld [vmem:[%s14542_s11 + $0x13c0] sm:$0xff]   ;;  %v14208_v27 = vld [vmem:[%s14542_s11 + $0x1348] sm:$0xff]  }
 0x252   : > { %12877 = vmatprep.subr.bf16.mxu0 %v14167_v20  ;;  %v2352_v20 = vrot.slane %v2336_v14, %v14583_v42  ;;  %v2345_v25 = vcombine.high %v15307_v21, %v15307_v21  ;;  %v14239_v11 = vld [vmem:[%s14542_s11 + $0x14c0] sm:$0xff]  }
 0x253   : > { %12898 = vmatpush3.bf16.msra.mxu1 %v14166_v18  ;;  %v2344_v18 = vcombine.high %v2336_v14, %v2336_v14  ;;  %v14241_v14 = vld [vmem:[%s14542_s11 + $0x1448] sm:$0xff]  }
 0x254   : > { %12899 = vmatprep.subr.bf16.mxu1 %v14169_v26  ;;  %v2374_v26 = vcombine.high %v2352_v20, %v2352_v20 }
 0x255   : > { %12878 = vmatpush3.bf16.msra.mxu0 %v14168_v23  ;;  %v2366_v24 = vrot.slane %v2344_v18, %v14583_v42  ;;  %v14207_v23 = vld [vmem:[%s14542_s11 + $0x1380] sm:$0xff]   ;;  %v14245_v18 = vld [vmem:[%s14542_s11 + $0x1450] sm:$0xff]  }
 0x256   : > { %12907 = vmatprep.subr.bf16.mxu0 %v14172_v31  ;;  %v14210_v31 = vld [vmem:[%s14542_s11 + $0x13c8] sm:$0xff]  }
 0x257   : > { %12900 = vmatpush3.bf16.msra.mxu1 %v14171_v29  ;;  %v14209_v29 = vld [vmem:[%s14542_s11 + $0x1308] sm:$0xff]  }
 0x258   : > { %8693 = vmatmul.mubr.bf16.vlgmr.msra.gmra.mrb[68].mxu0 %v2310_v30  ;;  %12929 = vmatprep.subr.bf16.mxu1 %v14174_v33  ;;  %v2373_v30 = vrot.slane %v2345_v25, %v14583_v42  ;;  %v14252_v25 = vld [vmem:[%s14542_s11 + $0x1498] sm:$0xff]  }
 0x259   : > { %12908 = vmatpush3.bf16.msra.mxu0 %v14173_v32  ;;  %8772 = vmatprep.mubr.bf16.mxu0 %v2366_v24  ;;  %v14211_v32 = vld [vmem:[%s14542_s11 + $0x1388] sm:$0xff]  }
 0x25a   : > { %8733 = vmatmul.mubr.bf16.vlgmr.msra.gmra.mrb[68].mxu1 %v2326_v36  ;;  %12909 = vmatprep.subr.bf16.mxu0 %v14176_v38  ;;  %v2377_v33 = vcombine.high %v2373_v30, %v2373_v30  ;;  %v14213_v36 = vld [vmem:[%s14542_s11 + $0x1310] sm:$0xff]  }
 0x25b   : > { %12930 = vmatpush3.bf16.msra.mxu1 %v14175_v35  ;;  %v14212_v35 = vld [vmem:[%s14542_s11 + $0x1350] sm:$0xff]  }
 0x25c   : > { %12931 = vmatprep.subr.bf16.mxu1 %v14178_v40  ;;  %v14214_v38 = vld [vmem:[%s14542_s11 + $0x13d0] sm:$0xff]   ;;  %v14216_v40 = vld [vmem:[%s14542_s11 + $0x1358] sm:$0xff]  }
 0x25d   : > { %12910 = vmatpush3.bf16.msra.mxu0 %v14177_v39  ;;  %v14215_v39 = vld [vmem:[%s14542_s11 + $0x1390] sm:$0xff]  }
 0x25e   : > { %12911 = vmatprep.subr.bf16.mxu0 %v14180_v43  ;;  %v14218_v43 = vld [vmem:[%s14542_s11 + $0x13d8] sm:$0xff]  }
 0x25f   : > { %12932 = vmatpush3.bf16.msra.mxu1 %v14179_v41  ;;  %v14217_v41 = vld [vmem:[%s14542_s11 + $0x1318] sm:$0xff]  }
 0x260   : > { %12933 = vmatprep.subr.bf16.mxu1 %v14182_v37  ;;  %v14220_v37 = vld [vmem:[%s14542_s11 + $0x1360] sm:$0xff]  }
 0x261   : > { %12912 = vmatpush3.bf16.msra.mxu0 %v14181_v44  ;;  %v14219_v44 = vld [vmem:[%s14542_s11 + $0x1398] sm:$0xff]  }
 0x262   : > { %12913 = vmatprep.subr.bf16.mxu0 %v14184_v46  ;;  %v14222_v46 = vld [vmem:[%s14542_s11 + $0x13e0] sm:$0xff]  }
 0x263   : > { %12934 = vmatpush3.bf16.msra.mxu1 %v14183_v45  ;;  %v14221_v45 = vld [vmem:[%s14542_s11 + $0x1320] sm:$0xff]  }
 0x264   : > { %12935 = vmatprep.subr.bf16.mxu1 %v14186_v48  ;;  %v14224_v48 = vld [vmem:[%s14542_s11 + $0x1368] sm:$0xff]  }
 0x265   : > { %12914 = vmatpush3.bf16.msra.mxu0 %v14185_v47  ;;  %v14223_v47 = vld [vmem:[%s14542_s11 + $0x13a0] sm:$0xff]  }
 0x266   : > { %12915 = vmatprep.subr.bf16.mxu0 %v14188_v50  ;;  %v14226_v50 = vld [vmem:[%s14542_s11 + $0x13e8] sm:$0xff]  }
 0x267   : > { %12936 = vmatpush3.bf16.msra.mxu1 %v14187_v49  ;;  %v14225_v49 = vld [vmem:[%s14542_s11 + $0x1328] sm:$0xff]  }
 0x268   : > { %12937 = vmatprep.subr.bf16.mxu1 %v14190_v52  ;;  %v14228_v52 = vld [vmem:[%s14542_s11 + $0x1370] sm:$0xff]  }
 0x269   : > { %12916 = vmatpush3.bf16.msra.mxu0 %v14189_v51  ;;  %v14227_v51 = vld [vmem:[%s14542_s11 + $0x13a8] sm:$0xff]  }
 0x26a   : > { %12917 = vmatprep.subr.bf16.mxu0 %v14192_v54  ;;  %v14229_v54 = vld [vmem:[%s14542_s11 + $0x1330] sm:$0xff]  }
 0x26b   : > { %v12615_v60 = vpop.f32.mrb[44].mxu0  ;;  %12938 = vmatpush3.bf16.msra.mxu1 %v14191_v53 }
 0x26c   : > { %v12616_v62 = vpop.f32.mrb[45].mxu0  ;;  %12939 = vmatprep.subr.bf16.mxu1 %v14194_v57  ;;  %v14230_v57 = vld [vmem:[%s14542_s11 + $0x13f0] sm:$0xff]  }
 0x26d   : > { %v12617_v0 = vadd.f32 %v12616_v62, %v12615_v60  ;;  %v12618_v1 = vpop.f32.mrb[46].mxu0  ;;  %v12637_v2 = vpop.f32.mrb[44].mxu1  ;;  %12918 = vmatpush3.bf16.msra.mxu0 %v14193_v55  ;;  %v14232_v62 = vld [vmem:[%s14542_s11 + $0x1378] sm:$0xff]  }
 0x26e   : > { %v12619_v4 = vpop.f32.mrb[47].mxu0  ;;  %v12638_v5 = vpop.f32.mrb[45].mxu1  ;;  %12919 = vmatprep.subr.bf16.mxu0 %v14196_v59 }
 0x26f   : > { %v8215_v6 = vadd.f32 %v12617_v0, %v15261_v28  ;;  %v12639_v7 = vadd.f32 %v12638_v5, %v12637_v2  ;;  %12940 = vmatpush3.bf16.msra.mxu1 %v14195_v58  ;;  %v12640_v10 = vpop.f32.mrb[46].mxu1  ;;  %v2376_v28 = vcombine.high %v2366_v24, %v2366_v24  ;;  %v14234_v4 = vld [vmem:[%s14542_s11 + $0x13f8] sm:$0xff]  }
 0x270   : > { %12941 = vmatprep.subr.bf16.mxu1 %v14198_v63  ;;  %v12641_v12 = vpop.f32.mrb[47].mxu1  ;;  %v14238_v10 = vld [vmem:[%s14542_s11 + $0x1400] sm:$0xff]   ;;  %v14250_v24 = vld [vmem:[%s14542_s11 + $0x1418] sm:$0xff]  }
 0x271   : > { %v15299_v13 = vadd.f32 %v12639_v7, %v8215_v6  ;;  %12920 = vmatpush3.bf16.msra.mxu0 %v14197_v61  ;;  %8812 = vmatprep.mubr.bf16.mxu1 %v2376_v28  ;;  %v14231_v61 = vld [vmem:[%s14542_s11 + $0x13b0] sm:$0xff]   ;;  %v14236_v7 = vld [vmem:[%s14542_s11 + $0x13b8] sm:$0xff]   ;;  %v14240_v12 = vld [vmem:[%s14542_s11 + $0x1480] sm:$0xff]  }
 0x272   : > { %12921 = vmatprep.subr.bf16.mxu0 %v14200_v3  ;;  %v14255_v28 = vld [vmem:[%s14542_s11 + $0x14e0] sm:$0xff]  }
 0x273   : > { %12942 = vmatpush3.bf16.msra.mxu1 %v14199_v56  ;;  %v14233_v56 = vld [vmem:[%s14542_s11 + $0x1338] sm:$0xff]  }
 0x274   : > { %12943 = vmatprep.subr.bf16.mxu1 %v14202_v9  ;;  %v14237_v9 = vld [vmem:[%s14542_s11 + $0x1440] sm:$0xff]  }
 0x275   : > { %12922 = vmatpush3.bf16.msra.mxu0 %v14201_v8  ;;  %v2359_v8 = vrot.slane %v15307_v21, %v14583_v42  ;;  %v14248_v21 = vld [vmem:[%s14542_s11 + $0x1490] sm:$0xff]  }
 0x276   : > { %12951 = vmatprep.subr.bf16.mxu0 %v14204_v17  ;;  %v14244_v17 = vld [vmem:[%s14542_s11 + $0x1488] sm:$0xff]  }
 0x277   : > { %12944 = vmatpush3.bf16.msra.mxu1 %v14203_v15  ;;  %v14242_v15 = vld [vmem:[%s14542_s11 + $0x1408] sm:$0xff]  }
 0x278   : > { %8773 = vmatmul.mubr.bf16.vlgmr.msra.gmra.mrb[72].mxu0 %v2352_v20  ;;  %12973 = vmatprep.subr.bf16.mxu1 %v14206_v22  ;;  %v14246_v20 = vld [vmem:[%s14542_s11 + $0x1410] sm:$0xff]   ;;  %v14249_v22 = vld [vmem:[%s14542_s11 + $0x1458] sm:$0xff]  }
 0x279   : > { %12952 = vmatpush3.bf16.msra.mxu0 %v14205_v19  ;;  %8852 = vmatprep.mubr.bf16.mxu0 %v2373_v30  ;;  %v14247_v19 = vld [vmem:[%s14542_s11 + $0x14d0] sm:$0xff]   ;;  %v14257_v30 = vld [vmem:[%s14542_s11 + $0x1468] sm:$0xff]  }
 0x27a   : > { %8813 = vmatmul.mubr.bf16.vlgmr.msra.gmra.mrb[72].mxu1 %v2374_v26  ;;  %12953 = vmatprep.subr.bf16.mxu0 %v14208_v27  ;;  %v14253_v26 = vld [vmem:[%s14542_s11 + $0x1460] sm:$0xff]  }
 0x27b   : > { %12974 = vmatpush3.bf16.msra.mxu1 %v14207_v23  ;;  %8892 = vmatprep.mubr.bf16.mxu1 %v2377_v33  ;;  %v14251_v23 = vld [vmem:[%s14542_s11 + $0x14d8] sm:$0xff]   ;;  %v14254_v27 = vld [vmem:[%s14542_s11 + $0x1420] sm:$0xff]   ;;  %v14260_v33 = vld [vmem:[%s14542_s11 + $0x14a8] sm:$0xff]  }
 0x27c   : > { %12975 = vmatprep.subr.bf16.mxu1 %v14210_v31  ;;  %v14258_v31 = vld [vmem:[%s14542_s11 + $0x1428] sm:$0xff]  }
 0x27d   : > { %12954 = vmatpush3.bf16.msra.mxu0 %v14209_v29  ;;  %v14256_v29 = vld [vmem:[%s14542_s11 + $0x14a0] sm:$0xff]  }
 0x27e   : > { %12955 = vmatprep.subr.bf16.mxu0 %v14212_v35  ;;  %v14261_v35 = vld [vmem:[%s14542_s11 + $0x1470] sm:$0xff]  }
 0x27f   : > { %12976 = vmatpush3.bf16.msra.mxu1 %v14211_v32  ;;  %v14259_v32 = vld [vmem:[%s14542_s11 + $0x14e8] sm:$0xff]  }
 0x280   : > { %12977 = vmatprep.subr.bf16.mxu1 %v14214_v38  ;;  %v14262_v38 = vld [vmem:[%s14542_s11 + $0x1430] sm:$0xff]  }
 0x281   : > { %12956 = vmatpush3.bf16.msra.mxu0 %v14213_v36 }
 0x282   : > { %12957 = vmatprep.subr.bf16.mxu0 %v14216_v40  ;;  %v14263_v40 = vld [vmem:[%s14542_s11 + $0x14f0] sm:$0xff]  }
 0x283   : > { %12978 = vmatpush3.bf16.msra.mxu1 %v14215_v39 }
 0x284   : > { %12979 = vmatprep.subr.bf16.mxu1 %v14218_v43 }
 0x285   : > { %12958 = vmatpush3.bf16.msra.mxu0 %v14217_v41 }
 0x286   : > { %12959 = vmatprep.subr.bf16.mxu0 %v14220_v37  ;;  %v14264_v37 = vld [vmem:[%s14542_s11 + $0x14b0] sm:$0xff]  }
 0x287   : > { %12980 = vmatpush3.bf16.msra.mxu1 %v14219_v44 }
 0x288   : > { %12981 = vmatprep.subr.bf16.mxu1 %v14222_v46 }
 0x289   : > { %12960 = vmatpush3.bf16.msra.mxu0 %v14221_v45  ;;  %v14265_v45 = vld [vmem:[%s14542_s11 + $0x1478] sm:$0xff]  }
 0x28a   : > { %12961 = vmatprep.subr.bf16.mxu0 %v14224_v48 }
 0x28b   : > { %v12659_v53 = vpop.f32.mrb[48].mxu0  ;;  %12982 = vmatpush3.bf16.msra.mxu1 %v14223_v47 }
 0x28c   : > { %v12660_v55 = vpop.f32.mrb[49].mxu0  ;;  %12983 = vmatprep.subr.bf16.mxu1 %v14226_v50  ;;  %v14266_v50 = vld [vmem:[%s14542_s11 + $0x1438] sm:$0xff]  }
 0x28d   : > { %v12661_v58 = vadd.f32 %v12660_v55, %v12659_v53  ;;  %v12662_v59 = vpop.f32.mrb[50].mxu0  ;;  %v12681_v60 = vpop.f32.mrb[48].mxu1  ;;  %12962 = vmatpush3.bf16.msra.mxu0 %v14225_v49  ;;  %v304_v55 = vld [vmem:[%s14537_s30 + $0x50] sm:$0xff] }
 0x28e   : > { %v12663_v63 = vpop.f32.mrb[51].mxu0  ;;  %v12682_v0 = vpop.f32.mrb[49].mxu1  ;;  %12963 = vmatprep.subr.bf16.mxu0 %v14228_v52  ;;  %v14267_v52 = vld [vmem:[%s14542_s11 + $0x14f8] sm:$0xff]   ;;  %v2378_v59 = vcombine.high %v304_v55, %v304_v55 }
 0x28f   : > { %v8295_v1 = vadd.f32 %v12661_v58, %v15299_v13  ;;  %v12683_v2 = vadd.f32 %v12682_v0, %v12681_v60  ;;  %12984 = vmatpush3.bf16.msra.mxu1 %v14227_v51  ;;  %v12684_v3 = vpop.f32.mrb[50].mxu1  ;;  %v2375_v13 = vcombine.high %v2359_v8, %v2359_v8  ;;  %v14268_v58 = vld [vmem:[%s14542_s11 + $0x14b8] sm:$0xff]   ;;  %v14269_v60 = vld [vmem:[%s14542_s11 + $0x1540] sm:$0xff]  }
 0x290   : > { %12985 = vmatprep.subr.bf16.mxu1 %v14230_v57  ;;  %v12685_v5 = vpop.f32.mrb[51].mxu1  ;;  %v2385_v57 = vrot.slane %v304_v55, %v14583_v42  ;;  %v15388_v63 = vrot.slane %v2378_v59, %v14583_v42  ;;  %v14271_v0 = vld [vmem:[%s14542_s11 + $0x15c0] sm:$0xff]   ;;  %v14306_v55 = vld [vmem:[%s14542_s11 + $0x1648] sm:$0xff]  }
 0x291   : > { %v15343_v6 = vadd.f32 %v12683_v2, %v8295_v1  ;;  %12964 = vmatpush3.bf16.msra.mxu0 %v14229_v54  ;;  %v14270_v2 = vld [vmem:[%s14542_s11 + $0x1500] sm:$0xff]   ;;  %v14307_v59 = vld [vmem:[%s14542_s11 + $0x1608] sm:$0xff]  }
 0x292   : > { %12965 = vmatprep.subr.bf16.mxu0 %v14232_v62  ;;  %v2401_v62 = vrot.slane %v2385_v57, %v14583_v42 }
 0x293   : > { %12986 = vmatpush3.bf16.msra.mxu1 %v14231_v61  ;;  %v2393_v61 = vcombine.high %v2385_v57, %v2385_v57  ;;  %v14305_v57 = vld [vmem:[%s14542_s11 + $0x1680] sm:$0xff]  }
 0x294   : > { %12987 = vmatprep.subr.bf16.mxu1 %v14234_v4  ;;  %v2423_v3 = vcombine.high %v2401_v62, %v2401_v62  ;;  %v14273_v4 = vld [vmem:[%s14542_s11 + $0x1548] sm:$0xff]  }
 0x295   : > { %12966 = vmatpush3.bf16.msra.mxu0 %v14233_v56  ;;  %v2415_v1 = vrot.slane %v2393_v61, %v14583_v42  ;;  %v2394_v56 = vcombine.high %v15388_v63, %v15388_v63  ;;  %v14309_v61 = vld [vmem:[%s14542_s11 + $0x1688] sm:$0xff]  }
 0x296   : > { %12995 = vmatprep.subr.bf16.mxu0 %v14237_v9  ;;  %v14274_v9 = vld [vmem:[%s14542_s11 + $0x1508] sm:$0xff]  }
 0x297   : > { %12988 = vmatpush3.bf16.msra.mxu1 %v14236_v7  ;;  %v2425_v5 = vcombine.high %v2415_v1, %v2415_v1  ;;  %v2422_v7 = vrot.slane %v2394_v56, %v14583_v42  ;;  %v14315_v56 = vld [vmem:[%s14542_s11 + $0x1618] sm:$0xff]  }
 0x298   : > { %8853 = vmatmul.mubr.bf16.vlgmr.msra.gmra.mrb[76].mxu0 %v2359_v8  ;;  %13017 = vmatprep.subr.bf16.mxu1 %v14239_v11  ;;  %v14275_v8 = vld [vmem:[%s14542_s11 + $0x15c8] sm:$0xff]   ;;  %v14277_v11 = vld [vmem:[%s14542_s11 + $0x1550] sm:$0xff]  }
 0x299   : > { %12996 = vmatpush3.bf16.msra.mxu0 %v14238_v10  ;;  %8932 = vmatprep.mubr.bf16.mxu0 %v2415_v1  ;;  %v2426_v10 = vcombine.high %v2422_v7, %v2422_v7  ;;  %v14313_v1 = vld [vmem:[%s14542_s11 + $0x1690] sm:$0xff]  }
 0x29a   : > { %8893 = vmatmul.mubr.bf16.vlgmr.msra.gmra.mrb[76].mxu1 %v2375_v13  ;;  %12997 = vmatprep.subr.bf16.mxu0 %v14241_v14  ;;  %v14279_v13 = vld [vmem:[%s14542_s11 + $0x15d0] sm:$0xff]  }
 0x29b   : > { %13018 = vmatpush3.bf16.msra.mxu1 %v14240_v12  ;;  %8972 = vmatprep.mubr.bf16.mxu1 %v2425_v5  ;;  %v14276_v12 = vld [vmem:[%s14542_s11 + $0x1588] sm:$0xff]   ;;  %v14278_v14 = vld [vmem:[%s14542_s11 + $0x1510] sm:$0xff]   ;;  %v14320_v5 = vld [vmem:[%s14542_s11 + $0x16e0] sm:$0xff]  }
 0x29c   : > { %13019 = vmatprep.subr.bf16.mxu1 %v14243_v16  ;;  %v14280_v16 = vld [vmem:[%s14542_s11 + $0x1590] sm:$0xff]  }
 0x29d   : > { %12998 = vmatpush3.bf16.msra.mxu0 %v14242_v15  ;;  %v14281_v15 = vld [vmem:[%s14542_s11 + $0x1558] sm:$0xff]  }
 0x29e   : > { %12999 = vmatprep.subr.bf16.mxu0 %v14245_v18  ;;  %v14282_v18 = vld [vmem:[%s14542_s11 + $0x1518] sm:$0xff]  }
 0x29f   : > { %13020 = vmatpush3.bf16.msra.mxu1 %v14244_v17  ;;  %v14283_v17 = vld [vmem:[%s14542_s11 + $0x15d8] sm:$0xff]  }
 0x2a0   : > { %13021 = vmatprep.subr.bf16.mxu1 %v14247_v19  ;;  %v14284_v19 = vld [vmem:[%s14542_s11 + $0x1598] sm:$0xff]  }
 0x2a1   : > { %13000 = vmatpush3.bf16.msra.mxu0 %v14246_v20  ;;  %v14285_v20 = vld [vmem:[%s14542_s11 + $0x1560] sm:$0xff]  }
 0x2a2   : > { %13001 = vmatprep.subr.bf16.mxu0 %v14249_v22  ;;  %v14286_v22 = vld [vmem:[%s14542_s11 + $0x1520] sm:$0xff]  }
 0x2a3   : > { %13022 = vmatpush3.bf16.msra.mxu1 %v14248_v21  ;;  %v14287_v21 = vld [vmem:[%s14542_s11 + $0x15e0] sm:$0xff]  }
 0x2a4   : > { %13023 = vmatprep.subr.bf16.mxu1 %v14251_v23  ;;  %v14288_v23 = vld [vmem:[%s14542_s11 + $0x15a0] sm:$0xff]  }
 0x2a5   : > { %13002 = vmatpush3.bf16.msra.mxu0 %v14250_v24  ;;  %v14289_v24 = vld [vmem:[%s14542_s11 + $0x1568] sm:$0xff]  }
 0x2a6   : > { %13003 = vmatprep.subr.bf16.mxu0 %v14253_v26  ;;  %v14290_v26 = vld [vmem:[%s14542_s11 + $0x1528] sm:$0xff]  }
 0x2a7   : > { %13024 = vmatpush3.bf16.msra.mxu1 %v14252_v25  ;;  %v14291_v25 = vld [vmem:[%s14542_s11 + $0x15e8] sm:$0xff]  }
 0x2a8   : > { %13025 = vmatprep.subr.bf16.mxu1 %v14255_v28  ;;  %v14293_v28 = vld [vmem:[%s14542_s11 + $0x1570] sm:$0xff]  }
 0x2a9   : > { %13004 = vmatpush3.bf16.msra.mxu0 %v14254_v27 }
 0x2aa   : > { %13005 = vmatprep.subr.bf16.mxu0 %v14257_v30  ;;  %v14292_v30 = vld [vmem:[%s14542_s11 + $0x15a8] sm:$0xff]  }
 0x2ab   : > { %v12703_v36 = vpop.f32.mrb[52].mxu0  ;;  %13026 = vmatpush3.bf16.msra.mxu1 %v14256_v29 }
 0x2ac   : > { %v12704_v39 = vpop.f32.mrb[53].mxu0  ;;  %13027 = vmatprep.subr.bf16.mxu1 %v14259_v32 }
 0x2ad   : > { %v12705_v41 = vadd.f32 %v12704_v39, %v12703_v36  ;;  %v12706_v43 = vpop.f32.mrb[54].mxu0  ;;  %v12725_v44 = vpop.f32.mrb[52].mxu1  ;;  %13006 = vmatpush3.bf16.msra.mxu0 %v14258_v31  ;;  %v14295_v36 = vld [vmem:[%s14542_s11 + $0x15f0] sm:$0xff]  }
 0x2ae   : > { %v12707_v46 = vpop.f32.mrb[55].mxu0  ;;  %v12726_v47 = vpop.f32.mrb[53].mxu1  ;;  %13007 = vmatprep.subr.bf16.mxu0 %v14261_v35  ;;  %v14294_v35 = vld [vmem:[%s14542_s11 + $0x1530] sm:$0xff]   ;;  %v14297_v43 = vld [vmem:[%s14542_s11 + $0x1578] sm:$0xff]  }
 0x2af   : > { %v8375_v48 = vadd.f32 %v12705_v41, %v15343_v6  ;;  %v12727_v49 = vadd.f32 %v12726_v47, %v12725_v44  ;;  %13028 = vmatpush3.bf16.msra.mxu1 %v14260_v33  ;;  %v12728_v51 = vpop.f32.mrb[54].mxu1  ;;  %v14272_v6 = vld [vmem:[%s14542_s11 + $0x1580] sm:$0xff]   ;;  %v14299_v47 = vld [vmem:[%s14542_s11 + $0x15f8] sm:$0xff]  }
 0x2b0   : > { %13029 = vmatprep.subr.bf16.mxu1 %v14263_v40  ;;  %v12729_v53 = vpop.f32.mrb[55].mxu1  ;;  %v14301_v51 = vld [vmem:[%s14542_s11 + $0x15b8] sm:$0xff]  }
 0x2b1   : > { %v15380_v54 = vadd.f32 %v12727_v49, %v8375_v48  ;;  %13008 = vmatpush3.bf16.msra.mxu0 %v14262_v38  ;;  %v14298_v48 = vld [vmem:[%s14542_s11 + $0x1538] sm:$0xff]   ;;  %v2408_v49 = vrot.slane %v15388_v63, %v14583_v42  ;;  %v14303_v53 = vld [vmem:[%s14542_s11 + $0x1600] sm:$0xff]   ;;  %v14311_v63 = vld [vmem:[%s14542_s11 + $0x1610] sm:$0xff]  }
 0x2b2   : > { %13009 = vmatprep.subr.bf16.mxu0 %v14265_v45 }
 0x2b3   : > { %13030 = vmatpush3.bf16.msra.mxu1 %v14264_v37  ;;  %v14296_v37 = vld [vmem:[%s14542_s11 + $0x15b0] sm:$0xff]  }
 0x2b4   : > { %13031 = vmatprep.subr.bf16.mxu1 %v14267_v52  ;;  %v14304_v52 = vld [vmem:[%s14542_s11 + $0x16c0] sm:$0xff]  }
 0x2b5   : > { %13010 = vmatpush3.bf16.msra.mxu0 %v14266_v50  ;;  %v14302_v50 = vld [vmem:[%s14542_s11 + $0x1640] sm:$0xff]  }
 0x2b6   : > { %13039 = vmatprep.subr.bf16.mxu0 %v14269_v60  ;;  %v14310_v60 = vld [vmem:[%s14542_s11 + $0x1650] sm:$0xff]  }
 0x2b7   : > { %13032 = vmatpush3.bf16.msra.mxu1 %v14268_v58  ;;  %v14308_v58 = vld [vmem:[%s14542_s11 + $0x16c8] sm:$0xff]  }
 0x2b8   : > { %13061 = vmatprep.subr.bf16.mxu1 %v14271_v0  ;;  %8933 = vmatmul.mubr.bf16.vlgmr.msra.gmra.mrb[80].mxu0 %v2401_v62  ;;  %v14312_v62 = vld [vmem:[%s14542_s11 + $0x16d0] sm:$0xff]   ;;  %v14314_v0 = vld [vmem:[%s14542_s11 + $0x1658] sm:$0xff]  }
 0x2b9   : > { %13040 = vmatpush3.bf16.msra.mxu0 %v14270_v2  ;;  %9012 = vmatprep.mubr.bf16.mxu0 %v2422_v7  ;;  %v14316_v2 = vld [vmem:[%s14542_s11 + $0x16d8] sm:$0xff]   ;;  %v14322_v7 = vld [vmem:[%s14542_s11 + $0x1668] sm:$0xff]  }
 0x2ba   : > { %8973 = vmatmul.mubr.bf16.vlgmr.msra.gmra.mrb[80].mxu1 %v2423_v3  ;;  %13041 = vmatprep.subr.bf16.mxu0 %v14273_v4  ;;  %v14318_v3 = vld [vmem:[%s14542_s11 + $0x1660] sm:$0xff]   ;;  %v14317_v4 = vld [vmem:[%s14542_s11 + $0x1698] sm:$0xff]  }
 0x2bb   : > { %13062 = vmatpush3.bf16.msra.mxu1 %v14272_v6  ;;  %9052 = vmatprep.mubr.bf16.mxu1 %v2426_v10  ;;  %v14319_v6 = vld [vmem:[%s14542_s11 + $0x1620] sm:$0xff]   ;;  %v14323_v10 = vld [vmem:[%s14542_s11 + $0x1628] sm:$0xff]  }
 0x2bc   : > { %13063 = vmatprep.subr.bf16.mxu1 %v14275_v8  ;;  %v14321_v8 = vld [vmem:[%s14542_s11 + $0x16a0] sm:$0xff]  }
 0x2bd   : > { %13042 = vmatpush3.bf16.msra.mxu0 %v14274_v9  ;;  %v14324_v9 = vld [vmem:[%s14542_s11 + $0x16e8] sm:$0xff]  }
 0x2be   : > { %13043 = vmatprep.subr.bf16.mxu0 %v14277_v11 }
 0x2bf   : > { %13064 = vmatpush3.bf16.msra.mxu1 %v14276_v12  ;;  %v14326_v12 = vld [vmem:[%s14542_s11 + $0x1670] sm:$0xff]  }
 0x2c0   : > { %13065 = vmatprep.subr.bf16.mxu1 %v14279_v13 }
 0x2c1   : > { %13044 = vmatpush3.bf16.msra.mxu0 %v14278_v14  ;;  %v14325_v14 = vld [vmem:[%s14542_s11 + $0x16a8] sm:$0xff]  }
 0x2c2   : > { %13045 = vmatprep.subr.bf16.mxu0 %v14281_v15 }
 0x2c3   : > { %13066 = vmatpush3.bf16.msra.mxu1 %v14280_v16 }
 0x2c4   : > { %13067 = vmatprep.subr.bf16.mxu1 %v14283_v17 }
 0x2c5   : > { %13046 = vmatpush3.bf16.msra.mxu0 %v14282_v18  ;;  %v14327_v18 = vld [vmem:[%s14542_s11 + $0x1630] sm:$0xff]  }
 0x2c6   : > { %13047 = vmatprep.subr.bf16.mxu0 %v14285_v20  ;;  %v14328_v20 = vld [vmem:[%s14542_s11 + $0x16f0] sm:$0xff]  }
 0x2c7   : > { %13068 = vmatpush3.bf16.msra.mxu1 %v14284_v19 }
 0x2c8   : > { %13069 = vmatprep.subr.bf16.mxu1 %v14287_v21 }
 0x2c9   : > { %13048 = vmatpush3.bf16.msra.mxu0 %v14286_v22  ;;  %v14329_v22 = vld [vmem:[%s14542_s11 + $0x16b0] sm:$0xff]  }
 0x2ca   : > { %13049 = vmatprep.subr.bf16.mxu0 %v14289_v24 }
 0x2cb   : > { %v12747_v27 = vpop.f32.mrb[56].mxu0  ;;  %13070 = vmatpush3.bf16.msra.mxu1 %v14288_v23 }
 0x2cc   : > { %v12748_v29 = vpop.f32.mrb[57].mxu0  ;;  %13071 = vmatprep.subr.bf16.mxu1 %v14291_v25  ;;  %v14330_v25 = vld [vmem:[%s14542_s11 + $0x1678] sm:$0xff]  }
 0x2cd   : > { %v12749_v31 = vadd.f32 %v12748_v29, %v12747_v27  ;;  %v12750_v32 = vpop.f32.mrb[58].mxu0  ;;  %v12769_v33 = vpop.f32.mrb[56].mxu1  ;;  %13050 = vmatpush3.bf16.msra.mxu0 %v14290_v26  ;;  %v14331_v27 = vld [vmem:[%s14542_s11 + $0x1638] sm:$0xff]  }
 0x2ce   : > { %v12751_v38 = vpop.f32.mrb[59].mxu0  ;;  %v12770_v39 = vpop.f32.mrb[57].mxu1  ;;  %13051 = vmatprep.subr.bf16.mxu0 %v14293_v28 }
 0x2cf   : > { %v8455_v40 = vadd.f32 %v12749_v31, %v15380_v54  ;;  %v12771_v41 = vadd.f32 %v12770_v39, %v12769_v33  ;;  %v12772_v44 = vpop.f32.mrb[58].mxu1  ;;  %13072 = vmatpush3.bf16.msra.mxu1 %v14292_v30  ;;  %v2424_v54 = vcombine.high %v2408_v49, %v2408_v49  ;;  %v14332_v30 = vld [vmem:[%s14542_s11 + $0x16f8] sm:$0xff]  }
 0x2d0   : > { %v12773_v45 = vpop.f32.mrb[59].mxu1  ;;  %13073 = vmatprep.subr.bf16.mxu1 %v14295_v36  ;;  %v305_v31 = vld [vmem:[%s14537_s30 + $0x58] sm:$0xff]  ;;  %v14334_v36 = vld [vmem:[%s14542_s11 + $0x1740] sm:$0xff]  }
 0x2d1   : > { %v15423_v46 = vadd.f32 %v12771_v41, %v8455_v40  ;;  %13052 = vmatpush3.bf16.msra.mxu0 %v14294_v35  ;;  %v2434_v32 = vrot.slane %v305_v31, %v14583_v42  ;;  %v14333_v33 = vld [vmem:[%s14542_s11 + $0x16b8] sm:$0xff]   ;;  %v2427_v35 = vcombine.high %v305_v31, %v305_v31  ;;  %v14336_v41 = vld [vmem:[%s14542_s11 + $0x17c0] sm:$0xff]   ;;  %v14370_v31 = vld [vmem:[%s14542_s11 + $0x1808] sm:$0xff]  }
 0x2d2   : > { %13053 = vmatprep.subr.bf16.mxu0 %v14297_v43  ;;  %v14335_v44 = vld [vmem:[%s14542_s11 + $0x1700] sm:$0xff]  }
 0x2d3   : > { %13074 = vmatpush3.bf16.msra.mxu1 %v14296_v37  ;;  %v2442_v38 = vcombine.high %v2434_v32, %v2434_v32  ;;  %v2450_v39 = vrot.slane %v2434_v32, %v14583_v42  ;;  %v15470_v40 = vrot.slane %v2427_v35, %v14583_v42  ;;  %v14371_v32 = vld [vmem:[%s14542_s11 + $0x1850] sm:$0xff]   ;;  %v14373_v35 = vld [vmem:[%s14542_s11 + $0x1858] sm:$0xff]  }
 0x2d4   : > { %13075 = vmatprep.subr.bf16.mxu1 %v14299_v47 }
 0x2d5   : > { %13054 = vmatpush3.bf16.msra.mxu0 %v14298_v48  ;;  %v2464_v43 = vrot.slane %v2442_v38, %v14583_v42  ;;  %v2443_v37 = vcombine.high %v15470_v40, %v15470_v40  ;;  %v2472_v45 = vcombine.high %v2450_v39, %v2450_v39  ;;  %v14337_v48 = vld [vmem:[%s14542_s11 + $0x1780] sm:$0xff]  }
 0x2d6   : > { %13083 = vmatprep.subr.bf16.mxu0 %v14302_v50  ;;  %v14340_v50 = vld [vmem:[%s14542_s11 + $0x17c8] sm:$0xff]   ;;  %v14375_v38 = vld [vmem:[%s14542_s11 + $0x1860] sm:$0xff]  }
 0x2d7   : > { %13076 = vmatpush3.bf16.msra.mxu1 %v14301_v51  ;;  %v2474_v47 = vcombine.high %v2464_v43, %v2464_v43  ;;  %v14339_v51 = vld [vmem:[%s14542_s11 + $0x1708] sm:$0xff]  }
 0x2d8   : > { %9013 = vmatmul.mubr.bf16.vlgmr.msra.gmra.mrb[84].mxu0 %v2408_v49  ;;  %13105 = vmatprep.subr.bf16.mxu1 %v14304_v52  ;;  %v2471_v49 = vrot.slane %v2443_v37, %v14583_v42 }
 0x2d9   : > { %13084 = vmatpush3.bf16.msra.mxu0 %v14303_v53  ;;  %9092 = vmatprep.mubr.bf16.mxu0 %v2464_v43  ;;  %v14342_v53 = vld [vmem:[%s14542_s11 + $0x1750] sm:$0xff]  }
 0x2da   : > { %9053 = vmatmul.mubr.bf16.vlgmr.msra.gmra.mrb[84].mxu1 %v2424_v54  ;;  %13085 = vmatprep.subr.bf16.mxu0 %v14306_v55  ;;  %v2475_v52 = vcombine.high %v2471_v49, %v2471_v49  ;;  %v14341_v54 = vld [vmem:[%s14542_s11 + $0x1788] sm:$0xff]   ;;  %v14344_v55 = vld [vmem:[%s14542_s11 + $0x17d0] sm:$0xff]  }
 0x2db   : > { %13106 = vmatpush3.bf16.msra.mxu1 %v14305_v57  ;;  %9132 = vmatprep.mubr.bf16.mxu1 %v2474_v47  ;;  %v14343_v57 = vld [vmem:[%s14542_s11 + $0x1710] sm:$0xff]  }
 0x2dc   : > { %13107 = vmatprep.subr.bf16.mxu1 %v14308_v58  ;;  %v14346_v58 = vld [vmem:[%s14542_s11 + $0x1758] sm:$0xff]   ;;  %v14379_v47 = vld [vmem:[%s14542_s11 + $0x1870] sm:$0xff]  }
 0x2dd   : > { %13086 = vmatpush3.bf16.msra.mxu0 %v14307_v59  ;;  %v14345_v59 = vld [vmem:[%s14542_s11 + $0x1790] sm:$0xff]  }
 0x2de   : > { %13087 = vmatprep.subr.bf16.mxu0 %v14310_v60  ;;  %v14348_v60 = vld [vmem:[%s14542_s11 + $0x17d8] sm:$0xff]  }
 0x2df   : > { %13108 = vmatpush3.bf16.msra.mxu1 %v14309_v61  ;;  %v14347_v61 = vld [vmem:[%s14542_s11 + $0x1718] sm:$0xff]  }
 0x2e0   : > { %13109 = vmatprep.subr.bf16.mxu1 %v14312_v62  ;;  %v14350_v62 = vld [vmem:[%s14542_s11 + $0x1760] sm:$0xff]  }
 0x2e1   : > { %13088 = vmatpush3.bf16.msra.mxu0 %v14311_v63  ;;  %v14349_v63 = vld [vmem:[%s14542_s11 + $0x1798] sm:$0xff]  }
 0x2e2   : > { %13089 = vmatprep.subr.bf16.mxu0 %v14314_v0  ;;  %v14352_v0 = vld [vmem:[%s14542_s11 + $0x17e0] sm:$0xff]  }
 0x2e3   : > { %13110 = vmatpush3.bf16.msra.mxu1 %v14313_v1  ;;  %v14351_v1 = vld [vmem:[%s14542_s11 + $0x1720] sm:$0xff]  }
 0x2e4   : > { %13111 = vmatprep.subr.bf16.mxu1 %v14316_v2  ;;  %v14354_v2 = vld [vmem:[%s14542_s11 + $0x1768] sm:$0xff]  }
 0x2e5   : > { %13090 = vmatpush3.bf16.msra.mxu0 %v14315_v56  ;;  %v14353_v56 = vld [vmem:[%s14542_s11 + $0x17a0] sm:$0xff]  }
 0x2e6   : > { %13091 = vmatprep.subr.bf16.mxu0 %v14318_v3  ;;  %v14356_v3 = vld [vmem:[%s14542_s11 + $0x17e8] sm:$0xff]  }
 0x2e7   : > { %13112 = vmatpush3.bf16.msra.mxu1 %v14317_v4 }
 0x2e8   : > { %13113 = vmatprep.subr.bf16.mxu1 %v14320_v5  ;;  %v14355_v5 = vld [vmem:[%s14542_s11 + $0x1728] sm:$0xff]  }
 0x2e9   : > { %13092 = vmatpush3.bf16.msra.mxu0 %v14319_v6 }
 0x2ea   : > { %13093 = vmatprep.subr.bf16.mxu0 %v14322_v7  ;;  %v14358_v7 = vld [vmem:[%s14542_s11 + $0x1770] sm:$0xff]  }
 0x2eb   : > { %v12791_v11 = vpop.f32.mrb[60].mxu0  ;;  %13114 = vmatpush3.bf16.msra.mxu1 %v14321_v8 }
 0x2ec   : > { %v12792_v13 = vpop.f32.mrb[61].mxu0  ;;  %13115 = vmatprep.subr.bf16.mxu1 %v14324_v9 }
 0x2ed   : > { %v12793_v15 = vadd.f32 %v12792_v13, %v12791_v11  ;;  %v12794_v16 = vpop.f32.mrb[62].mxu0  ;;  %v12813_v17 = vpop.f32.mrb[60].mxu1  ;;  %13094 = vmatpush3.bf16.msra.mxu0 %v14323_v10  ;;  %v14357_v11 = vld [vmem:[%s14542_s11 + $0x17a8] sm:$0xff]  }
 0x2ee   : > { %v12795_v19 = vpop.f32.mrb[63].mxu0  ;;  %v12814_v21 = vpop.f32.mrb[61].mxu1  ;;  %13095 = vmatprep.subr.bf16.mxu0 %v14326_v12  ;;  %v14360_v12 = vld [vmem:[%s14542_s11 + $0x17f0] sm:$0xff]  }
 0x2ef   : > { %v8535_v24 = vadd.f32 %v12793_v15, %v15423_v46  ;;  %v12815_v23 = vadd.f32 %v12814_v21, %v12813_v17  ;;  %v12816_v26 = vpop.f32.mrb[62].mxu1  ;;  %13116 = vmatpush3.bf16.msra.mxu1 %v14325_v14  ;;  %v14338_v46 = vld [vmem:[%s14542_s11 + $0x1748] sm:$0xff]   ;;  %v14359_v17 = vld [vmem:[%s14542_s11 + $0x1730] sm:$0xff]  }
 0x2f0   : > { %v12817_v28 = vpop.f32.mrb[63].mxu1  ;;  %13117 = vmatprep.subr.bf16.mxu1 %v14328_v20  ;;  %v14362_v20 = vld [vmem:[%s14542_s11 + $0x1778] sm:$0xff]   ;;  %v14367_v26 = vld [vmem:[%s14542_s11 + $0x1840] sm:$0xff]  }
 0x2f1   : > { %v15461_v29 = vadd.f32 %v12815_v23, %v8535_v24  ;;  %13096 = vmatpush3.bf16.msra.mxu0 %v14327_v18  ;;  %v14364_v24 = vld [vmem:[%s14542_s11 + $0x17f8] sm:$0xff]   ;;  %v14368_v28 = vld [vmem:[%s14542_s11 + $0x1800] sm:$0xff]  }
 0x2f2   : > { %13097 = vmatprep.subr.bf16.mxu0 %v14330_v25  ;;  %v14363_v23 = vld [vmem:[%s14542_s11 + $0x1738] sm:$0xff]   ;;  %v2457_v25 = vrot.slane %v15470_v40, %v14583_v42 }
 0x2f3   : > { %13118 = vmatpush3.bf16.msra.mxu1 %v14329_v22  ;;  %v14361_v22 = vld [vmem:[%s14542_s11 + $0x17b0] sm:$0xff]  }
 0x2f4   : > { %13119 = vmatprep.subr.bf16.mxu1 %v14332_v30  ;;  %v14369_v30 = vld [vmem:[%s14542_s11 + $0x1848] sm:$0xff]  }
 0x2f5   : > { %13098 = vmatpush3.bf16.msra.mxu0 %v14331_v27  ;;  %v14366_v27 = vld [vmem:[%s14542_s11 + $0x17b8] sm:$0xff]  }
 0x2f6   : > { %13127 = vmatprep.subr.bf16.mxu0 %v14334_v36  ;;  %v14374_v36 = vld [vmem:[%s14542_s11 + $0x1818] sm:$0xff]  }
 0x2f7   : > { %13120 = vmatpush3.bf16.msra.mxu1 %v14333_v33  ;;  %v14372_v33 = vld [vmem:[%s14542_s11 + $0x1810] sm:$0xff]  }
 0x2f8   : > { %13149 = vmatprep.subr.bf16.mxu1 %v14336_v41  ;;  %9093 = vmatmul.mubr.bf16.vlgmr.msra.gmra.mrb[88].mxu0 %v2450_v39  ;;  %v11282_v39 = vld.sshfl [vmem:[%s14537_s30 + $0x60] sm:$0x11 pattern:$0x75316420] }
 0x2f9   : > { %13128 = vmatpush3.bf16.msra.mxu0 %v14335_v44  ;;  %9172 = vmatprep.mubr.bf16.mxu0 %v2471_v49  ;;  %v2483_v40 = vcombine.high %v11282_v39, %v11282_v39  ;;  %v14376_v41 = vld [vmem:[%s14542_s11 + $0x1820] sm:$0xff]   ;;  %v14377_v44 = vld [vmem:[%s14542_s11 + $0x1868] sm:$0xff]  }
 0x2fa   : > { %9133 = vmatmul.mubr.bf16.vlgmr.msra.gmra.mrb[88].mxu1 %v2472_v45  ;;  %13129 = vmatprep.subr.bf16.mxu0 %v14338_v46  ;;  %v14378_v45 = vld [vmem:[%s14542_s11 + $0x1828] sm:$0xff]  }
 0x2fb   : > { %13150 = vmatpush3.bf16.msra.mxu1 %v14337_v48  ;;  %9212 = vmatprep.mubr.bf16.mxu1 %v2475_v52  ;;  %v2497_v43 = vrot.slane %v2483_v40, %v14583_v42 }
 0x2fc   : > { %13151 = vmatprep.subr.bf16.mxu1 %v14340_v50 }
 0x2fd   : > { %13130 = vmatpush3.bf16.msra.mxu0 %v14339_v51 }
 0x2fe   : > { %13131 = vmatprep.subr.bf16.mxu0 %v14342_v53 }
 0x2ff   : > { %13152 = vmatpush3.bf16.msra.mxu1 %v14341_v54 }
 0x300   : > { %13153 = vmatprep.subr.bf16.mxu1 %v14344_v55  ;;  %v14380_v55 = vld [vmem:[%s14542_s11 + $0x1830] sm:$0xff]  }
 0x301   : > { %13132 = vmatpush3.bf16.msra.mxu0 %v14343_v57 }
 0x302   : > { %13133 = vmatprep.subr.bf16.mxu0 %v14346_v58  ;;  %v14381_v58 = vld [vmem:[%s14542_s11 + $0x1878] sm:$0xff]  }
 0x303   : > { %13154 = vmatpush3.bf16.msra.mxu1 %v14345_v59 }
 0x304   : > { %13155 = vmatprep.subr.bf16.mxu1 %v14348_v60 }
 0x305   : > { %13134 = vmatpush3.bf16.msra.mxu0 %v14347_v61  ;;  %v14382_v61 = vld [vmem:[%s14542_s11 + $0x1838] sm:$0xff]  }
 0x306   : > { %13135 = vmatprep.subr.bf16.mxu0 %v14350_v62  ;;  %v2490_v62 = vrot.slane %v11282_v39, %v14583_v42 }
 0x307   : > { %13156 = vmatpush3.bf16.msra.mxu1 %v14349_v63 }
 0x308   : > { %13157 = vmatprep.subr.bf16.mxu1 %v14352_v0 }
 0x309   : > { %13136 = vmatpush3.bf16.msra.mxu0 %v14351_v1 }
 0x30a   : > { %13137 = vmatprep.subr.bf16.mxu0 %v14354_v2 }
 0x30b   : > { %v12835_v4 = vpop.f32.mrb[64].mxu0  ;;  %13158 = vmatpush3.bf16.msra.mxu1 %v14353_v56 }
 0x30c   : > { %v12836_v6 = vpop.f32.mrb[65].mxu0  ;;  %13159 = vmatprep.subr.bf16.mxu1 %v14356_v3 }
 0x30d   : > { %v12837_v8 = vadd.f32 %v12836_v6, %v12835_v4  ;;  %v12838_v9 = vpop.f32.mrb[66].mxu0  ;;  %v12857_v10 = vpop.f32.mrb[64].mxu1  ;;  %13138 = vmatpush3.bf16.msra.mxu0 %v14355_v5 }
 0x30e   : > { %v12839_v13 = vpop.f32.mrb[67].mxu0  ;;  %v12858_v14 = vpop.f32.mrb[65].mxu1  ;;  %13139 = vmatprep.subr.bf16.mxu0 %v14358_v7 }
 0x30f   : > { %v8615_v15 = vadd.f32 %v12837_v8, %v15461_v29  ;;  %v12859_v16 = vadd.f32 %v12858_v14, %v12857_v10  ;;  %v12860_v18 = vpop.f32.mrb[66].mxu1  ;;  %13160 = vmatpush3.bf16.msra.mxu1 %v14357_v11  ;;  %v2473_v29 = vcombine.high %v2457_v25, %v2457_v25 }
 0x310   : > { %v12861_v19 = vpop.f32.mrb[67].mxu1  ;;  %13161 = vmatprep.subr.bf16.mxu1 %v14360_v12 }
 0x311   : > { %v8655_v21 = vadd.f32 %v12859_v16, %v8615_v15  ;;  %13140 = vmatpush3.bf16.msra.mxu0 %v14359_v17 }
 0x312   : > { %13141 = vmatprep.subr.bf16.mxu0 %v14362_v20 }
 0x313   : > { %13162 = vmatpush3.bf16.msra.mxu1 %v14361_v22 }
 0x314   : > { %13163 = vmatprep.subr.bf16.mxu1 %v14364_v24 }
 0x315   : > { %13142 = vmatpush3.bf16.msra.mxu0 %v14363_v23 }
 0x316   : > { %13171 = vmatprep.subr.bf16.mxu0 %v14367_v26 }
 0x317   : > { %13164 = vmatpush3.bf16.msra.mxu1 %v14366_v27 }
 0x318   : > { %9173 = vmatmul.mubr.bf16.vlgmr.msra.gmra.mrb[92].mxu0 %v2457_v25 }
 0x319   : > { %13172 = vmatpush3.bf16.msra.mxu0 %v14368_v28  ;;  %9252 = vmatprep.mubr.bf16.mxu0 %v2497_v43 }
 0x31a   : > { %9213 = vmatmul.mubr.bf16.vlgmr.msra.gmra.mrb[92].mxu1 %v2473_v29  ;;  %13173 = vmatprep.subr.bf16.mxu0 %v14369_v30 }
 0x31d   : > { %13174 = vmatpush3.bf16.msra.mxu0 %v14370_v31 }
 0x31e   : > { %13175 = vmatprep.subr.bf16.mxu0 %v14371_v32 }
 0x321   : > { %13176 = vmatpush3.bf16.msra.mxu0 %v14372_v33 }
 0x322   : > { %13177 = vmatprep.subr.bf16.mxu0 %v14373_v35 }
 0x325   : > { %13178 = vmatpush3.bf16.msra.mxu0 %v14374_v36 }
 0x326   : > { %13179 = vmatprep.subr.bf16.mxu0 %v14375_v38 }
 0x329   : > { %13180 = vmatpush3.bf16.msra.mxu0 %v14376_v41 }
 0x32a   : > { %13181 = vmatprep.subr.bf16.mxu0 %v14377_v44 }
 0x32b   : > { %v12879_v37 = vpop.f32.mrb[68].mxu0 }
 0x32c   : > { %v12880_v46 = vpop.f32.mrb[69].mxu0 }
 0x32d   : > { %v12881_v48 = vadd.f32 %v12880_v46, %v12879_v37  ;;  %v12882_v49 = vpop.f32.mrb[70].mxu0  ;;  %v12901_v50 = vpop.f32.mrb[68].mxu1  ;;  %13182 = vmatpush3.bf16.msra.mxu0 %v14378_v45 }
 0x32e   : > { %v12883_v51 = vpop.f32.mrb[71].mxu0  ;;  %v12902_v52 = vpop.f32.mrb[69].mxu1  ;;  %13183 = vmatprep.subr.bf16.mxu0 %v14379_v47 }
 0x32f   : > { %v8695_v53 = vadd.f32 %v12881_v48, %v8655_v21  ;;  %v12903_v54 = vadd.f32 %v12902_v52, %v12901_v50  ;;  %v12904_v57 = vpop.f32.mrb[70].mxu1 }
 0x330   : > { %v12905_v59 = vpop.f32.mrb[71].mxu1 }
 0x331   : > { %v8735_v60 = vadd.f32 %v12903_v54, %v8695_v53  ;;  %13184 = vmatpush3.bf16.msra.mxu0 %v14380_v55 }
 0x332   : > { %13185 = vmatprep.subr.bf16.mxu0 %v14381_v58 }
 0x335   : > { %13186 = vmatpush3.bf16.msra.mxu0 %v14382_v61 }
 0x338   : > { %9253 = vmatmul.mubr.bf16.vlgmr.msra.gmra.mrb[96].mxu0 %v2490_v62 }
 0x34b   : > { %v12923_v63 = vpop.f32.mrb[72].mxu0 }
 0x34c   : > { %v12924_v0 = vpop.f32.mrb[73].mxu0 }
 0x34d   : > { %v12925_v1 = vadd.f32 %v12924_v0, %v12923_v63  ;;  %v12926_v2 = vpop.f32.mrb[74].mxu0  ;;  %v12945_v56 = vpop.f32.mrb[72].mxu1 }
 0x34e   : > { %v12927_v3 = vpop.f32.mrb[75].mxu0  ;;  %v12946_v4 = vpop.f32.mrb[73].mxu1 }
 0x34f   : > { %v8775_v5 = vadd.f32 %v12925_v1, %v8735_v60  ;;  %v12947_v6 = vadd.f32 %v12946_v4, %v12945_v56  ;;  %v12948_v7 = vpop.f32.mrb[74].mxu1 }
 0x350   : > { %v12949_v8 = vpop.f32.mrb[75].mxu1 }
 0x351   : > { %v8815_v9 = vadd.f32 %v12947_v6, %v8775_v5 }
 0x36b   : > { %v12967_v10 = vpop.f32.mrb[76].mxu0 }
 0x36c   : > { %v12968_v11 = vpop.f32.mrb[77].mxu0 }
 0x36d   : > { %v12969_v12 = vadd.f32 %v12968_v11, %v12967_v10  ;;  %v12970_v13 = vpop.f32.mrb[78].mxu0  ;;  %v12989_v14 = vpop.f32.mrb[76].mxu1  ;;  %v293_v11 = vld [vmem:[#allocation2] sm:$0x3] }
 0x36e   : > { %v12971_v42 = vpop.f32.mrb[79].mxu0  ;;  %v12990_v15 = vpop.f32.mrb[77].mxu1 }
 0x36f   : > { %v8855_v16 = vadd.f32 %v12969_v12, %v8815_v9  ;;  %v12991_v17 = vadd.f32 %v12990_v15, %v12989_v14  ;;  %v12992_v18 = vpop.f32.mrb[78].mxu1  ;;  %v9277_v42 = vld [vmem:[%s17067_s3] sm:$0xff] (!%p12067_p6)  ;;  %v9278_v15 = vld [vmem:[%s17067_s3 + $0x8] sm:$0xff] (!%p12067_p6) }
 0x370   : > { %v12993_v20 = vpop.f32.mrb[79].mxu1  ;;  %v13237_v18 = vpack.c.bf16 (!%p12067_p6), %v9278_v15, %v9277_v42  ;;  %v9457_v42 = vld [vmem:[%s17069_s5 + $0x288] sm:$0xff] (!%p12067_p6)  ;;  %v9289_v15 = vld [vmem:[%s17067_s3 + $0x60] sm:$0xf] (!%p12067_p6) }
 0x371   : > { %v8895_v19 = vadd.f32 %v12991_v17, %v8855_v16  ;;  %v9279_v16 = vld [vmem:[%s17067_s3 + $0x10] sm:$0xff] (!%p12067_p6)  ;;  %v14477_v17 = vmov (!%p12067_p6), 0.0|0.0   ;;  %v9280_v20 = vld [vmem:[%s17067_s3 + $0x18] sm:$0xff] (!%p12067_p6) }
 0x372   : > { %13236 = vmatprep.subr.bf16.mxu0 (!%p12067_p6), %v14477_v17 }
 0x373   : > { %13238 = vmatpush3.bf16.msra.mxu0 (!%p12067_p6), %v13237_v18 }
 0x374   : > { %13239 = vmatprep.subr.bf16.mxu0 (!%p12067_p6), %v14477_v17 }
 0x38b   : > { %v13011_v21 = vpop.f32.mrb[80].mxu0 }
 0x38c   : > { %v13012_v22 = vpop.f32.mrb[81].mxu0 }
 0x38d   : > { %v13013_v24 = vadd.f32 %v13012_v22, %v13011_v21  ;;  %v13014_v23 = vpop.f32.mrb[82].mxu0  ;;  %v13033_v25 = vpop.f32.mrb[80].mxu1  ;;  %v13240_v21 = vpack.c.bf16 (!%p12067_p6), %v9280_v20, %v9279_v16  ;;  %v9281_v22 = vld [vmem:[%s17067_s3 + $0x20] sm:$0xff] (!%p12067_p6) }
 0x38e   : > { %v13015_v26 = vpop.f32.mrb[83].mxu0  ;;  %v13034_v27 = vpop.f32.mrb[81].mxu1  ;;  %v9377_v23 = vld [vmem:[%s17069_s5 + $0x8] sm:$0xff] (!%p12067_p6) }
 0x38f   : > { %v8935_v28 = vadd.f32 %v13013_v24, %v8895_v19  ;;  %v13035_v29 = vadd.f32 %v13034_v27, %v13033_v25  ;;  %v13036_v30 = vpop.f32.mrb[82].mxu1  ;;  %v14478_v19 = vmov (!%p12067_p6), 0.0   ;;  %v9282_v24 = vld [vmem:[%s17067_s3 + $0x28] sm:$0xff] (!%p12067_p6)  ;;  %v9403_v25 = vld [vmem:[%s17069_s5 + $0xd8] sm:$0xff] (!%p12067_p6)  ;;  %v9376_v27 = vld [vmem:[%s17069_s5] sm:$0xff] (!%p12067_p6)  ;;  %13241 = vmatpush3.bf16.msra.mxu0 (!%p12067_p6), %v13240_v21 }
 0x390   : > { %v13037_v31 = vpop.f32.mrb[83].mxu1  ;;  %9997 = vmatprep.mubr.f32.mxu1 (!%p12067_p6), %v14478_v19  ;;  %13233 = vmatprep.mubr.msk.f32.mxu0 (!%p12067_p6), %vm14479_vm2, %v14478_v19  ;;  %v13254_v26 = vpack.c.bf16 (!%p12067_p6), %v9403_v25, %v9377_v23  ;;  %v9483_v23 = vld [vmem:[%s17069_s5 + $0x358] sm:$0xff] (!%p12067_p6)  ;;  %v9509_v25 = vld [vmem:[%s17069_s5 + $0x428] sm:$0xff] (!%p12067_p6) }
 0x391   : > { %v8975_v32 = vadd.f32 %v13035_v29, %v8935_v28  ;;  %v9402_v28 = vld [vmem:[%s17069_s5 + $0xd0] sm:$0xff] (!%p12067_p6)  ;;  %v13243_v29 = vpack.c.bf16 (!%p12067_p6), %v9282_v24, %v9281_v22  ;;  %v9429_v31 = vld [vmem:[%s17069_s5 + $0x1a8] sm:$0xff] (!%p12067_p6)  ;;  %13242 = vmatprep.subr.bf16.mxu0 (!%p12067_p6), %v14477_v17  ;;  %v9456_v24 = vld [vmem:[%s17069_s5 + $0x280] sm:$0xff] (!%p12067_p6) }
 0x392   : > { %v13256_v30 = vpack.c.bf16 (!%p12067_p6), %v9402_v28, %v9376_v27  ;;  %13255 = vmatprep.subr.bf16.mxu1 (!%p12067_p6), %v13254_v26  ;;  %v9430_v22 = vld [vmem:[%s17069_s5 + $0x1b0] sm:$0xff] (!%p12067_p6)  ;;  %v13286_v27 = vpack.c.bf16 (!%p12067_p6), %v9509_v25, %v9483_v23  ;;  %v9484_v23 = vld [vmem:[%s17069_s5 + $0x360] sm:$0xff] (!%p12067_p6) }
 0x393   : > { %13244 = vmatpush3.bf16.msra.mxu0 (!%p12067_p6), %v13243_v29  ;;  %v13284_v26 = vpack.c.bf16 (!%p12067_p6), %v9456_v24, %v9430_v22  ;;  %v9482_v28 = vld [vmem:[%s17069_s5 + $0x350] sm:$0xff] (!%p12067_p6)  ;;  %v9508_v29 = vld [vmem:[%s17069_s5 + $0x420] sm:$0xff] (!%p12067_p6) }
 0x394   : > { %13257 = vmatpush1.bf16.msra.mxu1 (!%p12067_p6), %v13256_v30  ;;  %13245 = vmatprep.subr.bf16.mxu0 (!%p12067_p6), %v14477_v17  ;;  %v9535_v30 = vld [vmem:[%s17069_s5 + $0x4f8] sm:$0xff] (!%p12067_p6)  ;;  %v9510_v25 = vld [vmem:[%s17069_s5 + $0x430] sm:$0xff] (!%p12067_p6) }
 0x3ab   : > { %v13055_v33 = vpop.f32.mrb[84].mxu0 }
 0x3ac   : > { %v13056_v35 = vpop.f32.mrb[85].mxu0 }
 0x3ad   : > { %v13057_v36 = vadd.f32 %v13056_v35, %v13055_v33  ;;  %v13058_v38 = vpop.f32.mrb[86].mxu0  ;;  %v13077_v39 = vpop.f32.mrb[84].mxu1  ;;  %v9284_v33 = vld [vmem:[%s17067_s3 + $0x38] sm:$0xff] (!%p12067_p6) }
 0x3ae   : > { %v13059_v40 = vpop.f32.mrb[87].mxu0  ;;  %v13078_v41 = vpop.f32.mrb[85].mxu1  ;;  %v9455_v35 = vld [vmem:[%s17069_s5 + $0x278] sm:$0xff] (!%p12067_p6)  ;;  %v9428_v38 = vld [vmem:[%s17069_s5 + $0x1a0] sm:$0xff] (!%p12067_p6) }
 0x3af   : > { %v9015_v43 = vadd.f32 %v13057_v36, %v8975_v32  ;;  %v13079_v44 = vadd.f32 %v13078_v41, %v13077_v39  ;;  %v13080_v37 = vpop.f32.mrb[86].mxu1  ;;  %v9283_v32 = vld [vmem:[%s17067_s3 + $0x30] sm:$0xff] (!%p12067_p6)  ;;  %v13258_v36 = vpack.c.bf16 (!%p12067_p6), %v9455_v35, %v9429_v31  ;;  %v9481_v41 = vld [vmem:[%s17069_s5 + $0x348] sm:$0xff] (!%p12067_p6) }
 0x3b0   : > { %v13081_v45 = vpop.f32.mrb[87].mxu1  ;;  %v9454_v39 = vld [vmem:[%s17069_s5 + $0x270] sm:$0xff] (!%p12067_p6)  ;;  %v9561_v31 = vld [vmem:[%s17069_s5 + $0x5c8] sm:$0xff] (!%p12067_p6) }
 0x3b1   : > { %v9055_v46 = vadd.f32 %v13079_v44, %v9015_v43  ;;  %v13260_v40 = vpack.c.bf16 (!%p12067_p6), %v9454_v39, %v9428_v38  ;;  %v9507_v43 = vld [vmem:[%s17069_s5 + $0x418] sm:$0xff] (!%p12067_p6)  ;;  %v13246_v44 = vpack.c.bf16 (!%p12067_p6), %v9284_v33, %v9283_v32  ;;  %13259 = vmatprep.subr.bf16.mxu1 (!%p12067_p6), %v13258_v36  ;;  %v9480_v45 = vld [vmem:[%s17069_s5 + $0x340] sm:$0xff] (!%p12067_p6)  ;;  %v13288_v32 = vpack.c.bf16 (!%p12067_p6), %v9508_v29, %v9482_v28  ;;  %v9534_v35 = vld [vmem:[%s17069_s5 + $0x4f0] sm:$0xff] (!%p12067_p6) }
 0x3b2   : > { %v13262_v37 = vpack.c.bf16 (!%p12067_p6), %v9507_v43, %v9481_v41  ;;  %v13290_v33 = vpack.c.bf16 (!%p12067_p6), %v9561_v31, %v9535_v30  ;;  %v9560_v36 = vld [vmem:[%s17069_s5 + $0x5c0] sm:$0xff] (!%p12067_p6)  ;;  %v9587_v38 = vld [vmem:[%s17069_s5 + $0x698] sm:$0xff] (!%p12067_p6)  ;;  %v9613_v39 = vld [vmem:[%s17069_s5 + $0x768] sm:$0xff] (!%p12067_p6) }
 0x3b3   : > { %13261 = vmatpush1.bf16.msra.mxu1 (!%p12067_p6), %v13260_v40  ;;  %13247 = vmatpush3.bf16.msra.mxu0 (!%p12067_p6), %v13246_v44  ;;  %v13292_v40 = vpack.c.bf16 (!%p12067_p6), %v9560_v36, %v9534_v35  ;;  %v13294_v41 = vpack.c.bf16 (!%p12067_p6), %v9613_v39, %v9587_v38  ;;  %v9586_v43 = vld [vmem:[%s17069_s5 + $0x690] sm:$0xff] (!%p12067_p6)  ;;  %v9612_v44 = vld [vmem:[%s17069_s5 + $0x760] sm:$0xff] (!%p12067_p6)  ;;  %v9537_v30 = vld [vmem:[%s17069_s5 + $0x508] sm:$0xff] (!%p12067_p6)  ;;  %v13312_v35 = vpack.c.bf16 (!%p12067_p6), %v9510_v25, %v9484_v23 }
 0x3b4   : > { %13263 = vmatprep.subr.bf16.mxu1 (!%p12067_p6), %v13262_v37  ;;  %13248 = vmatprep.subr.bf16.mxu0 (!%p12067_p6), %v14477_v17  ;;  %v9639_v37 = vld [vmem:[%s17069_s5 + $0x838] sm:$0xff] (!%p12067_p6)  ;;  %v9486_v28 = vld [vmem:[%s17069_s5 + $0x370] sm:$0xff] (!%p12067_p6)  ;;  %v9512_v29 = vld [vmem:[%s17069_s5 + $0x440] sm:$0xff] (!%p12067_p6) }
 0x3b5   : > { %v9563_v31 = vld [vmem:[%s17069_s5 + $0x5d8] sm:$0xff] (!%p12067_p6)  ;;  %v13336_v36 = vpack.c.bf16 (!%p12067_p6), %v9512_v29, %v9486_v28  ;;  %v9536_v38 = vld [vmem:[%s17069_s5 + $0x500] sm:$0xff] (!%p12067_p6)  ;;  %v9562_v39 = vld [vmem:[%s17069_s5 + $0x5d0] sm:$0xff] (!%p12067_p6) }
 0x3b6   : > { %v9462_v28 = vld [vmem:[%s17069_s5 + $0x2b0] sm:$0xff] (!%p12067_p6) }
 0x3cb   : > { %v13099_v47 = vpop.f32.mrb[88].mxu0 }
 0x3cc   : > { %v13100_v48 = vpop.f32.mrb[89].mxu0 }
 0x3cd   : > { %v13101_v49 = vadd.f32 %v13100_v48, %v13099_v47  ;;  %v13102_v50 = vpop.f32.mrb[90].mxu0  ;;  %v13121_v51 = vpop.f32.mrb[88].mxu1  ;;  %v9286_v47 = vld [vmem:[%s17067_s3 + $0x48] sm:$0xff] (!%p12067_p6)  ;;  %v9506_v48 = vld [vmem:[%s17069_s5 + $0x410] sm:$0xff] (!%p12067_p6) }
 0x3ce   : > { %v13103_v52 = vpop.f32.mrb[91].mxu0  ;;  %v13122_v53 = vpop.f32.mrb[89].mxu1  ;;  %v9533_v50 = vld [vmem:[%s17069_s5 + $0x4e8] sm:$0xff] (!%p12067_p6) }
 0x3cf   : > { %v9095_v54 = vadd.f32 %v13101_v49, %v9055_v46  ;;  %v13123_v55 = vadd.f32 %v13122_v53, %v13121_v51  ;;  %v13124_v57 = vpop.f32.mrb[90].mxu1  ;;  %v9285_v46 = vld [vmem:[%s17067_s3 + $0x40] sm:$0xff] (!%p12067_p6)  ;;  %v13264_v49 = vpack.c.bf16 (!%p12067_p6), %v9506_v48, %v9480_v45  ;;  %v9559_v51 = vld [vmem:[%s17069_s5 + $0x5b8] sm:$0xff] (!%p12067_p6)  ;;  %v9665_v45 = vld [vmem:[%s17069_s5 + $0x908] sm:$0xff] (!%p12067_p6) }
 0x3d0   : > { %v13125_v58 = vpop.f32.mrb[91].mxu1  ;;  %v13266_v52 = vpack.c.bf16 (!%p12067_p6), %v9559_v51, %v9533_v50  ;;  %v9532_v53 = vld [vmem:[%s17069_s5 + $0x4e0] sm:$0xff] (!%p12067_p6)  ;;  %v9585_v57 = vld [vmem:[%s17069_s5 + $0x688] sm:$0xff] (!%p12067_p6)  ;;  %v9638_v48 = vld [vmem:[%s17069_s5 + $0x830] sm:$0xff] (!%p12067_p6) }
 0x3d1   : > { %v9135_v59 = vadd.f32 %v13123_v55, %v9095_v54  ;;  %v9558_v54 = vld [vmem:[%s17069_s5 + $0x5b0] sm:$0xff] (!%p12067_p6)  ;;  %v13249_v55 = vpack.c.bf16 (!%p12067_p6), %v9286_v47, %v9285_v46  ;;  %13265 = vmatpush1.bf16.msra.mxu1 (!%p12067_p6), %v13264_v49  ;;  %v13296_v46 = vpack.c.bf16 (!%p12067_p6), %v9612_v44, %v9586_v43  ;;  %v13298_v47 = vpack.c.bf16 (!%p12067_p6), %v9665_v45, %v9639_v37  ;;  %v9664_v49 = vld [vmem:[%s17069_s5 + $0x900] sm:$0xff] (!%p12067_p6)  ;;  %v9689_v51 = vld [vmem:[%s17069_s5 + $0x9c8] sm:$0xf] (!%p12067_p6) }
 0x3d2   : > { %v9287_v58 = vld [vmem:[%s17067_s3 + $0x50] sm:$0xff] (!%p12067_p6)  ;;  %13267 = vmatprep.subr.bf16.mxu1 (!%p12067_p6), %v13266_v52  ;;  %v13300_v50 = vpack.c.bf16 (!%p12067_p6), %v9664_v49, %v9638_v48  ;;  %v9691_v52 = vld [vmem:[%s17069_s5 + $0x9d8] sm:$0xf] (!%p12067_p6)  ;;  %v9564_v44 = vld [vmem:[%s17069_s5 + $0x5e0] sm:$0xff] (!%p12067_p6)  ;;  %v13316_v48 = vpack.c.bf16 (!%p12067_p6), %v9562_v39, %v9536_v38 }
 0x3d3   : > { %13250 = vmatpush3.bf16.msra.mxu0 (!%p12067_p6), %v13249_v55  ;;  %v9690_v55 = vld [vmem:[%s17069_s5 + $0x9d0] sm:$0xf] (!%p12067_p6)  ;;  %v9589_v37 = vld [vmem:[%s17069_s5 + $0x6a8] sm:$0xff] (!%p12067_p6)  ;;  %v9615_v45 = vld [vmem:[%s17069_s5 + $0x778] sm:$0xff] (!%p12067_p6) }
 0x3d4   : > { %13251 = vmatprep.subr.bf16.mxu0 (!%p12067_p6), %v14477_v17  ;;  %v9538_v43 = vld [vmem:[%s17069_s5 + $0x510] sm:$0xff] (!%p12067_p6)  ;;  %v9517_v38 = vld [vmem:[%s17069_s5 + $0x468] sm:$0xff] (!%p12067_p6) }
 0x3d5   : > { %v13340_v49 = vpack.c.bf16 (!%p12067_p6), %v9564_v44, %v9538_v43  ;;  %v9514_v43 = vld [vmem:[%s17069_s5 + $0x450] sm:$0xff] (!%p12067_p6) }
 0x3eb   : > { %v13143_v60 = vpop.f32.mrb[92].mxu0 }
 0x3ec   : > { %v13144_v61 = vpop.f32.mrb[93].mxu0 }
 0x3ed   : > { %v13145_v62 = vadd.f32 %v13144_v61, %v13143_v60  ;;  %v13146_v63 = vpop.f32.mrb[94].mxu0  ;;  %v13165_v0 = vpop.f32.mrb[92].mxu1  ;;  %v9611_v60 = vld [vmem:[%s17069_s5 + $0x758] sm:$0xff] (!%p12067_p6) }
 0x3ee   : > { %v13147_v1 = vpop.f32.mrb[95].mxu0  ;;  %v13166_v2 = vpop.f32.mrb[93].mxu1  ;;  %v13268_v63 = vpack.c.bf16 (!%p12067_p6), %v9558_v54, %v9532_v53  ;;  %v9381_v53 = vld [vmem:[%s17069_s5 + $0x28] sm:$0xff] (!%p12067_p6)  ;;  %v9688_v54 = vld [vmem:[%s17069_s5 + $0x9c0] sm:$0xf] (!%p12067_p6) }
 0x3ef   : > { %v9175_v56 = vadd.f32 %v13145_v62, %v9135_v59  ;;  %v13167_v3 = vadd.f32 %v13166_v2, %v13165_v0  ;;  %v13168_v4 = vpop.f32.mrb[94].mxu1  ;;  %v9288_v59 = vld [vmem:[%s17067_s3 + $0x58] sm:$0xff] (!%p12067_p6)  ;;  %v12068_v62 = vld [vmem:[%s17066_s2] ss:$0 sm:$0xff] (!%p12067_p6)  ;;  %v13270_v0 = vpack.c.bf16 (!%p12067_p6), %v9611_v60, %v9585_v57  ;;  %v9610_v2 = vld [vmem:[%s17069_s5 + $0x750] sm:$0xff] (!%p12067_p6) }
 0x3f0   : > { %v13169_v5 = vpop.f32.mrb[95].mxu1  ;;  %v9584_v1 = vld [vmem:[%s17069_s5 + $0x680] sm:$0xff] (!%p12067_p6)  ;;  %v9663_v4 = vld [vmem:[%s17069_s5 + $0x8f8] sm:$0xff] (!%p12067_p6)  ;;  %13269 = vmatpush1.bf16.msra.mxu1 (!%p12067_p6), %v13268_v63  ;;  %v9409_v60 = vld [vmem:[%s17069_s5 + $0x108] sm:$0xff] (!%p12067_p6) }
 0x3f1   : > { %v9215_v6 = vadd.f32 %v13167_v3, %v9175_v56  ;;  %v13252_v56 = vpack.c.bf16 (!%p12067_p6), %v9288_v59, %v9287_v58  ;;  %v9637_v3 = vld [vmem:[%s17069_s5 + $0x828] sm:$0xff] (!%p12067_p6)  ;;  %13271 = vmatprep.subr.bf16.mxu1 (!%p12067_p6), %v13270_v0  ;;  %v9407_v57 = vld [vmem:[%s17069_s5 + $0xf8] sm:$0xff] (!%p12067_p6)  ;;  %v9380_v63 = vld [vmem:[%s17069_s5 + $0x20] sm:$0xff] (!%p12067_p6) }
 0x3f2   : > { %v13302_v58 = vpack.c.bf16 (!%p12067_p6), %v9407_v57, %v9381_v53  ;;  %v9383_v59 = vld [vmem:[%s17069_s5 + $0x38] sm:$0xff] (!%p12067_p6)  ;;  %v9406_v0 = vld [vmem:[%s17069_s5 + $0xf0] sm:$0xff] (!%p12067_p6)  ;;  %v9641_v57 = vld [vmem:[%s17069_s5 + $0x848] sm:$0xff] (!%p12067_p6) }
 0x3f3   : > { %13253 = vmatpush3.bf16.msra.mxu0 (!%p12067_p6), %v13252_v56  ;;  %v9433_v56 = vld [vmem:[%s17069_s5 + $0x1c8] sm:$0xff] (!%p12067_p6) }
 0x3f4   : > { %13231 = vmatprep.subr.mxu0 (!%p12067_p6), %v14478_v19 }
 0x3f7   : > { %13232 = vmatpush3.msk.msra.mxu0 (!%p12067_p6), %vm9301_vm3, %v9289_v15  ;;  %v9434_v15 = vld [vmem:[%s17069_s5 + $0x1d0] sm:$0xff] (!%p12067_p6) }
 0x40b   : > { %v13187_v7 = vpop.f32.mrb[96].mxu0 }
 0x40c   : > { %v13188_v8 = vpop.f32.mrb[97].mxu0 }
 0x40d   : > { %v13189_v9 = vadd.f32 %v13188_v8, %v13187_v7  ;;  %v13190_v10 = vpop.f32.mrb[98].mxu0  ;;  %9266 = sbr.rel (%p12067_p6) target bundleno = 2035 (0x7f3), region = 56  ;;  %v9405_v7 = vld [vmem:[%s17069_s5 + $0xe8] sm:$0xff] (!%p12067_p6)  ;;  %v9378_v8 = vld [vmem:[%s17069_s5 + $0x10] sm:$0xff] (!%p12067_p6) }
 0x40e   : > { %v13191_v12 = vpop.f32.mrb[99].mxu0  ;;  %v9404_v10 = vld [vmem:[%s17069_s5 + $0xe0] sm:$0xff] (!%p12067_p6) }
 0x40f   : > { %v9255_v13 = vadd.f32 %v13189_v9, %v9215_v6  ;;  %v9379_v6 = vld [vmem:[%s17069_s5 + $0x18] sm:$0xff] (!%p12067_p6)  ;;  %v13272_v9 = vpack.c.bf16 (!%p12067_p6), %v9610_v2, %v9584_v1  ;;  %v9636_v12 = vld [vmem:[%s17069_s5 + $0x820] sm:$0xff] (!%p12067_p6)  ;;  %v13280_v18 = vpack.c.bf16 (!%p12067_p6), %v9404_v10, %v9378_v8  ;;  %v9382_v1 = vld [vmem:[%s17069_s5 + $0x30] sm:$0xff] (!%p12067_p6) }
 0x410   : > { %v13278_v17 = vpack.c.bf16 (!%p12067_p6), %v9405_v7, %v9379_v6  ;;  %v9408_v2 = vld [vmem:[%s17069_s5 + $0x100] sm:$0xff] (!%p12067_p6)  ;;  %v9461_v6 = vld [vmem:[%s17069_s5 + $0x2a8] sm:$0xff] (!%p12067_p6) }
 0x411   : > { %v9260_v14 = vadd.f32 %v9255_v13, %v293_v11  ;;  %v13274_v11 = vpack.c.bf16 (!%p12067_p6), %v9663_v4, %v9637_v3  ;;  %v9662_v13 = vld [vmem:[%s17069_s5 + $0x8f0] sm:$0xff] (!%p12067_p6)  ;;  %13273 = vmatpush1.bf16.msra.mxu1 (!%p12067_p6), %v13272_v9  ;;  %v9459_v4 = vld [vmem:[%s17069_s5 + $0x298] sm:$0xff] (!%p12067_p6)  ;;  %v13304_v9 = vpack.c.bf16 (!%p12067_p6), %v9406_v0, %v9380_v63  ;;  %v13328_v10 = vpack.c.bf16 (!%p12067_p6), %v9408_v2, %v9382_v1  ;;  %v9640_v63 = vld [vmem:[%s17069_s5 + $0x840] sm:$0xff] (!%p12067_p6) }
 0x412   : > { %v13276_v20 = vpack.c.bf16 (!%p12067_p6), %v9662_v13, %v9636_v12  ;;  %13279 = vmatprep.subr.bf16.mxu0 (!%p12067_p6), %v13278_v17  ;;  %v9458_v12 = vld [vmem:[%s17069_s5 + $0x290] sm:$0xff] (!%p12067_p6)  ;;  %v9485_v17 = vld [vmem:[%s17069_s5 + $0x368] sm:$0xff] (!%p12067_p6) }
 0x413   : > { %9262 = vst.msk [vmem:[#allocation2] sm:$0x3] %vm9261_vm1, %v9260_v14  ;;  %v9431_v14 = vld [vmem:[%s17069_s5 + $0x1b8] sm:$0xff] (!%p12067_p6)  ;;  %13275 = vmatprep.subr.bf16.mxu1 (!%p12067_p6), %v13274_v11  ;;  %v9432_v11 = vld [vmem:[%s17069_s5 + $0x1c0] sm:$0xff] (!%p12067_p6)  ;;  %v9666_v2 = vld [vmem:[%s17069_s5 + $0x910] sm:$0xff] (!%p12067_p6) }
 0x414   : > { %v13282_v21 = vpack.c.bf16 %v9457_v42, %v9431_v14  ;;  %v13306_v14 = vpack.c.bf16 %v9459_v4, %v9433_v56  ;;  %v13308_v22 = vpack.c.bf16 %v9458_v12, %v9432_v11  ;;  %v9642_v56 = vld [vmem:[%s17069_s5 + $0x850] sm:$0xff]  ;;  %v13324_v4 = vpack.c.bf16 %v9666_v2, %v9640_v63  ;;  %v9692_v11 = vld [vmem:[%s17069_s5 + $0x9e0] sm:$0xf]  ;;  %v9621_v63 = vld [vmem:[%s17069_s5 + $0x7a8] sm:$0xff] }
 0x415   : > { %13277 = vmatpush1.bf16.msra.mxu1 %v13276_v20  ;;  %v9487_v20 = vld [vmem:[%s17069_s5 + $0x378] sm:$0xff]  ;;  %v9694_v12 = vld [vmem:[%s17069_s5 + $0x9f0] sm:$0xf]  ;;  %v9592_v2 = vld [vmem:[%s17069_s5 + $0x6c0] sm:$0xff] }
 0x416   : > { %12072 = vmatprep.subr.msk.mxu1 %vm9301_vm3, %v9689_v51  ;;  %v9614_v51 = vld [vmem:[%s17069_s5 + $0x770] sm:$0xff] }
 0x419   : > { %12073 = vmatpush1.msk.msra.mxu1 %vm9301_vm3, %v9688_v54  ;;  %v9590_v54 = vld [vmem:[%s17069_s5 + $0x6b0] sm:$0xff] }
 0x41a   : > { %v9267_v61 = vld [vmem:[#allocation2] sm:$0x3]  ;;  %13303 = vmatprep.subr.bf16.mxu1 %v13302_v58  ;;  %v9667_v58 = vld [vmem:[%s17069_s5 + $0x918] sm:$0xff] }
 0x41b   : > { %v9275_v5 = vadd.f32 %v12068_v62, %v9267_v61  ;;  %v13326_v61 = vpack.c.bf16 %v9409_v60, %v9383_v59  ;;  %v12069_v62 = vld [vmem:[%s17068_s4] ss:$0 sm:$0xff]  ;;  %v9643_v59 = vld [vmem:[%s17069_s5 + $0x858] sm:$0xff]  ;;  %v9669_v60 = vld [vmem:[%s17069_s5 + $0x928] sm:$0xff]  ;;  %v13322_v0 = vpack.c.bf16 %v9667_v58, %v9641_v57 }
 0x41c   : > { %v13346_v1 = vpack.c.bf16 %v9669_v60, %v9643_v59  ;;  %v9542_v58 = vld [vmem:[%s17069_s5 + $0x530] sm:$0xff]  ;;  %v9568_v59 = vld [vmem:[%s17069_s5 + $0x600] sm:$0xff]  ;;  %v9593_v60 = vld [vmem:[%s17069_s5 + $0x6c8] sm:$0xff] }
 0x41d   : > { %v9276_v16 = vmax.f32 %v9275_v5, 0.0  ;;  %v9435_v5 = vld [vmem:[%s17069_s5 + $0x1d8] sm:$0xff] }
 0x41e   : > { %v13330_v42 = vpack.c.bf16 %v9461_v6, %v9435_v5  ;;  %v9693_v6 = vld [vmem:[%s17069_s5 + $0x9e8] sm:$0xf] }
 0x41f   : > { %13234 = vmatmul.mubr.msk.f32.vlgmr.msra.gmra.mrb[0].mxu0 %vm9297_vm4, %v9276_v16  ;;  %v9460_v16 = vld [vmem:[%s17069_s5 + $0x2a0] sm:$0xff] }
 0x420   : > { %13281 = vmatpush1.bf16.msra.mxu0 %v13280_v18  ;;  %10068 = vmatprep.mubr.f32.mxu0 %v14478_v19  ;;  %v9511_v18 = vld [vmem:[%s17069_s5 + $0x438] sm:$0xff]  ;;  %v13332_v24 = vpack.c.bf16 %v9460_v16, %v9434_v15  ;;  %v9410_v15 = vld [vmem:[%s17069_s5 + $0x110] sm:$0xff] }
 0x421   : > { %13283 = vmatprep.subr.bf16.mxu0 %v13282_v21  ;;  %v9513_v21 = vld [vmem:[%s17069_s5 + $0x448] sm:$0xff]  ;;  %v9386_v16 = vld [vmem:[%s17069_s5 + $0x50] sm:$0xff] }
 0x424   : > { %13285 = vmatpush1.bf16.msra.mxu0 %v13284_v26  ;;  %v13310_v26 = vpack.c.bf16 %v9511_v18, %v9485_v17  ;;  %v9412_v17 = vld [vmem:[%s17069_s5 + $0x120] sm:$0xff]  ;;  %v9437_v18 = vld [vmem:[%s17069_s5 + $0x1e8] sm:$0xff] }
 0x425   : > { %13287 = vmatprep.subr.bf16.mxu0 %v13286_v27  ;;  %v13334_v27 = vpack.c.bf16 %v9513_v21, %v9487_v20  ;;  %v9463_v20 = vld [vmem:[%s17069_s5 + $0x2b8] sm:$0xff] }
 0x426   : > { %v9439_v21 = vld [vmem:[%s17069_s5 + $0x1f8] sm:$0xff]  ;;  %v13354_v29 = vpack.c.bf16 %v9463_v20, %v9437_v18  ;;  %v9672_v18 = vld [vmem:[%s17069_s5 + $0x940] sm:$0xff] }
 0x428   : > { %13289 = vmatpush1.bf16.msra.mxu0 %v13288_v32  ;;  %v9539_v32 = vld [vmem:[%s17069_s5 + $0x518] sm:$0xff] }
 0x429   : > { %13291 = vmatprep.subr.bf16.mxu0 %v13290_v33  ;;  %v9565_v33 = vld [vmem:[%s17069_s5 + $0x5e8] sm:$0xff] }
 0x42c   : > { %13293 = vmatpush1.bf16.msra.mxu0 %v13292_v40  ;;  %v13314_v40 = vpack.c.bf16 %v9563_v31, %v9537_v30  ;;  %v9438_v31 = vld [vmem:[%s17069_s5 + $0x1f0] sm:$0xff] }
 0x42d   : > { %13295 = vmatprep.subr.bf16.mxu0 %v13294_v41  ;;  %v13338_v41 = vpack.c.bf16 %v9565_v33, %v9539_v32  ;;  %v9464_v32 = vld [vmem:[%s17069_s5 + $0x2c0] sm:$0xff]  ;;  %v9489_v33 = vld [vmem:[%s17069_s5 + $0x388] sm:$0xff] }
 0x430   : > { %13297 = vmatpush1.bf16.msra.mxu0 %v13296_v46  ;;  %v9591_v46 = vld [vmem:[%s17069_s5 + $0x6b8] sm:$0xff] }
 0x431   : > { %13299 = vmatprep.subr.bf16.mxu0 %v13298_v47  ;;  %v9617_v47 = vld [vmem:[%s17069_s5 + $0x788] sm:$0xff] }
 0x432   : > { %v13342_v53 = vpack.c.bf16 %v9617_v47, %v9591_v46  ;;  %v9516_v46 = vld [vmem:[%s17069_s5 + $0x460] sm:$0xff]  ;;  %v9541_v47 = vld [vmem:[%s17069_s5 + $0x528] sm:$0xff] }
 0x434   : > { %13301 = vmatpush1.bf16.msra.mxu0 %v13300_v50  ;;  %v9588_v50 = vld [vmem:[%s17069_s5 + $0x6a0] sm:$0xff] }
 0x435   : > { %12075 = vmatprep.subr.msk.mxu0 %vm9301_vm3, %v9691_v52  ;;  %v13318_v52 = vpack.c.bf16 %v9615_v45, %v9589_v37  ;;  %v9490_v45 = vld [vmem:[%s17069_s5 + $0x390] sm:$0xff] }
 0x438   : > { %12076 = vmatpush1.msk.msra.mxu0 %vm9301_vm3, %v9690_v55  ;;  %v9616_v55 = vld [vmem:[%s17069_s5 + $0x780] sm:$0xff] }
 0x439   : > { %13327 = vmatprep.subr.bf16.mxu0 %v13326_v61  ;;  %v13320_v61 = vpack.c.bf16 %v9614_v51, %v9588_v50  ;;  %v9569_v50 = vld [vmem:[%s17069_s5 + $0x608] sm:$0xff] }
 0x4f2   : > { %v9371_v3 = vpop.f32.mrb[0].mxu0 }
 0x4f3   : > { %v9372_v7 = vadd.f32 %v12069_v62, %v9371_v3  ;;  %v13235_v8 = vpop.f32.mrb[1].mxu0  ;;  %v13344_v62 = vpack.c.bf16 %v9616_v55, %v9590_v54  ;;  %v9668_v3 = vld [vmem:[%s17069_s5 + $0x920] sm:$0xff]  ;;  %v9566_v54 = vld [vmem:[%s17069_s5 + $0x5f0] sm:$0xff] }
 0x4f4   : > { %v13348_v5 = vpack.c.bf16 %v9668_v3, %v9642_v56  ;;  %v9385_v8 = vld [vmem:[%s17069_s5 + $0x48] sm:$0xff]  ;;  %v9618_v56 = vld [vmem:[%s17069_s5 + $0x790] sm:$0xff] }
 0x4f5   : > { %v15789_v13 = vmax.f32 %v9372_v7, 0.0  ;;  %v9695_v7 = vld [vmem:[%s17069_s5 + $0x9f8] sm:$0xf] }
 0x4f7   : > { %12074 = vmatmul.mubr.msk.f32.vlgmr.msra.gmra.mrb[0].mxu1 %vm9297_vm4, %v15789_v13  ;;  %12077 = vmatmul.mubr.msk.f32.vlgmr.msra.gmra.mrb[2].mxu0 %vm9297_vm4, %v15789_v13 }
 0x4f8   : > { %13305 = vmatpush1.bf16.msra.mxu1 %v13304_v9  ;;  %13329 = vmatpush1.bf16.msra.mxu0 %v13328_v10  ;;  %v9411_v9 = vld [vmem:[%s17069_s5 + $0x118] sm:$0xff] }
 0x4f9   : > { %13307 = vmatprep.subr.bf16.mxu1 %v13306_v14  ;;  %13331 = vmatprep.subr.bf16.mxu0 %v13330_v42  ;;  %v9387_v10 = vld [vmem:[%s17069_s5 + $0x58] sm:$0xff]  ;;  %v9413_v14 = vld [vmem:[%s17069_s5 + $0x128] sm:$0xff]  ;;  %v9384_v42 = vld [vmem:[%s17069_s5 + $0x40] sm:$0xff] }
 0x4fa   : > { %10139 = vmatprep.mubr.f32.mxu1 %v14478_v19  ;;  %10210 = vmatprep.mubr.f32.mxu0 %v14478_v19  ;;  %v13374_v23 = vpack.c.bf16 %v9413_v14, %v9387_v10  ;;  %v13352_v25 = vpack.c.bf16 %v9410_v15, %v9384_v42  ;;  %v9673_v10 = vld [vmem:[%s17069_s5 + $0x948] sm:$0xff]  ;;  %v9644_v14 = vld [vmem:[%s17069_s5 + $0x860] sm:$0xff] }
 0x4fc   : > { %13309 = vmatpush1.bf16.msra.mxu1 %v13308_v22  ;;  %13333 = vmatpush1.bf16.msra.mxu0 %v13332_v24  ;;  %v9465_v22 = vld [vmem:[%s17069_s5 + $0x2c8] sm:$0xff]  ;;  %v13350_v24 = vpack.c.bf16 %v9411_v9, %v9385_v8  ;;  %v9671_v8 = vld [vmem:[%s17069_s5 + $0x938] sm:$0xff] }
 0x4fd   : > { %13311 = vmatprep.subr.bf16.mxu1 %v13310_v26  ;;  %13335 = vmatprep.subr.bf16.mxu0 %v13334_v27  ;;  %v13376_v26 = vpack.c.bf16 %v9412_v17, %v9386_v16  ;;  %v9436_v27 = vld [vmem:[%s17069_s5 + $0x1e0] sm:$0xff]  ;;  %v13378_v30 = vpack.c.bf16 %v9465_v22, %v9439_v21  ;;  %v9647_v9 = vld [vmem:[%s17069_s5 + $0x878] sm:$0xff]  ;;  %v9670_v16 = vld [vmem:[%s17069_s5 + $0x930] sm:$0xff] }
 0x4fe   : > { %v13356_v39 = vpack.c.bf16 %v9462_v28, %v9436_v27  ;;  %v13394_v15 = vpack.c.bf16 %v9673_v10, %v9647_v9  ;;  %v9646_v17 = vld [vmem:[%s17069_s5 + $0x870] sm:$0xff]  ;;  %v13372_v20 = vpack.c.bf16 %v9670_v16, %v9644_v14  ;;  %v9697_v22 = vld [vmem:[%s17069_s5 + $0xa08] sm:$0xf]  ;;  %v9696_v27 = vld [vmem:[%s17069_s5 + $0xa00] sm:$0xf] }
 0x4ff   : > { %v13396_v21 = vpack.c.bf16 %v9672_v18, %v9646_v17  ;;  %v9698_v28 = vld [vmem:[%s17069_s5 + $0xa10] sm:$0xf]  ;;  %v9572_v9 = vld [vmem:[%s17069_s5 + $0x620] sm:$0xff]  ;;  %v9597_v10 = vld [vmem:[%s17069_s5 + $0x6e8] sm:$0xff] }
 0x500   : > { %13313 = vmatpush1.bf16.msra.mxu1 %v13312_v35  ;;  %13337 = vmatpush1.bf16.msra.mxu0 %v13336_v36  ;;  %v9515_v35 = vld [vmem:[%s17069_s5 + $0x458] sm:$0xff]  ;;  %v9625_v14 = vld [vmem:[%s17069_s5 + $0x7c8] sm:$0xff]  ;;  %v9596_v16 = vld [vmem:[%s17069_s5 + $0x6e0] sm:$0xff] }
 0x501   : > { %13315 = vmatprep.subr.bf16.mxu1 %v13314_v40  ;;  %13339 = vmatprep.subr.bf16.mxu0 %v13338_v41  ;;  %v9491_v36 = vld [vmem:[%s17069_s5 + $0x398] sm:$0xff]  ;;  %v13380_v40 = vpack.c.bf16 %v9464_v32, %v9438_v31  ;;  %v9488_v41 = vld [vmem:[%s17069_s5 + $0x380] sm:$0xff]  ;;  %v13358_v44 = vpack.c.bf16 %v9515_v35, %v9489_v33  ;;  %v9414_v31 = vld [vmem:[%s17069_s5 + $0x130] sm:$0xff] }
 0x502   : > { %v13382_v37 = vpack.c.bf16 %v9517_v38, %v9491_v36  ;;  %v13360_v51 = vpack.c.bf16 %v9514_v43, %v9488_v41  ;;  %v9390_v32 = vld [vmem:[%s17069_s5 + $0x70] sm:$0xff]  ;;  %v9416_v33 = vld [vmem:[%s17069_s5 + $0x140] sm:$0xff]  ;;  %v9441_v35 = vld [vmem:[%s17069_s5 + $0x208] sm:$0xff] }
 0x503   : > { %v9467_v36 = vld [vmem:[%s17069_s5 + $0x2d8] sm:$0xff]  ;;  %v9622_v17 = vld [vmem:[%s17069_s5 + $0x7b0] sm:$0xff] }
 0x504   : > { %13317 = vmatpush1.bf16.msra.mxu1 %v13316_v48  ;;  %13341 = vmatpush1.bf16.msra.mxu0 %v13340_v49  ;;  %v9567_v48 = vld [vmem:[%s17069_s5 + $0x5f8] sm:$0xff] }
 0x505   : > { %13319 = vmatprep.subr.bf16.mxu1 %v13318_v52  ;;  %13343 = vmatprep.subr.bf16.mxu0 %v13342_v53  ;;  %v9543_v49 = vld [vmem:[%s17069_s5 + $0x538] sm:$0xff]  ;;  %v13384_v52 = vpack.c.bf16 %v9516_v46, %v9490_v45  ;;  %v9540_v53 = vld [vmem:[%s17069_s5 + $0x520] sm:$0xff]  ;;  %v13362_v55 = vpack.c.bf16 %v9567_v48, %v9541_v47  ;;  %v9466_v45 = vld [vmem:[%s17069_s5 + $0x2d0] sm:$0xff]  ;;  %v13402_v46 = vpack.c.bf16 %v9467_v36, %v9441_v35 }
 0x506   : > { %v13386_v57 = vpack.c.bf16 %v9569_v50, %v9543_v49  ;;  %v9443_v38 = vld [vmem:[%s17069_s5 + $0x218] sm:$0xff]  ;;  %v9442_v48 = vld [vmem:[%s17069_s5 + $0x210] sm:$0xff]  ;;  %v9468_v49 = vld [vmem:[%s17069_s5 + $0x2e0] sm:$0xff] }
 0x507   : > { %v9493_v50 = vld [vmem:[%s17069_s5 + $0x3a8] sm:$0xff]  ;;  %v9676_v35 = vld [vmem:[%s17069_s5 + $0x960] sm:$0xff] }
 0x508   : > { %13321 = vmatpush1.bf16.msra.mxu1 %v13320_v61  ;;  %13345 = vmatpush1.bf16.msra.mxu0 %v13344_v62  ;;  %v9619_v61 = vld [vmem:[%s17069_s5 + $0x798] sm:$0xff] }
 0x509   : > { %13323 = vmatprep.subr.bf16.mxu1 %v13322_v0  ;;  %13347 = vmatprep.subr.bf16.mxu0 %v13346_v1  ;;  %v9595_v62 = vld [vmem:[%s17069_s5 + $0x6d8] sm:$0xff]  ;;  %v13364_v0 = vpack.c.bf16 %v9566_v54, %v9540_v53  ;;  %v13388_v1 = vpack.c.bf16 %v9568_v59, %v9542_v58  ;;  %v13366_v3 = vpack.c.bf16 %v9619_v61, %v9593_v60  ;;  %v9521_v53 = vld [vmem:[%s17069_s5 + $0x488] sm:$0xff]  ;;  %v9518_v58 = vld [vmem:[%s17069_s5 + $0x470] sm:$0xff] }
 0x50a   : > { %v9494_v61 = vld [vmem:[%s17069_s5 + $0x3b0] sm:$0xff] }
 0x50c   : > { %13325 = vmatpush1.bf16.msra.mxu1 %v13324_v4  ;;  %13349 = vmatpush1.bf16.msra.mxu0 %v13348_v5  ;;  %v13390_v4 = vpack.c.bf16 %v9621_v63, %v9595_v62  ;;  %v9594_v5 = vld [vmem:[%s17069_s5 + $0x6d0] sm:$0xff]  ;;  %v9520_v62 = vld [vmem:[%s17069_s5 + $0x480] sm:$0xff]  ;;  %v9545_v63 = vld [vmem:[%s17069_s5 + $0x548] sm:$0xff] }
 0x50d   : > { %12078 = vmatprep.subr.msk.mxu1 %vm9301_vm3, %v9693_v6  ;;  %12081 = vmatprep.subr.msk.mxu0 %vm9301_vm3, %v9695_v7  ;;  %v9620_v6 = vld [vmem:[%s17069_s5 + $0x7a0] sm:$0xff]  ;;  %v9645_v7 = vld [vmem:[%s17069_s5 + $0x868] sm:$0xff] }
 0x50e   : > { %v13370_v42 = vpack.c.bf16 %v9671_v8, %v9645_v7  ;;  %v9546_v8 = vld [vmem:[%s17069_s5 + $0x550] sm:$0xff] }
 0x510   : > { %12079 = vmatpush1.msk.msra.mxu1 %vm9301_vm3, %v9692_v11  ;;  %12082 = vmatpush1.msk.msra.mxu0 %vm9301_vm3, %v9694_v12  ;;  %v13368_v11 = vpack.c.bf16 %v9618_v56, %v9592_v2  ;;  %v13392_v12 = vpack.c.bf16 %v9620_v6, %v9594_v5  ;;  %v9573_v2 = vld [vmem:[%s17069_s5 + $0x628] sm:$0xff]  ;;  %v9570_v5 = vld [vmem:[%s17069_s5 + $0x610] sm:$0xff] }
 0x511   : > { %12080 = vmatmul.mubr.msk.f32.vlgmr.msra.gmra.mrb[2].mxu1 %vm9297_vm4, %v15789_v13  ;;  %12083 = vmatmul.mubr.msk.f32.vlgmr.msra.gmra.mrb[4].mxu0 %vm9297_vm4, %v15789_v13 }
 0x512   : > { %13351 = vmatprep.subr.bf16.mxu1 %v13350_v24  ;;  %13375 = vmatprep.subr.bf16.mxu0 %v13374_v23  ;;  %v9699_v24 = vld [vmem:[%s17069_s5 + $0xa18] sm:$0xf]  ;;  %v9389_v23 = vld [vmem:[%s17069_s5 + $0x68] sm:$0xff] }
 0x513   : > { %13353 = vmatpush1.bf16.msra.mxu1 %v13352_v25  ;;  %13377 = vmatpush1.bf16.msra.mxu0 %v13376_v26  ;;  %v9415_v25 = vld [vmem:[%s17069_s5 + $0x138] sm:$0xff] }
 0x514   : > { %13355 = vmatprep.subr.bf16.mxu1 %v13354_v29  ;;  %13379 = vmatprep.subr.bf16.mxu0 %v13378_v30  ;;  %v9391_v26 = vld [vmem:[%s17069_s5 + $0x78] sm:$0xff]  ;;  %v9417_v29 = vld [vmem:[%s17069_s5 + $0x148] sm:$0xff]  ;;  %v9388_v30 = vld [vmem:[%s17069_s5 + $0x60] sm:$0xff] }
 0x515   : > { %10281 = vmatprep.mubr.f32.mxu1 %v14478_v19  ;;  %10352 = vmatprep.mubr.f32.mxu0 %v14478_v19  ;;  %v13422_v41 = vpack.c.bf16 %v9417_v29, %v9391_v26  ;;  %v13400_v43 = vpack.c.bf16 %v9414_v31, %v9388_v30  ;;  %v9677_v26 = vld [vmem:[%s17069_s5 + $0x968] sm:$0xff]  ;;  %v9648_v29 = vld [vmem:[%s17069_s5 + $0x880] sm:$0xff] }
 0x517   : > { %13357 = vmatpush1.bf16.msra.mxu1 %v13356_v39  ;;  %13381 = vmatpush1.bf16.msra.mxu0 %v13380_v40  ;;  %v9469_v39 = vld [vmem:[%s17069_s5 + $0x2e8] sm:$0xff]  ;;  %v13398_v40 = vpack.c.bf16 %v9415_v25, %v9389_v23  ;;  %v9675_v23 = vld [vmem:[%s17069_s5 + $0x958] sm:$0xff] }
 0x518   : > { %13359 = vmatprep.subr.bf16.mxu1 %v13358_v44  ;;  %13383 = vmatprep.subr.bf16.mxu0 %v13382_v37  ;;  %v13424_v44 = vpack.c.bf16 %v9416_v33, %v9390_v32  ;;  %v9440_v37 = vld [vmem:[%s17069_s5 + $0x200] sm:$0xff]  ;;  %v13426_v47 = vpack.c.bf16 %v9469_v39, %v9443_v38  ;;  %v9651_v25 = vld [vmem:[%s17069_s5 + $0x898] sm:$0xff]  ;;  %v9674_v32 = vld [vmem:[%s17069_s5 + $0x950] sm:$0xff] }
 0x519   : > { %v13404_v54 = vpack.c.bf16 %v9466_v45, %v9440_v37  ;;  %v13442_v31 = vpack.c.bf16 %v9677_v26, %v9651_v25  ;;  %v9650_v33 = vld [vmem:[%s17069_s5 + $0x890] sm:$0xff]  ;;  %v13420_v36 = vpack.c.bf16 %v9674_v32, %v9648_v29  ;;  %v9701_v39 = vld [vmem:[%s17069_s5 + $0xa28] sm:$0xf]  ;;  %v9700_v37 = vld [vmem:[%s17069_s5 + $0xa20] sm:$0xf] }
 0x51a   : > { %v13444_v38 = vpack.c.bf16 %v9676_v35, %v9650_v33  ;;  %v9702_v45 = vld [vmem:[%s17069_s5 + $0xa30] sm:$0xf]  ;;  %v9576_v25 = vld [vmem:[%s17069_s5 + $0x640] sm:$0xff]  ;;  %v9601_v26 = vld [vmem:[%s17069_s5 + $0x708] sm:$0xff] }
 0x51b   : > { %13361 = vmatpush1.bf16.msra.mxu1 %v13360_v51  ;;  %13385 = vmatpush1.bf16.msra.mxu0 %v13384_v52  ;;  %v9519_v51 = vld [vmem:[%s17069_s5 + $0x478] sm:$0xff]  ;;  %v9629_v29 = vld [vmem:[%s17069_s5 + $0x7e8] sm:$0xff]  ;;  %v9600_v32 = vld [vmem:[%s17069_s5 + $0x700] sm:$0xff] }
 0x51c   : > { %13363 = vmatprep.subr.bf16.mxu1 %v13362_v55  ;;  %13387 = vmatprep.subr.bf16.mxu0 %v13386_v57  ;;  %v9495_v52 = vld [vmem:[%s17069_s5 + $0x3b8] sm:$0xff]  ;;  %v13428_v55 = vpack.c.bf16 %v9468_v49, %v9442_v48  ;;  %v9492_v57 = vld [vmem:[%s17069_s5 + $0x3a0] sm:$0xff]  ;;  %v13406_v59 = vpack.c.bf16 %v9519_v51, %v9493_v50  ;;  %v9418_v48 = vld [vmem:[%s17069_s5 + $0x150] sm:$0xff] }
 0x51d   : > { %v13430_v60 = vpack.c.bf16 %v9521_v53, %v9495_v52  ;;  %v13408_v56 = vpack.c.bf16 %v9518_v58, %v9492_v57  ;;  %v9394_v49 = vld [vmem:[%s17069_s5 + $0x90] sm:$0xff]  ;;  %v9420_v50 = vld [vmem:[%s17069_s5 + $0x160] sm:$0xff]  ;;  %v9445_v51 = vld [vmem:[%s17069_s5 + $0x228] sm:$0xff] }
 0x51e   : > { %v9471_v52 = vld [vmem:[%s17069_s5 + $0x2f8] sm:$0xff]  ;;  %v9626_v33 = vld [vmem:[%s17069_s5 + $0x7d0] sm:$0xff] }
 0x51f   : > { %13365 = vmatpush1.bf16.msra.mxu1 %v13364_v0  ;;  %13389 = vmatpush1.bf16.msra.mxu0 %v13388_v1  ;;  %v9571_v0 = vld [vmem:[%s17069_s5 + $0x618] sm:$0xff] }
 0x520   : > { %13367 = vmatprep.subr.bf16.mxu1 %v13366_v3  ;;  %13391 = vmatprep.subr.bf16.mxu0 %v13390_v4  ;;  %v9547_v1 = vld [vmem:[%s17069_s5 + $0x558] sm:$0xff]  ;;  %v13432_v3 = vpack.c.bf16 %v9520_v62, %v9494_v61  ;;  %v9544_v4 = vld [vmem:[%s17069_s5 + $0x540] sm:$0xff]  ;;  %v13410_v6 = vpack.c.bf16 %v9571_v0, %v9545_v63  ;;  %v9470_v61 = vld [vmem:[%s17069_s5 + $0x2f0] sm:$0xff]  ;;  %v13450_v62 = vpack.c.bf16 %v9471_v52, %v9445_v51 }
 0x521   : > { %v13434_v7 = vpack.c.bf16 %v9573_v2, %v9547_v1  ;;  %v9447_v53 = vld [vmem:[%s17069_s5 + $0x238] sm:$0xff]  ;;  %v9446_v0 = vld [vmem:[%s17069_s5 + $0x230] sm:$0xff]  ;;  %v9472_v1 = vld [vmem:[%s17069_s5 + $0x300] sm:$0xff] }
 0x522   : > { %v9497_v2 = vld [vmem:[%s17069_s5 + $0x3c8] sm:$0xff]  ;;  %v9680_v51 = vld [vmem:[%s17069_s5 + $0x980] sm:$0xff] }
 0x523   : > { %13369 = vmatpush1.bf16.msra.mxu1 %v13368_v11  ;;  %13393 = vmatpush1.bf16.msra.mxu0 %v13392_v12  ;;  %v9623_v11 = vld [vmem:[%s17069_s5 + $0x7b8] sm:$0xff] }
 0x524   : > { %13371 = vmatprep.subr.bf16.mxu1 %v13370_v42  ;;  %13395 = vmatprep.subr.bf16.mxu0 %v13394_v15  ;;  %v9599_v12 = vld [vmem:[%s17069_s5 + $0x6f8] sm:$0xff]  ;;  %v13412_v42 = vpack.c.bf16 %v9570_v5, %v9544_v4  ;;  %v13436_v15 = vpack.c.bf16 %v9572_v9, %v9546_v8  ;;  %v13414_v18 = vpack.c.bf16 %v9623_v11, %v9597_v10  ;;  %v9525_v4 = vld [vmem:[%s17069_s5 + $0x4a8] sm:$0xff]  ;;  %v9522_v8 = vld [vmem:[%s17069_s5 + $0x490] sm:$0xff] }
 0x525   : > { %v9498_v11 = vld [vmem:[%s17069_s5 + $0x3d0] sm:$0xff] }
 0x527   : > { %13373 = vmatpush1.bf16.msra.mxu1 %v13372_v20  ;;  %13397 = vmatpush1.bf16.msra.mxu0 %v13396_v21  ;;  %v13438_v20 = vpack.c.bf16 %v9625_v14, %v9599_v12  ;;  %v9598_v21 = vld [vmem:[%s17069_s5 + $0x6f0] sm:$0xff]  ;;  %v9524_v12 = vld [vmem:[%s17069_s5 + $0x4a0] sm:$0xff]  ;;  %v9549_v14 = vld [vmem:[%s17069_s5 + $0x568] sm:$0xff] }
 0x528   : > { %12084 = vmatprep.subr.msk.mxu1 %vm9301_vm3, %v9697_v22  ;;  %12087 = vmatprep.subr.msk.mxu0 %vm9301_vm3, %v9699_v24  ;;  %v9624_v22 = vld [vmem:[%s17069_s5 + $0x7c0] sm:$0xff]  ;;  %v9649_v24 = vld [vmem:[%s17069_s5 + $0x888] sm:$0xff] }
 0x529   : > { %v13418_v30 = vpack.c.bf16 %v9675_v23, %v9649_v24  ;;  %v9550_v23 = vld [vmem:[%s17069_s5 + $0x570] sm:$0xff] }
 0x52b   : > { %12085 = vmatpush1.msk.msra.mxu1 %vm9301_vm3, %v9696_v27  ;;  %12088 = vmatpush1.msk.msra.mxu0 %vm9301_vm3, %v9698_v28  ;;  %v13416_v27 = vpack.c.bf16 %v9622_v17, %v9596_v16  ;;  %v13440_v28 = vpack.c.bf16 %v9624_v22, %v9598_v21  ;;  %v9577_v16 = vld [vmem:[%s17069_s5 + $0x648] sm:$0xff]  ;;  %v9574_v21 = vld [vmem:[%s17069_s5 + $0x630] sm:$0xff] }
 0x52c   : > { %12086 = vmatmul.mubr.msk.f32.vlgmr.msra.gmra.mrb[4].mxu1 %vm9297_vm4, %v15789_v13  ;;  %12089 = vmatmul.mubr.msk.f32.vlgmr.msra.gmra.mrb[6].mxu0 %vm9297_vm4, %v15789_v13 }
 0x52d   : > { %13399 = vmatprep.subr.bf16.mxu1 %v13398_v40  ;;  %13423 = vmatprep.subr.bf16.mxu0 %v13422_v41  ;;  %v9703_v40 = vld [vmem:[%s17069_s5 + $0xa38] sm:$0xf]  ;;  %v9393_v41 = vld [vmem:[%s17069_s5 + $0x88] sm:$0xff] }
 0x52e   : > { %13401 = vmatpush1.bf16.msra.mxu1 %v13400_v43  ;;  %13425 = vmatpush1.bf16.msra.mxu0 %v13424_v44  ;;  %v9419_v43 = vld [vmem:[%s17069_s5 + $0x158] sm:$0xff] }
 0x52f   : > { %13403 = vmatprep.subr.bf16.mxu1 %v13402_v46  ;;  %13427 = vmatprep.subr.bf16.mxu0 %v13426_v47  ;;  %v9395_v44 = vld [vmem:[%s17069_s5 + $0x98] sm:$0xff]  ;;  %v9421_v46 = vld [vmem:[%s17069_s5 + $0x168] sm:$0xff]  ;;  %v9392_v47 = vld [vmem:[%s17069_s5 + $0x80] sm:$0xff] }
 0x530   : > { %10423 = vmatprep.mubr.f32.mxu1 %v14478_v19  ;;  %10494 = vmatprep.mubr.f32.mxu0 %v14478_v19  ;;  %v13470_v57 = vpack.c.bf16 %v9421_v46, %v9395_v44  ;;  %v13448_v58 = vpack.c.bf16 %v9418_v48, %v9392_v47  ;;  %v9681_v44 = vld [vmem:[%s17069_s5 + $0x988] sm:$0xff]  ;;  %v9652_v46 = vld [vmem:[%s17069_s5 + $0x8a0] sm:$0xff] }
 0x532   : > { %13405 = vmatpush1.bf16.msra.mxu1 %v13404_v54  ;;  %13429 = vmatpush1.bf16.msra.mxu0 %v13428_v55  ;;  %v9473_v54 = vld [vmem:[%s17069_s5 + $0x308] sm:$0xff]  ;;  %v13446_v55 = vpack.c.bf16 %v9419_v43, %v9393_v41  ;;  %v9679_v41 = vld [vmem:[%s17069_s5 + $0x978] sm:$0xff] }
 0x533   : > { %13407 = vmatprep.subr.bf16.mxu1 %v13406_v59  ;;  %13431 = vmatprep.subr.bf16.mxu0 %v13430_v60  ;;  %v13472_v59 = vpack.c.bf16 %v9420_v50, %v9394_v49  ;;  %v9444_v60 = vld [vmem:[%s17069_s5 + $0x220] sm:$0xff]  ;;  %v13474_v63 = vpack.c.bf16 %v9473_v54, %v9447_v53  ;;  %v9655_v43 = vld [vmem:[%s17069_s5 + $0x8b8] sm:$0xff]  ;;  %v9678_v49 = vld [vmem:[%s17069_s5 + $0x970] sm:$0xff] }
 0x534   : > { %v13452_v5 = vpack.c.bf16 %v9470_v61, %v9444_v60  ;;  %v13490_v48 = vpack.c.bf16 %v9681_v44, %v9655_v43  ;;  %v9654_v50 = vld [vmem:[%s17069_s5 + $0x8b0] sm:$0xff]  ;;  %v13468_v52 = vpack.c.bf16 %v9678_v49, %v9652_v46  ;;  %v9705_v54 = vld [vmem:[%s17069_s5 + $0xa48] sm:$0xf]  ;;  %v9704_v60 = vld [vmem:[%s17069_s5 + $0xa40] sm:$0xf] }
 0x535   : > { %v13492_v53 = vpack.c.bf16 %v9680_v51, %v9654_v50  ;;  %v9706_v61 = vld [vmem:[%s17069_s5 + $0xa50] sm:$0xf]  ;;  %v9580_v43 = vld [vmem:[%s17069_s5 + $0x660] sm:$0xff]  ;;  %v9605_v44 = vld [vmem:[%s17069_s5 + $0x728] sm:$0xff] }
 0x536   : > { %13409 = vmatpush1.bf16.msra.mxu1 %v13408_v56  ;;  %13433 = vmatpush1.bf16.msra.mxu0 %v13432_v3  ;;  %v9523_v56 = vld [vmem:[%s17069_s5 + $0x498] sm:$0xff]  ;;  %v9633_v46 = vld [vmem:[%s17069_s5 + $0x808] sm:$0xff]  ;;  %v9604_v49 = vld [vmem:[%s17069_s5 + $0x720] sm:$0xff] }
 0x537   : > { %13411 = vmatprep.subr.bf16.mxu1 %v13410_v6  ;;  %13435 = vmatprep.subr.bf16.mxu0 %v13434_v7  ;;  %v9499_v3 = vld [vmem:[%s17069_s5 + $0x3d8] sm:$0xff]  ;;  %v13476_v6 = vpack.c.bf16 %v9472_v1, %v9446_v0  ;;  %v9496_v7 = vld [vmem:[%s17069_s5 + $0x3c0] sm:$0xff]  ;;  %v13454_v9 = vpack.c.bf16 %v9523_v56, %v9497_v2  ;;  %v9422_v0 = vld [vmem:[%s17069_s5 + $0x170] sm:$0xff] }
 0x538   : > { %v13478_v10 = vpack.c.bf16 %v9525_v4, %v9499_v3  ;;  %v13456_v17 = vpack.c.bf16 %v9522_v8, %v9496_v7  ;;  %v9398_v1 = vld [vmem:[%s17069_s5 + $0xb0] sm:$0xff]  ;;  %v9424_v2 = vld [vmem:[%s17069_s5 + $0x180] sm:$0xff]  ;;  %v9449_v56 = vld [vmem:[%s17069_s5 + $0x248] sm:$0xff] }
 0x539   : > { %v9475_v3 = vld [vmem:[%s17069_s5 + $0x318] sm:$0xff]  ;;  %v9630_v50 = vld [vmem:[%s17069_s5 + $0x7f0] sm:$0xff] }
 0x53a   : > { %13413 = vmatpush1.bf16.msra.mxu1 %v13412_v42  ;;  %13437 = vmatpush1.bf16.msra.mxu0 %v13436_v15  ;;  %v9575_v42 = vld [vmem:[%s17069_s5 + $0x638] sm:$0xff] }
 0x53b   : > { %13415 = vmatprep.subr.bf16.mxu1 %v13414_v18  ;;  %13439 = vmatprep.subr.bf16.mxu0 %v13438_v20  ;;  %v9551_v15 = vld [vmem:[%s17069_s5 + $0x578] sm:$0xff]  ;;  %v13480_v18 = vpack.c.bf16 %v9524_v12, %v9498_v11  ;;  %v9548_v20 = vld [vmem:[%s17069_s5 + $0x560] sm:$0xff]  ;;  %v13458_v22 = vpack.c.bf16 %v9575_v42, %v9549_v14  ;;  %v9474_v11 = vld [vmem:[%s17069_s5 + $0x310] sm:$0xff]  ;;  %v13498_v12 = vpack.c.bf16 %v9475_v3, %v9449_v56 }
 0x53c   : > { %v13482_v24 = vpack.c.bf16 %v9577_v16, %v9551_v15  ;;  %v9451_v4 = vld [vmem:[%s17069_s5 + $0x258] sm:$0xff]  ;;  %v9450_v42 = vld [vmem:[%s17069_s5 + $0x250] sm:$0xff]  ;;  %v9476_v15 = vld [vmem:[%s17069_s5 + $0x320] sm:$0xff] }
 0x53d   : > { %v9501_v16 = vld [vmem:[%s17069_s5 + $0x3e8] sm:$0xff]  ;;  %v9684_v56 = vld [vmem:[%s17069_s5 + $0x9a0] sm:$0xff] }
 0x53e   : > { %13417 = vmatpush1.bf16.msra.mxu1 %v13416_v27  ;;  %13441 = vmatpush1.bf16.msra.mxu0 %v13440_v28  ;;  %v9627_v27 = vld [vmem:[%s17069_s5 + $0x7d8] sm:$0xff] }
 0x53f   : > { %13419 = vmatprep.subr.bf16.mxu1 %v13418_v30  ;;  %13443 = vmatprep.subr.bf16.mxu0 %v13442_v31  ;;  %v9603_v28 = vld [vmem:[%s17069_s5 + $0x718] sm:$0xff]  ;;  %v13460_v30 = vpack.c.bf16 %v9574_v21, %v9548_v20  ;;  %v13484_v31 = vpack.c.bf16 %v9576_v25, %v9550_v23  ;;  %v13462_v35 = vpack.c.bf16 %v9627_v27, %v9601_v26  ;;  %v9529_v20 = vld [vmem:[%s17069_s5 + $0x4c8] sm:$0xff]  ;;  %v9526_v23 = vld [vmem:[%s17069_s5 + $0x4b0] sm:$0xff] }
 0x540   : > { %v9502_v27 = vld [vmem:[%s17069_s5 + $0x3f0] sm:$0xff] }
 0x542   : > { %13421 = vmatpush1.bf16.msra.mxu1 %v13420_v36  ;;  %13445 = vmatpush1.bf16.msra.mxu0 %v13444_v38  ;;  %v13486_v36 = vpack.c.bf16 %v9629_v29, %v9603_v28  ;;  %v9602_v38 = vld [vmem:[%s17069_s5 + $0x710] sm:$0xff]  ;;  %v9528_v28 = vld [vmem:[%s17069_s5 + $0x4c0] sm:$0xff]  ;;  %v9553_v29 = vld [vmem:[%s17069_s5 + $0x588] sm:$0xff] }
 0x543   : > { %12090 = vmatprep.subr.msk.mxu1 %vm9301_vm3, %v9701_v39  ;;  %12093 = vmatprep.subr.msk.mxu0 %vm9301_vm3, %v9703_v40  ;;  %v9628_v39 = vld [vmem:[%s17069_s5 + $0x7e0] sm:$0xff]  ;;  %v9653_v40 = vld [vmem:[%s17069_s5 + $0x8a8] sm:$0xff] }
 0x544   : > { %v13466_v47 = vpack.c.bf16 %v9679_v41, %v9653_v40  ;;  %v9554_v41 = vld [vmem:[%s17069_s5 + $0x590] sm:$0xff] }
 0x546   : > { %12091 = vmatpush1.msk.msra.mxu1 %vm9301_vm3, %v9700_v37  ;;  %12094 = vmatpush1.msk.msra.mxu0 %vm9301_vm3, %v9702_v45  ;;  %v13464_v37 = vpack.c.bf16 %v9626_v33, %v9600_v32  ;;  %v13488_v45 = vpack.c.bf16 %v9628_v39, %v9602_v38  ;;  %v9581_v32 = vld [vmem:[%s17069_s5 + $0x668] sm:$0xff]  ;;  %v9578_v38 = vld [vmem:[%s17069_s5 + $0x650] sm:$0xff] }
 0x547   : > { %12092 = vmatmul.mubr.msk.f32.vlgmr.msra.gmra.mrb[6].mxu1 %vm9297_vm4, %v15789_v13  ;;  %12095 = vmatmul.mubr.msk.f32.vlgmr.msra.gmra.mrb[8].mxu0 %vm9297_vm4, %v15789_v13 }
 0x548   : > { %13447 = vmatprep.subr.bf16.mxu1 %v13446_v55  ;;  %13471 = vmatprep.subr.bf16.mxu0 %v13470_v57  ;;  %v9707_v55 = vld [vmem:[%s17069_s5 + $0xa58] sm:$0xf]  ;;  %v9397_v57 = vld [vmem:[%s17069_s5 + $0xa8] sm:$0xff] }
 0x549   : > { %13449 = vmatpush1.bf16.msra.mxu1 %v13448_v58  ;;  %13473 = vmatpush1.bf16.msra.mxu0 %v13472_v59  ;;  %v9423_v58 = vld [vmem:[%s17069_s5 + $0x178] sm:$0xff] }
 0x54a   : > { %13451 = vmatprep.subr.bf16.mxu1 %v13450_v62  ;;  %13475 = vmatprep.subr.bf16.mxu0 %v13474_v63  ;;  %v9399_v59 = vld [vmem:[%s17069_s5 + $0xb8] sm:$0xff]  ;;  %v9425_v62 = vld [vmem:[%s17069_s5 + $0x188] sm:$0xff]  ;;  %v9396_v63 = vld [vmem:[%s17069_s5 + $0xa0] sm:$0xff] }
 0x54b   : > { %10565 = vmatprep.mubr.f32.mxu1 %v14478_v19  ;;  %10636 = vmatprep.mubr.f32.mxu0 %v14478_v19  ;;  %v13518_v7 = vpack.c.bf16 %v9425_v62, %v9399_v59  ;;  %v13496_v8 = vpack.c.bf16 %v9422_v0, %v9396_v63  ;;  %v9685_v59 = vld [vmem:[%s17069_s5 + $0x9a8] sm:$0xff]  ;;  %v9656_v62 = vld [vmem:[%s17069_s5 + $0x8c0] sm:$0xff] }
 0x54d   : > { %13453 = vmatpush1.bf16.msra.mxu1 %v13452_v5  ;;  %13477 = vmatpush1.bf16.msra.mxu0 %v13476_v6  ;;  %v9477_v5 = vld [vmem:[%s17069_s5 + $0x328] sm:$0xff]  ;;  %v13494_v6 = vpack.c.bf16 %v9423_v58, %v9397_v57  ;;  %v9683_v57 = vld [vmem:[%s17069_s5 + $0x998] sm:$0xff] }
 0x54e   : > { %13455 = vmatprep.subr.bf16.mxu1 %v13454_v9  ;;  %13479 = vmatprep.subr.bf16.mxu0 %v13478_v10  ;;  %v13520_v9 = vpack.c.bf16 %v9424_v2, %v9398_v1  ;;  %v9448_v10 = vld [vmem:[%s17069_s5 + $0x240] sm:$0xff]  ;;  %v13522_v14 = vpack.c.bf16 %v9477_v5, %v9451_v4  ;;  %v9659_v58 = vld [vmem:[%s17069_s5 + $0x8d8] sm:$0xff]  ;;  %v9682_v1 = vld [vmem:[%s17069_s5 + $0x990] sm:$0xff] }
 0x54f   : > { %v13500_v21 = vpack.c.bf16 %v9474_v11, %v9448_v10  ;;  %v13538_v0 = vpack.c.bf16 %v9685_v59, %v9659_v58  ;;  %v9658_v2 = vld [vmem:[%s17069_s5 + $0x8d0] sm:$0xff]  ;;  %v13516_v3 = vpack.c.bf16 %v9682_v1, %v9656_v62  ;;  %v9709_v5 = vld [vmem:[%s17069_s5 + $0xa68] sm:$0xf]  ;;  %v9400_v10 = vld [vmem:[%s17069_s5 + $0xc0] sm:$0xff] }
 0x550   : > { %v13540_v4 = vpack.c.bf16 %v9684_v56, %v9658_v2  ;;  %v9426_v11 = vld [vmem:[%s17069_s5 + $0x190] sm:$0xff] }
 0x551   : > { %13457 = vmatpush1.bf16.msra.mxu1 %v13456_v17  ;;  %13481 = vmatpush1.bf16.msra.mxu0 %v13480_v18  ;;  %v9527_v17 = vld [vmem:[%s17069_s5 + $0x4b8] sm:$0xff] }
 0x552   : > { %13459 = vmatprep.subr.bf16.mxu1 %v13458_v22  ;;  %13483 = vmatprep.subr.bf16.mxu0 %v13482_v24  ;;  %v9503_v18 = vld [vmem:[%s17069_s5 + $0x3f8] sm:$0xff]  ;;  %v13524_v22 = vpack.c.bf16 %v9476_v15, %v9450_v42  ;;  %v9500_v24 = vld [vmem:[%s17069_s5 + $0x3e0] sm:$0xff]  ;;  %v13502_v25 = vpack.c.bf16 %v9527_v17, %v9501_v16  ;;  %v13544_v16 = vpack.c.bf16 %v9426_v11, %v9400_v10  ;;  %v16703_v10 = vsub.s32 2, %v14577_v34 }
 0x553   : > { %v13526_v26 = vpack.c.bf16 %v9529_v20, %v9503_v18  ;;  %v13504_v33 = vpack.c.bf16 %v9526_v23, %v9500_v24  ;;  %v9479_v42 = vld [vmem:[%s17069_s5 + $0x338] sm:$0xff]  ;;  %v9452_v18 = vld [vmem:[%s17069_s5 + $0x260] sm:$0xff]  ;;  %v9478_v20 = vld [vmem:[%s17069_s5 + $0x330] sm:$0xff]  ;;  %v16706_v11 = vsub.s32 1, %v14577_v34 }
 0x554   : > { %v13548_v24 = vpack.c.bf16 %v9478_v20, %v9452_v18  ;;  %v9715_v18 = vld [vmem:[%s17070_s6 + $0x8] sm:$0xff] }
 0x555   : > { %13461 = vmatpush1.bf16.msra.mxu1 %v13460_v30  ;;  %13485 = vmatpush1.bf16.msra.mxu0 %v13484_v31  ;;  %v9579_v30 = vld [vmem:[%s17069_s5 + $0x658] sm:$0xff] }
 0x556   : > { %13463 = vmatprep.subr.bf16.mxu1 %v13462_v35  ;;  %13487 = vmatprep.subr.bf16.mxu0 %v13486_v36  ;;  %v9555_v31 = vld [vmem:[%s17069_s5 + $0x598] sm:$0xff]  ;;  %v13528_v35 = vpack.c.bf16 %v9528_v28, %v9502_v27  ;;  %v9552_v36 = vld [vmem:[%s17069_s5 + $0x580] sm:$0xff]  ;;  %v13506_v39 = vpack.c.bf16 %v9579_v30, %v9553_v29  ;;  %v9557_v27 = vld [vmem:[%s17069_s5 + $0x5a8] sm:$0xff] }
 0x557   : > { %v13530_v40 = vpack.c.bf16 %v9581_v32, %v9555_v31  ;;  %v9556_v30 = vld [vmem:[%s17069_s5 + $0x5a0] sm:$0xff]  ;;  %v9582_v31 = vld [vmem:[%s17069_s5 + $0x670] sm:$0xff]  ;;  %v9609_v32 = vld [vmem:[%s17069_s5 + $0x748] sm:$0xff] }
 0x559   : > { %13465 = vmatpush1.bf16.msra.mxu1 %v13464_v37  ;;  %13489 = vmatpush1.bf16.msra.mxu0 %v13488_v45  ;;  %v9631_v37 = vld [vmem:[%s17069_s5 + $0x7f8] sm:$0xff] }
 0x55a   : > { %13467 = vmatprep.subr.bf16.mxu1 %v13466_v47  ;;  %13491 = vmatprep.subr.bf16.mxu0 %v13490_v48  ;;  %v9607_v45 = vld [vmem:[%s17069_s5 + $0x738] sm:$0xff]  ;;  %v13508_v47 = vpack.c.bf16 %v9578_v38, %v9552_v36  ;;  %v13532_v48 = vpack.c.bf16 %v9580_v43, %v9554_v41  ;;  %v13510_v51 = vpack.c.bf16 %v9631_v37, %v9605_v44  ;;  %v9608_v38 = vld [vmem:[%s17069_s5 + $0x740] sm:$0xff] }
 0x55b   : > { %v9687_v41 = vld [vmem:[%s17069_s5 + $0x9b8] sm:$0xff]  ;;  %v9660_v37 = vld [vmem:[%s17069_s5 + $0x8e0] sm:$0xff] }
 0x55d   : > { %13469 = vmatpush1.bf16.msra.mxu1 %v13468_v52  ;;  %13493 = vmatpush1.bf16.msra.mxu0 %v13492_v53  ;;  %v13534_v52 = vpack.c.bf16 %v9633_v46, %v9607_v45  ;;  %v9606_v53 = vld [vmem:[%s17069_s5 + $0x730] sm:$0xff] }
 0x55e   : > { %12096 = vmatprep.subr.msk.mxu1 %vm9301_vm3, %v9705_v54  ;;  %12099 = vmatprep.subr.msk.mxu0 %vm9301_vm3, %v9707_v55  ;;  %v9632_v54 = vld [vmem:[%s17069_s5 + $0x800] sm:$0xff]  ;;  %v9657_v55 = vld [vmem:[%s17069_s5 + $0x8c8] sm:$0xff]  ;;  %v9686_v45 = vld [vmem:[%s17069_s5 + $0x9b0] sm:$0xff] }
 0x55f   : > { %v13514_v63 = vpack.c.bf16 %v9683_v57, %v9657_v55  ;;  %v13564_v46 = vpack.c.bf16 %v9686_v45, %v9660_v37 }
 0x561   : > { %12097 = vmatpush1.msk.msra.mxu1 %vm9301_vm3, %v9704_v60  ;;  %12100 = vmatpush1.msk.msra.mxu0 %vm9301_vm3, %v9706_v61  ;;  %v13512_v60 = vpack.c.bf16 %v9630_v50, %v9604_v49  ;;  %v13536_v61 = vpack.c.bf16 %v9632_v54, %v9606_v53 }
 0x562   : > { %12098 = vmatmul.mubr.msk.f32.vlgmr.msra.gmra.mrb[8].mxu1 %vm9297_vm4, %v15789_v13  ;;  %12101 = vmatmul.mubr.msk.f32.vlgmr.msra.gmra.mrb[10].mxu0 %vm9297_vm4, %v15789_v13 }
 0x563   : > { %13495 = vmatprep.subr.bf16.mxu1 %v13494_v6  ;;  %13519 = vmatprep.subr.bf16.mxu0 %v13518_v7  ;;  %v9711_v6 = vld [vmem:[%s17069_s5 + $0xa78] sm:$0xf]  ;;  %v9401_v7 = vld [vmem:[%s17069_s5 + $0xc8] sm:$0xff] }
 0x564   : > { %13497 = vmatpush1.bf16.msra.mxu1 %v13496_v8  ;;  %13521 = vmatpush1.bf16.msra.mxu0 %v13520_v9  ;;  %v9427_v8 = vld [vmem:[%s17069_s5 + $0x198] sm:$0xff]  ;;  %v9708_v9 = vld [vmem:[%s17069_s5 + $0xa60] sm:$0xf] }
 0x565   : > { %13499 = vmatprep.subr.bf16.mxu1 %v13498_v12  ;;  %13523 = vmatprep.subr.bf16.mxu0 %v13522_v14  ;;  %v9710_v12 = vld [vmem:[%s17069_s5 + $0xa70] sm:$0xf]  ;;  %v9453_v14 = vld [vmem:[%s17069_s5 + $0x268] sm:$0xff]  ;;  %v13542_v15 = vpack.c.bf16 %v9427_v8, %v9401_v7 }
 0x566   : > { %10707 = vmatprep.mubr.f32.mxu1 %v14478_v19  ;;  %10778 = vmatprep.mubr.f32.mxu0 %v14478_v19  ;;  %v13546_v17 = vpack.c.bf16 %v9479_v42, %v9453_v14  ;;  %v16712_v14 = vsub.s32 4, %v14577_v34  ;;  %v16715_v42 = vsub.s32 6, %v14577_v34 }
 0x568   : > { %13501 = vmatpush1.bf16.msra.mxu1 %v13500_v21  ;;  %13525 = vmatpush1.bf16.msra.mxu0 %v13524_v22  ;;  %v9505_v21 = vld [vmem:[%s17069_s5 + $0x408] sm:$0xff]  ;;  %v9531_v22 = vld [vmem:[%s17069_s5 + $0x4d8] sm:$0xff] }
 0x569   : > { %13503 = vmatprep.subr.bf16.mxu1 %v13502_v25  ;;  %13527 = vmatprep.subr.bf16.mxu0 %v13526_v26  ;;  %v13550_v23 = vpack.c.bf16 %v9531_v22, %v9505_v21  ;;  %v9504_v25 = vld [vmem:[%s17069_s5 + $0x400] sm:$0xff]  ;;  %v9530_v26 = vld [vmem:[%s17069_s5 + $0x4d0] sm:$0xff] }
 0x56a   : > { %v13552_v28 = vpack.c.bf16 %v9530_v26, %v9504_v25 }
 0x56c   : > { %13505 = vmatpush1.bf16.msra.mxu1 %v13504_v33  ;;  %13529 = vmatpush1.bf16.msra.mxu0 %v13528_v35  ;;  %v9635_v33 = vld [vmem:[%s17069_s5 + $0x818] sm:$0xff]  ;;  %v13556_v35 = vpack.c.bf16 %v9582_v31, %v9556_v30 }
 0x56d   : > { %13507 = vmatprep.subr.bf16.mxu1 %v13506_v39  ;;  %13531 = vmatprep.subr.bf16.mxu0 %v13530_v40  ;;  %v13558_v36 = vpack.c.bf16 %v9635_v33, %v9609_v32  ;;  %v9634_v39 = vld [vmem:[%s17069_s5 + $0x810] sm:$0xff]  ;;  %v9661_v40 = vld [vmem:[%s17069_s5 + $0x8e8] sm:$0xff]  ;;  %v9773_v32 = vrot.slane %v9715_v18, %v16712_v14  ;;  %v9781_v33 = vrot.slane %v9715_v18, %v16715_v42 }
 0x56e   : > { %v13560_v43 = vpack.c.bf16 %v9634_v39, %v9608_v38  ;;  %v13562_v44 = vpack.c.bf16 %v9687_v41, %v9661_v40 }
 0x570   : > { %13509 = vmatpush1.bf16.msra.mxu1 %v13508_v47  ;;  %13533 = vmatpush1.bf16.msra.mxu0 %v13532_v48  ;;  %v9713_v47 = vld [vmem:[%s17069_s5 + $0xa88] sm:$0xf]  ;;  %v9712_v48 = vld [vmem:[%s17069_s5 + $0xa80] sm:$0xf] }
 0x571   : > { %13511 = vmatprep.subr.bf16.mxu1 %v13510_v51  ;;  %13535 = vmatprep.subr.bf16.mxu0 %v13534_v52 }
 0x574   : > { %13513 = vmatpush1.bf16.msra.mxu1 %v13512_v60  ;;  %13537 = vmatpush1.bf16.msra.mxu0 %v13536_v61 }
 0x575   : > { %13515 = vmatprep.subr.bf16.mxu1 %v13514_v63  ;;  %13539 = vmatprep.subr.bf16.mxu0 %v13538_v0 }
 0x578   : > { %13517 = vmatpush1.bf16.msra.mxu1 %v13516_v3  ;;  %13541 = vmatpush1.bf16.msra.mxu0 %v13540_v4 }
 0x579   : > { %12102 = vmatprep.subr.msk.mxu1 %vm9301_vm3, %v9709_v5  ;;  %12105 = vmatprep.subr.msk.mxu0 %vm9301_vm3, %v9711_v6  ;;  %v16693_v6 = vsub.s32 0, %v14577_v34 }
 0x57c   : > { %12103 = vmatpush1.msk.msra.mxu1 %vm9301_vm3, %v9708_v9  ;;  %12106 = vmatpush1.msk.msra.mxu0 %vm9301_vm3, %v9710_v12  ;;  %v9714_v9 = vld [vmem:[%s17070_s6] sm:$0xff]  ;;  %v16709_v12 = vsub.s32 3, %v14577_v34 }
 0x57d   : > { %12104 = vmatmul.mubr.msk.f32.vlgmr.msra.gmra.mrb[10].mxu1 %vm9297_vm4, %v15789_v13  ;;  %12107 = vmatmul.mubr.msk.f32.vlgmr.msra.gmra.mrb[12].mxu0 %vm9297_vm4, %v15789_v13  ;;  %v9733_v20 = vrot.slane %v9714_v9, %v16703_v10  ;;  %v9729_v21 = vrot.slane %v9714_v9, %v16706_v11 }
 0x57e   : > { %13543 = vmatprep.subr.bf16.mxu1 %v13542_v15  ;;  %10849 = vmatprep.mubr.f32.mxu1 %v14478_v19  ;;  %v9583_v19 = vld [vmem:[%s17069_s5 + $0x678] sm:$0xff]  ;;  %v16718_v15 = vsub.s32 5, %v14577_v34  ;;  %v9737_v22 = vrot.slane %v9714_v9, %v16709_v12  ;;  %v9769_v31 = vrot.slane %v9715_v18, %v16709_v12 }
 0x57f   : > { %13545 = vmatpush1.bf16.msra.mxu1 %v13544_v16  ;;  %v13554_v29 = vpack.c.bf16 %v9583_v19, %v9557_v27  ;;  %v16721_v16 = vsub.s32 7, %v14577_v34  ;;  %v9757_v27 = vrot.slane %v9715_v18, %v16693_v6  ;;  %v9765_v19 = vrot.slane %v9715_v18, %v16703_v10 }
 0x580   : > { %13547 = vmatprep.subr.bf16.mxu1 %v13546_v17  ;;  %v9725_v17 = vrot.slane %v9714_v9, %v16693_v6  ;;  %v9745_v25 = vrot.slane %v9714_v9, %v16718_v15  ;;  %v9777_v41 = vrot.slane %v9715_v18, %v16718_v15 }
 0x581   : > { %v9753_v26 = vrot.slane %v9714_v9, %v16721_v16 }
 0x583   : > { %13549 = vmatpush1.bf16.msra.mxu1 %v13548_v24  ;;  %v9741_v24 = vrot.slane %v9714_v9, %v16712_v14 }
 0x584   : > { %13551 = vmatprep.subr.bf16.mxu1 %v13550_v23  ;;  %v9749_v23 = vrot.slane %v9714_v9, %v16715_v42 }
 0x587   : > { %13553 = vmatpush1.bf16.msra.mxu1 %v13552_v28  ;;  %v9761_v28 = vrot.slane %v9715_v18, %v16706_v11 }
 0x588   : > { %13555 = vmatprep.subr.bf16.mxu1 %v13554_v29  ;;  %v16740_v29 = vld [vmem:[%s17070_s6 + $0x10] sm:$0xff] }
 0x589   : > { %v9813_v9 = vrot.slane %v16740_v29, %v16715_v42 }
 0x58b   : > { %13557 = vmatpush1.bf16.msra.mxu1 %v13556_v35 }
 0x58c   : > { %13559 = vmatprep.subr.bf16.mxu1 %v13558_v36 }
 0x58f   : > { %13561 = vmatpush1.bf16.msra.mxu1 %v13560_v43  ;;  %v9785_v43 = vrot.slane %v9715_v18, %v16721_v16 }
 0x590   : > { %13563 = vmatprep.subr.bf16.mxu1 %v13562_v44  ;;  %v9789_v44 = vrot.slane %v16740_v29, %v16693_v6 }
 0x593   : > { %13565 = vmatpush1.bf16.msra.mxu1 %v13564_v46  ;;  %v9797_v46 = vrot.slane %v16740_v29, %v16703_v10  ;;  %v9809_v10 = vrot.slane %v16740_v29, %v16718_v15 }
 0x594   : > { %12108 = vmatprep.subr.msk.mxu1 %vm9301_vm3, %v9713_v47  ;;  %v9793_v47 = vrot.slane %v16740_v29, %v16706_v11 }
 0x597   : > { %12109 = vmatpush1.msk.msra.mxu1 %vm9301_vm3, %v9712_v48 }
 0x598   : > { %12110 = vmatmul.mubr.msk.f32.vlgmr.msra.gmra.mrb[12].mxu1 %vm9297_vm4, %v15789_v13 }
 0x5ca   : > { %v9999_v49 = vpop.f32.mrb[0].mxu1  ;;  %v10070_v50 = vpop.f32.mrb[2].mxu0 }
 0x5cb   : > { %v10001_v51 = vpop.f32.mrb[1].mxu1  ;;  %v10072_v52 = vpop.f32.mrb[3].mxu0  ;;  %v16742_v30 = vadd.f32 %v9999_v49, %v9725_v17  ;;  %v16747_v35 = vadd.f32 %v10070_v50, %v9733_v20  ;;  %v9801_v50 = vrot.slane %v16740_v29, %v16709_v12  ;;  %v9817_v12 = vrot.slane %v16740_v29, %v16721_v16 }
 0x5cc   : > { %v16749_v36 = vadd.f32 %v10001_v51, %v9729_v21  ;;  %v16751_v38 = vadd.f32 %v10072_v52, %v9737_v22  ;;  %v9805_v51 = vrot.slane %v16740_v29, %v16712_v14 }
 0x5cd   : > { %v10857_v48 = vsel %vm10856_vm5, %v16742_v30, -inf  ;;  %v10859_v52 = vsel %vm10856_vm5, %v16747_v35, -inf }
 0x5e4   : > { %v10141_v53 = vpop.f32.mrb[2].mxu1  ;;  %v10212_v54 = vpop.f32.mrb[4].mxu0 }
 0x5e5   : > { %v10143_v55 = vpop.f32.mrb[3].mxu1  ;;  %v10214_v57 = vpop.f32.mrb[5].mxu0  ;;  %v16753_v39 = vadd.f32 %v10141_v53, %v9741_v24  ;;  %v16755_v40 = vadd.f32 %v10212_v54, %v9749_v23  ;;  %v10858_v53 = vsel %vm10856_vm5, %v16749_v36, -inf  ;;  %v10860_v54 = vsel %vm10856_vm5, %v16751_v38, -inf }
 0x5e6   : > { %v16761_v37 = vadd.f32 %v10143_v55, %v9745_v25  ;;  %v16763_v45 = vadd.f32 %v10214_v57, %v9753_v26  ;;  %v9717_v57 = vld [vmem:[%s17070_s6 + $0x18] sm:$0x3] }
 0x5e7   : > { %v10861_v55 = vsel %vm10856_vm5, %v16753_v39, -inf  ;;  %v9821_v16 = vrot.slane %v9717_v57, %v16693_v6 }
 0x5e8   : > { %v10863_v14 = vsel %vm10856_vm5, %v16761_v37, -inf  ;;  %v10867_v17 = vsel %vm10856_vm5, %v16763_v45, -inf  ;;  %v10862_v21 = vmax.f32 %v10857_v48, %v10861_v55 }
 0x5e9   : > { %v10868_v25 = vmax.f32 %v10860_v54, %v10867_v17 }
 0x5ff   : > { %v10283_v58 = vpop.f32.mrb[4].mxu1  ;;  %v16666_v59 = vpop.f32.mrb[6].mxu0 }
 0x600   : > { %v16668_v60 = vpop.f32.mrb[5].mxu1  ;;  %v16670_v61 = vpop.f32.mrb[7].mxu0  ;;  %v16771_v49 = vadd.f32 %v10283_v58, %v9757_v27  ;;  %v10865_v58 = vsel %vm10856_vm5, %v16755_v40, -inf  ;;  %v16801_v18 = vadd.f32 %v16666_v59, %v9765_v19 }
 0x601   : > { %v16804_v20 = vadd.f32 %v16668_v60, %v9761_v28  ;;  %v16809_v15 = vadd.f32 %v16670_v61, %v9769_v31  ;;  %v10866_v22 = vmax.f32 %v10859_v52, %v10865_v58  ;;  %v10864_v60 = vmax.f32 %v10858_v53, %v10863_v14 }
 0x602   : > { %v10869_v42 = vsel %vm10856_vm5, %v16771_v49, -inf  ;;  %v9825_v61 = vrot.slane %v9717_v57, %v16706_v11  ;;  %v10873_v6 = vsel %vm10856_vm5, %v16801_v18, -inf }
 0x603   : > { %v10870_v27 = vmax.f32 %v10862_v21, %v10869_v42 }
 0x61a   : > { %v16672_v62 = vpop.f32.mrb[6].mxu1  ;;  %v16674_v63 = vpop.f32.mrb[8].mxu0 }
 0x61b   : > { %v16676_v13 = vpop.f32.mrb[7].mxu1  ;;  %v16678_v0 = vpop.f32.mrb[9].mxu0  ;;  %v16813_v24 = vadd.f32 %v16672_v62, %v9773_v32  ;;  %v16816_v23 = vadd.f32 %v16674_v63, %v9781_v33  ;;  %v10871_v62 = vsel %vm10856_vm5, %v16804_v20, -inf  ;;  %v10874_v33 = vmax.f32 %v10866_v22, %v10873_v6 }
 0x61c   : > { %v16819_v59 = vadd.f32 %v16676_v13, %v9777_v41  ;;  %v16822_v26 = vadd.f32 %v16678_v0, %v9785_v43  ;;  %v10875_v13 = vsel %vm10856_vm5, %v16809_v15, -inf  ;;  %v10872_v41 = vmax.f32 %v10864_v60, %v10871_v62 }
 0x61d   : > { %v10877_v28 = vsel %vm10856_vm5, %v16813_v24, -inf  ;;  %v10876_v43 = vmax.f32 %v10868_v25, %v10875_v13 }
 0x61e   : > { %v10879_v29 = vsel %vm10856_vm5, %v16819_v59, -inf }
 0x61f   : > { %v10880_v48 = vmax.f32 %v10872_v41, %v10879_v29 }
 0x635   : > { %v16680_v1 = vpop.f32.mrb[8].mxu1  ;;  %v16682_v2 = vpop.f32.mrb[10].mxu0 }
 0x636   : > { %v16684_v56 = vpop.f32.mrb[9].mxu1  ;;  %v16686_v3 = vpop.f32.mrb[11].mxu0  ;;  %v16830_v63 = vadd.f32 %v16680_v1, %v9789_v44  ;;  %v16835_v19 = vadd.f32 %v16682_v2, %v9797_v46  ;;  %v10881_v1 = vsel %vm10856_vm5, %v16816_v23, -inf  ;;  %v10883_v2 = vsel %vm10856_vm5, %v16822_v26, -inf }
 0x637   : > { %v16838_v0 = vadd.f32 %v16684_v56, %v9793_v47  ;;  %v16841_v11 = vadd.f32 %v16686_v3, %v9801_v50  ;;  %v10882_v47 = vmax.f32 %v10874_v33, %v10881_v1 }
 0x638   : > { %v10885_v44 = vsel %vm10856_vm5, %v16830_v63, -inf  ;;  %v10889_v46 = vsel %vm10856_vm5, %v16835_v19, -inf }
 0x639   : > { %v10890_v57 = vmax.f32 %v10882_v47, %v10889_v46 }
 0x650   : > { %v16688_v4 = vpop.f32.mrb[10].mxu1  ;;  %v16690_v5 = vpop.f32.mrb[12].mxu0 }
 0x651   : > { %v16695_v7 = vpop.f32.mrb[11].mxu1  ;;  %v16697_v8 = vpop.f32.mrb[13].mxu0  ;;  %v16850_v31 = vadd.f32 %v16688_v4, %v9805_v51  ;;  %v16855_v56 = vadd.f32 %v16690_v5, %v9813_v9  ;;  %v10878_v4 = vmax.f32 %v10870_v27, %v10877_v28  ;;  %v10887_v5 = vsel %vm10856_vm5, %v16838_v0, -inf }
 0x652   : > { %v16858_v3 = vadd.f32 %v16695_v7, %v9809_v10  ;;  %v16861_v32 = vadd.f32 %v16697_v8, %v9817_v12  ;;  %v10891_v7 = vsel %vm10856_vm5, %v16841_v11, -inf  ;;  %v10884_v8 = vmax.f32 %v10876_v43, %v10883_v2 }
 0x653   : > { %v10893_v50 = vsel %vm10856_vm5, %v16850_v31, -inf  ;;  %v10886_v51 = vmax.f32 %v10878_v4, %v10885_v44  ;;  %v10897_v52 = vsel %vm10856_vm5, %v16855_v56, -inf  ;;  %v10888_v58 = vmax.f32 %v10880_v48, %v10887_v5 }
 0x654   : > { %v10895_v53 = vsel %vm10856_vm5, %v16858_v3, -inf  ;;  %v10899_v54 = vsel %vm10856_vm5, %v16861_v32, -inf  ;;  %v10892_v9 = vmax.f32 %v10884_v8, %v10891_v7  ;;  %v10898_v21 = vmax.f32 %v10890_v57, %v10897_v52 }
 0x655   : > { %v10894_v14 = vmax.f32 %v10886_v51, %v10893_v50  ;;  %v10896_v42 = vmax.f32 %v10888_v58, %v10895_v53 }
 0x656   : > { %v10900_v22 = vmax.f32 %v10892_v9, %v10899_v54 }
 0x658   : > { %v10907_v13 = vmax.f32 %v10898_v21, %v10900_v22 }
 0x66b   : > { %v10851_v55 = vpop.f32.mrb[12].mxu1 }
 0x66c   : > { %v16879_v10 = vadd.f32 %v10851_v55, %v9821_v16  ;;  %v10853_v12 = vpop.f32.mrb[13].mxu1 }
 0x66d   : > { %v16881_v17 = vadd.f32 %v10853_v12, %v9825_v61 }
 0x66e   : > { %v10901_v60 = vsel %vm10856_vm5, %v16879_v10, -inf }
 0x66f   : > { %v10902_v25 = vmax.f32 %v10894_v14, %v10901_v60  ;;  %v10904_v27 = vsel %vm10903_vm6, %v16881_v17, -inf }
 0x670   : > { %v10905_v6 = vmax.f32 %v10896_v42, %v10904_v27 }
 0x672   : > { %v10906_v62 = vmax.f32 %v10902_v25, %v10905_v6 }
 0x674   : > { %v10908_v28 = vmax.f32 %v10906_v62, %v10907_v13 }
 0x676   : > { %10909 = vmax.xlane.f32.xlu0 %v10908_v28 }
 0x703   : > { %v16887_v16 = vpop.xlane.xlu0 %10909 }
 0x704   : > { %v10911_v61 = vsub.f32 %v16742_v30, %v16887_v16  ;;  %v10912_v1 = vsub.f32 %v16749_v36, %v16887_v16  ;;  %v10913_v29 = vsub.f32 %v16747_v35, %v16887_v16  ;;  %v10914_v2 = vsub.f32 %v16751_v38, %v16887_v16 }
 0x705   : > { %v10915_v33 = vsub.f32 %v16753_v39, %v16887_v16  ;;  %v10916_v44 = vsub.f32 %v16761_v37, %v16887_v16  ;;  %v10917_v30 = vsub.f32 %v16755_v40, %v16887_v16  ;;  %v10918_v35 = vsub.f32 %v16763_v45, %v16887_v16 }
 0x706   : > { %v10937_v41 = vmul.f32 1.442695, %v10911_v61  ;;  %v10939_v43 = vmul.f32 1.442695, %v10912_v1  ;;  %v10941_v4 = vmul.f32 1.442695, %v10913_v29  ;;  %v10919_v39 = vsub.f32 %v16771_v49, %v16887_v16 }
 0x707   : > { %v10943_v46 = vmul.f32 1.442695, %v10914_v2  ;;  %v10945_v36 = vmul.f32 1.442695, %v10915_v33  ;;  %v10947_v38 = vmul.f32 1.442695, %v10916_v44  ;;  %v10920_v37 = vsub.f32 %v16804_v20, %v16887_v16 }
 0x708   : > { %14383 = vpow2.f32 %v10937_v41  ;;  %v10949_v5 = vmul.f32 1.442695, %v10917_v30  ;;  %v10951_v7 = vmul.f32 1.442695, %v10918_v35  ;;  %v10921_v40 = vsub.f32 %v16801_v18, %v16887_v16 }
 0x709   : > { %14385 = vpow2.f32 %v10939_v43  ;;  %v10953_v47 = vmul.f32 1.442695, %v10919_v39  ;;  %v10922_v8 = vsub.f32 %v16809_v15, %v16887_v16  ;;  %v10955_v49 = vmul.f32 1.442695, %v10920_v37 }
 0x70a   : > { %14387 = vpow2.f32 %v10941_v4  ;;  %v10923_v52 = vsub.f32 %v16813_v24, %v16887_v16  ;;  %v10957_v53 = vmul.f32 1.442695, %v10921_v40  ;;  %v10924_v57 = vsub.f32 %v16819_v59, %v16887_v16 }
 0x70b   : > { %14389 = vpow2.f32 %v10943_v46  ;;  %v10959_v58 = vmul.f32 1.442695, %v10922_v8  ;;  %v10925_v24 = vsub.f32 %v16816_v23, %v16887_v16  ;;  %v10926_v59 = vsub.f32 %v16822_v26, %v16887_v16 }
 0x70c   : > { %14391 = vpow2.f32 %v10945_v36  ;;  %v10961_v21 = vmul.f32 1.442695, %v10923_v52  ;;  %v10963_v25 = vmul.f32 1.442695, %v10924_v57  ;;  %v10927_v23 = vsub.f32 %v16830_v63, %v16887_v16 }
 0x70d   : > { %14393 = vpow2.f32 %v10947_v38  ;;  %v10965_v13 = vmul.f32 1.442695, %v10925_v24  ;;  %v10928_v26 = vsub.f32 %v16838_v0, %v16887_v16  ;;  %v10967_v29 = vmul.f32 1.442695, %v10926_v59 }
 0x70e   : > { %14395 = vpow2.f32 %v10949_v5  ;;  %v10929_v63 = vsub.f32 %v16835_v19, %v16887_v16  ;;  %v10969_v43 = vmul.f32 1.442695, %v10927_v23  ;;  %v10930_v0 = vsub.f32 %v16841_v11, %v16887_v16 }
 0x70f   : > { %14397 = vpow2.f32 %v10951_v7  ;;  %v10971_v30 = vmul.f32 1.442695, %v10928_v26  ;;  %v10931_v19 = vsub.f32 %v16850_v31, %v16887_v16  ;;  %v10932_v11 = vsub.f32 %v16858_v3, %v16887_v16 }
 0x710   : > { %14399 = vpow2.f32 %v10953_v47  ;;  %v10973_v39 = vmul.f32 1.442695, %v10929_v63  ;;  %v10975_v40 = vmul.f32 1.442695, %v10930_v0  ;;  %v10933_v31 = vsub.f32 %v16855_v56, %v16887_v16 }
 0x711   : > { %14401 = vpow2.f32 %v10955_v49  ;;  %v10934_v3 = vsub.f32 %v16861_v32, %v16887_v16  ;;  %v10935_v56 = vsub.f32 %v16879_v10, %v16887_v16  ;;  %v10936_v32 = vsub.f32 %v16881_v17, %v16887_v16 }
 0x712   : > { %v16911_v48 = vpop.eup %14383  ;;  %14403 = vpow2.f32 %v10957_v53 }
 0x713   : > { %v16913_v45 = vpop.eup %14385  ;;  %v10989_v50 = vsel %vm10856_vm5, %v16911_v48, 0.0  ;;  %14405 = vpow2.f32 %v10959_v58  ;;  %v10985_v10 = vmul.f32 1.442695, %v10935_v56 }
 0x714   : > { %v16919_v20 = vpop.eup %14387  ;;  %v10990_v51 = vsel %vm10856_vm5, %v16913_v45, 0.0  ;;  %14407 = vpow2.f32 %v10961_v21 }
 0x715   : > { %v16923_v18 = vpop.eup %14389  ;;  %v10991_v54 = vadd.f32 %v10990_v51, %v10989_v50  ;;  %v10992_v15 = vsel %vm10856_vm5, %v16919_v20, 0.0  ;;  %14409 = vpow2.f32 %v10963_v25  ;;  %v10977_v50 = vmul.f32 1.442695, %v10931_v19 }
 0x716   : > { %v16929_v55 = vpop.eup %14391  ;;  %v10994_v12 = vsel %vm10856_vm5, %v16923_v18, 0.0  ;;  %14411 = vpow2.f32 %v10965_v13  ;;  %v10987_v13 = vmul.f32 1.442695, %v10936_v32 }
 0x717   : > { %v10993_v9 = vadd.f32 %v10992_v15, %v10991_v54  ;;  %v16935_v14 = vpop.eup %14393  ;;  %v10996_v22 = vsel %vm10856_vm5, %v16929_v55, 0.0  ;;  %14413 = vpow2.f32 %v10967_v29  ;;  %v10979_v54 = vmul.f32 1.442695, %v10932_v11 }
 0x718   : > { %v16941_v60 = vpop.eup %14395  ;;  %v10998_v6 = vsel %vm10856_vm5, %v16935_v14, 0.0  ;;  %14415 = vpow2.f32 %v10969_v43 }
 0x719   : > { %v10995_v42 = vadd.f32 %v10994_v12, %v10993_v9  ;;  %v16947_v62 = vpop.eup %14397  ;;  %v11000_v61 = vsel %vm10856_vm5, %v16941_v60, 0.0  ;;  %14417 = vpow2.f32 %v10971_v30  ;;  %v10981_v9 = vmul.f32 1.442695, %v10933_v31 }
 0x71a   : > { %v16953_v1 = vpop.eup %14399  ;;  %v11002_v33 = vsel %vm10856_vm5, %v16947_v62, 0.0  ;;  %14419 = vpow2.f32 %v10973_v39 }
 0x71b   : > { %v10997_v27 = vadd.f32 %v10996_v22, %v10995_v42  ;;  %v16959_v41 = vpop.eup %14401  ;;  %v11004_v4 = vsel %vm10856_vm5, %v16953_v1, 0.0  ;;  %14421 = vpow2.f32 %v10975_v40  ;;  %v10983_v42 = vmul.f32 1.442695, %v10934_v3 }
 0x71c   : > { %v16965_v46 = vpop.eup %14403  ;;  %v11006_v35 = vsel %vm10856_vm5, %v16959_v41, 0.0  ;;  %14423 = vpow2.f32 %v10977_v50 }
 0x71d   : > { %v10999_v28 = vadd.f32 %v10998_v6, %v10997_v27  ;;  %v16971_v38 = vpop.eup %14405  ;;  %v11008_v37 = vsel %vm10856_vm5, %v16965_v46, 0.0  ;;  %14425 = vpow2.f32 %v10979_v54 }
 0x71e   : > { %v16977_v7 = vpop.eup %14407  ;;  %v11010_v8 = vsel %vm10856_vm5, %v16971_v38, 0.0  ;;  %14427 = vpow2.f32 %v10981_v9 }
 0x71f   : > { %v11001_v2 = vadd.f32 %v11000_v61, %v10999_v28  ;;  %v16983_v49 = vpop.eup %14409  ;;  %v11012_v52 = vsel %vm10856_vm5, %v16977_v7, 0.0  ;;  %14429 = vpow2.f32 %v10983_v42 }
 0x720   : > { %v16989_v53 = vpop.eup %14411  ;;  %v11014_v57 = vsel %vm10856_vm5, %v16983_v49, 0.0  ;;  %14431 = vpow2.f32 %v10985_v10 }
 0x721   : > { %v11003_v44 = vadd.f32 %v11002_v33, %v11001_v2  ;;  %v16995_v58 = vpop.eup %14413  ;;  %v11016_v24 = vsel %vm10856_vm5, %v16989_v53, 0.0  ;;  %14433 = vpow2.f32 %v10987_v13 }
 0x722   : > { %v17001_v21 = vpop.eup %14415  ;;  %v11018_v59 = vsel %vm10856_vm5, %v16995_v58, 0.0 }
 0x723   : > { %v11005_v36 = vadd.f32 %v11004_v4, %v11003_v44  ;;  %v14418_v25 = vpop.eup %14417  ;;  %v11020_v6 = vsel %vm10856_vm5, %v17001_v21, 0.0 }
 0x724   : > { %v14420_v23 = vpop.eup %14419  ;;  %v11022_v61 = vsel %vm10856_vm5, %v14418_v25, 0.0 }
 0x725   : > { %v11007_v5 = vadd.f32 %v11006_v35, %v11005_v36  ;;  %v14422_v17 = vpop.eup %14421  ;;  %v11024_v26 = vsel %vm10856_vm5, %v14420_v23, 0.0 }
 0x726   : > { %v14424_v29 = vpop.eup %14423  ;;  %v11026_v33 = vsel %vm10856_vm5, %v14422_v17, 0.0 }
 0x727   : > { %v11009_v47 = vadd.f32 %v11008_v37, %v11007_v5  ;;  %v14426_v63 = vpop.eup %14425  ;;  %v11028_v44 = vsel %vm10856_vm5, %v14424_v29, 0.0 }
 0x728   : > { %v14428_v4 = vpop.eup %14427  ;;  %v11030_v30 = vsel %vm10856_vm5, %v14426_v63, 0.0 }
 0x729   : > { %v11011_v51 = vadd.f32 %v11010_v8, %v11009_v47  ;;  %v14430_v36 = vpop.eup %14429  ;;  %v11032_v19 = vsel %vm10856_vm5, %v14428_v4, 0.0 }
 0x72a   : > { %v14432_v39 = vpop.eup %14431  ;;  %v11034_v37 = vsel %vm10856_vm5, %v14430_v36, 0.0 }
 0x72b   : > { %v11013_v15 = vadd.f32 %v11012_v52, %v11011_v51  ;;  %v14434_v11 = vpop.eup %14433  ;;  %v11036_v47 = vsel %vm10856_vm5, %v14432_v39, 0.0  ;;  %v14480_v52 = vmov 1983009808  }
 0x72c   : > { %v11038_v31 = vsel %vm10903_vm6, %v14434_v11, 0.0  ;;  %v11098_v3 = vunpack.c.l.s4 %v14480_v52 }
 0x72d   : > { %v11015_v12 = vadd.f32 %v11014_v57, %v11013_v15 }
 0x72e   : > { %v11099_v54 = vunpack.c.0.s8 %v11098_v3 }
 0x72f   : > { %v11017_v22 = vadd.f32 %v11016_v24, %v11015_v12 }
 0x730   : > { %v11102_v57 = vsub.s32 %v11099_v54, %v14577_v34 }
 0x731   : > { %v11019_v27 = vadd.f32 %v11018_v59, %v11017_v22 }
 0x733   : > { %v11021_v28 = vadd.f32 %v11020_v6, %v11019_v27 }
 0x735   : > { %v11023_v16 = vadd.f32 %v11022_v61, %v11021_v28 }
 0x737   : > { %v11025_v2 = vadd.f32 %v11024_v26, %v11023_v16 }
 0x739   : > { %v11027_v43 = vadd.f32 %v11026_v33, %v11025_v2 }
 0x73b   : > { %v11029_v0 = vadd.f32 %v11028_v44, %v11027_v43 }
 0x73d   : > { %v11031_v35 = vadd.f32 %v11030_v30, %v11029_v0 }
 0x73f   : > { %v11033_v5 = vadd.f32 %v11032_v19, %v11031_v35 }
 0x741   : > { %v11035_v40 = vadd.f32 %v11034_v37, %v11033_v5 }
 0x743   : > { %v11037_v8 = vadd.f32 %v11036_v47, %v11035_v40 }
 0x745   : > { %v11039_v50 = vadd.f32 %v11038_v31, %v11037_v8 }
 0x747   : > { %11040 = vadd.xlane.f32.xlu0 %v11039_v50 }
 0x7d4   : > { %v11041_v51 = vpop.xlane.xlu0 %11040 }
 0x7d5   : > { %14435 = vrcp.f32 %v11041_v51 }
 0x7df   : > { %v14436_v15 = vpop.eup %14435 }
 0x7e0   : > { %v11043_v56 = vmul.f32 %v14436_v15, %v16911_v48  ;;  %v11044_v9 = vmul.f32 %v14436_v15, %v16913_v45  ;;  %v11045_v12 = vmul.f32 %v14436_v15, %v16919_v20  ;;  %v11046_v24 = vmul.f32 %v14436_v15, %v16923_v18 }
 0x7e1   : > { %v11047_v32 = vmul.f32 %v14436_v15, %v16929_v55  ;;  %v11048_v42 = vmul.f32 %v14436_v15, %v16935_v14  ;;  %v11049_v22 = vmul.f32 %v14436_v15, %v16941_v60  ;;  %v11050_v59 = vmul.f32 %v14436_v15, %v16947_v62 }
 0x7e2   : > { %v11051_v10 = vmul.f32 %v14436_v15, %v16953_v1  ;;  %v11052_v34 = vmul.f32 %v14436_v15, %v16959_v41  ;;  %v11053_v48 = vmul.f32 %v14436_v15, %v16965_v46  ;;  %v11054_v45 = vmul.f32 %v14436_v15, %v16971_v38 }
 0x7e3   : > { %v11055_v20 = vmul.f32 %v14436_v15, %v16977_v7  ;;  %v11056_v18 = vmul.f32 %v14436_v15, %v16983_v49  ;;  %v11057_v55 = vmul.f32 %v14436_v15, %v16989_v53  ;;  %v11058_v14 = vmul.f32 %v14436_v15, %v16995_v58 }
 0x7e4   : > { %v11059_v60 = vmul.f32 %v14436_v15, %v17001_v21  ;;  %v11060_v62 = vmul.f32 %v14436_v15, %v14418_v25  ;;  %v11061_v27 = vmul.f32 %v14436_v15, %v14420_v23  ;;  %v11062_v6 = vmul.f32 %v14436_v15, %v14422_v17 }
 0x7e5   : > { %v11063_v1 = vmul.f32 %v14436_v15, %v14424_v29  ;;  %v11064_v13 = vmul.f32 %v14436_v15, %v14426_v63  ;;  %v11065_v41 = vmul.f32 %v14436_v15, %v14428_v4  ;;  %v11066_v28 = vmul.f32 %v14436_v15, %v14430_v36 }
 0x7e6   : > { %v11067_v46 = vmul.f32 %v14436_v15, %v14432_v39  ;;  %v11068_v61 = vmul.f32 %v14436_v15, %v14434_v11  ;;  %v11095_v38 = vcombine.low %v11043_v56, %v11044_v9  ;;  %v11096_v16 = vcombine.low %v11045_v12, %v11046_v24 }
 0x7e7   : > { %v11112_v7 = vcombine.low %v11047_v32, %v11048_v42  ;;  %v11113_v26 = vcombine.low %v11049_v22, %v11050_v59  ;;  %v11129_v49 = vcombine.low %v11051_v10, %v11052_v34  ;;  %v11130_v2 = vcombine.low %v11053_v48, %v11054_v45 }
 0x7e8   : > { %v11103_v53 = vrot.slane %v11095_v38, %v11102_v57  ;;  %v11110_v33 = vrot.slane %v11096_v16, %v11102_v57  ;;  %v11146_v58 = vcombine.low %v11055_v20, %v11056_v18  ;;  %v11147_v43 = vcombine.low %v11057_v55, %v11058_v14 }
 0x7e9   : > { %v11120_v21 = vrot.slane %v11112_v7, %v11102_v57  ;;  %v11127_v25 = vrot.slane %v11113_v26, %v11102_v57  ;;  %v11137_v23 = vrot.slane %v11129_v49, %v11102_v57  ;;  %v11144_v17 = vrot.slane %v11130_v2, %v11102_v57 }
 0x7ea   : > { %v11111_v29 = vcombine.low %v11103_v53, %v11110_v33  ;;  %v11154_v63 = vrot.slane %v11146_v58, %v11102_v57  ;;  %v11161_v44 = vrot.slane %v11147_v43, %v11102_v57  ;;  %v11163_v4 = vcombine.low %v11059_v60, %v11060_v62 }
 0x7eb   : > { %v11128_v0 = vcombine.low %v11120_v21, %v11127_v25  ;;  %v11145_v30 = vcombine.low %v11137_v23, %v11144_v17  ;;  %v11164_v36 = vcombine.low %v11061_v27, %v11062_v6  ;;  %v11180_v35 = vcombine.low %v11063_v1, %v11064_v13 }
 0x7ec   : > { %v11162_v19 = vcombine.low %v11154_v63, %v11161_v44  ;;  %v11171_v39 = vrot.slane %v11163_v4, %v11102_v57  ;;  %v11181_v5 = vcombine.low %v11065_v41, %v11066_v28  ;;  %v11197_v37 = vcombine.low %v11067_v46, %v11068_v61  ;;  %11212 = vst [vmem:[#allocation3] sm:$0xff] %v11111_v29 }
 0x7ed   : > { %v11178_v11 = vrot.slane %v11164_v36, %v11102_v57  ;;  %v11188_v40 = vrot.slane %v11180_v35, %v11102_v57  ;;  %11213 = vst [vmem:[#allocation3 + $0x8] sm:$0xff] %v11128_v0  ;;  %11214 = vst [vmem:[#allocation3 + $0x10] sm:$0xff] %v11145_v30 }
 0x7ee   : > { %v11195_v47 = vrot.slane %v11181_v5, %v11102_v57  ;;  %v11204_v8 = vrot.slane %v11197_v37, %v11102_v57  ;;  %11215 = vst [vmem:[#allocation3 + $0x18] sm:$0xff] %v11162_v19 }
 0x7ef   : > { %v11179_v31 = vcombine.low %v11171_v39, %v11178_v11 }
 0x7f0   : > { %v11196_v50 = vcombine.low %v11188_v40, %v11195_v47  ;;  %11220 = vst.msk [vmem:[#allocation3 + $0x30] sm:$0xf] %vm11219_vm8, %v11204_v8 }
 0x7f1   : > { %11216 = vst [vmem:[#allocation3 + $0x20] sm:$0xff] %v11179_v31 }
 0x7f2   : > { %11217 = vst [vmem:[#allocation3 + $0x28] sm:$0xff] %v11196_v50 }
 0x7f3 PF: > { %p13570_p7 = scmp.eq.s32.totalorder %s14528_s25, 5  ;;  %s14481_s12 = smov [#allocation3]  }
 0x7f4   : > { %s11228_s13 = sshll.u32 %s14481_s12, 4  ;;  %s11229_s13 = int_to_ptr.vmem [resolvable:$true] %s11228_s13 }
 0x7f5   : > { %s14437_s14 = scalar_lea.vmem %s11229_s13, 832  ;;  %p14444_p11 = scmp.lt.s32.totalorder %s11229_s13, %s11229_s13 }
 0x7f6   : > { %p14438_p8 = scmp.ne.s32.totalorder %s11229_s13, %s14437_s14  ;;  %p14445_p12 = scmp.lt.s32.totalorder %s14437_s14, %s14437_s14 }
 0x7f8   : > { %p14439_p9 = pnand %p14438_p8, %p13570_p7  ;;  %p14446_p13 = por %p14445_p12, %p14444_p11 }
 0x7fa   : > { %p14440_p10 = pneg %p14439_p9 }
 0x7fc   : > { %p14447_p0 = pnand %p14446_p13, %p14440_p10 }
 0x7fe   : > { %14450 = shalt.err (!%p14447_p0)
}
 0x7ff   : > { %s14451_s17 = scalar_lea.hbm %s17071_s7, 832 }
 0x800   : > { %p14452_p1 = scmp.ne.s32.totalorder %s17071_s7, %s14451_s17  ;;  %p14457_p4 = scmp.lt.u32.totalorder %s14451_s17, %s17071_s7 }
 0x802   : > { %p14453_p2 = pnand %p14452_p1, %p13570_p7 }
 0x804   : > { %p14454_p3 = pneg %p14453_p2 }
 0x806   : > { %p14459_p5 = pnand %p14457_p4, %p14454_p3 }
 0x808   : > { %14462 = shalt.err (!%p14459_p5)
}
 0x809   : > { %13567 = dma.vmem_to_hbm [thread:$0]  (%p13570_p7), %s11229_s13, 832, %s17071_s7, [#allocation4]  }
 0x80a   : > { %14468 = dma.done.wait (%p13570_p7), [#allocation4], 832  }
 0x80b   : > { %14470 = vsyncadd (%p13570_p7), [#allocation4], 4294966464 }
 0x80c PF: > { %s18_s24 = sadd.s32 1, %s14473_s24  }
 0x80d   : > { %p15_p6 = scmp.ge.s32.totalorder %s18_s24, 8  }
 0x80f   :  { %17 = sbr.rel (!%p15_p6) target bundleno = 1 (0x1), region = 86 }
 0x816   :  { %11241 = vsyncpa [#allocation4], 1 }
 0x817   :  { %11243 = vsyncpa [#allocation4 + $0x1], 1 }

</bundles_post_ra>
